<compile_context>
chip_gen: v6e
topology: v6e:2x2x1
jax: 0.10.0
libtpu: 0.0.40
codegen_flags: <defaults>
</compile_context>

<pallas_src>
import numpy as np
import jax
import jax.numpy as jnp
from jax.experimental import pallas as pl
from jax.experimental.pallas import tpu as pltpu

# ----- module hyper-parameters (defaults of MelTransformer.__init__) -----
FILTER_LENGTH = 1024
HOP_LENGTH = 256
WIN_LENGTH = 1024
N_MEL_CHANNELS = 80
SAMPLING_RATE = 22050
MEL_FMIN = 0.0
MEL_FMAX = 8000.0
CUTOFF = FILTER_LENGTH // 2 + 1          # 513 real FFT bins
C_PAD = 640                              # 513 zero-padded to a multiple of 128
M_PAD = 128                              # 80 mel channels zero-padded to 128


# ------------------------ deterministic parameters ------------------------
def _hz_to_mel(freqs):
    freqs = np.atleast_1d(np.asarray(freqs, dtype=np.float64))
    f_min, f_sp = 0.0, 200.0 / 3
    mels = (freqs - f_min) / f_sp
    min_log_hz = 1000.0
    min_log_mel = (min_log_hz - f_min) / f_sp
    logstep = np.log(6.4) / 27.0
    log_t = freqs >= min_log_hz
    mels[log_t] = min_log_mel + np.log(freqs[log_t] / min_log_hz) / logstep
    return mels


def _mel_to_hz(mels):
    mels = np.atleast_1d(np.asarray(mels, dtype=np.float64))
    f_min, f_sp = 0.0, 200.0 / 3
    freqs = f_min + f_sp * mels
    min_log_hz = 1000.0
    min_log_mel = (min_log_hz - f_min) / f_sp
    logstep = np.log(6.4) / 27.0
    log_t = mels >= min_log_mel
    freqs[log_t] = min_log_hz * np.exp(logstep * (mels[log_t] - min_log_mel))
    return freqs


def librosa_mel_fn(sr, n_fft, n_mels, fmin, fmax):
    """Slaney-style mel filterbank (librosa.filters.mel, norm='slaney')."""
    fftfreqs = np.linspace(0.0, sr / 2.0, 1 + n_fft // 2)
    min_mel = _hz_to_mel(fmin)[0]
    max_mel = _hz_to_mel(fmax)[0]
    mel_f = _mel_to_hz(np.linspace(min_mel, max_mel, n_mels + 2))
    fdiff = np.diff(mel_f)
    ramps = mel_f[:, None] - fftfreqs[None, :]
    weights = np.zeros((n_mels, 1 + n_fft // 2), dtype=np.float64)
    for i in range(n_mels):
        lower = -ramps[i] / fdiff[i]
        upper = ramps[i + 2] / fdiff[i + 1]
        weights[i] = np.maximum(0.0, np.minimum(lower, upper))
    enorm = 2.0 / (mel_f[2:n_mels + 2] - mel_f[:n_mels])
    weights *= enorm[:, None]
    return weights.astype(np.float32)


def make_stft_forward_basis(filter_length, win_length):
    """Windowed Fourier basis (same as STFT.forward_basis in the torch code).
    Returns (filter_length, cutoff) real / imag matrices (transposed for frames@basis)."""
    assert filter_length >= win_length
    fourier_basis = np.fft.fft(np.eye(filter_length))
    real_b = np.real(fourier_basis[:CUTOFF, :])
    imag_b = np.imag(fourier_basis[:CUTOFF, :])
    # periodic ('fftbins=True') hann window; pad_center is a no-op (win == n_fft)
    n = np.arange(win_length)
    win = 0.5 - 0.5 * np.cos(2.0 * np.pi * n / win_length)
    real_b = (real_b * win[None, :]).astype(np.float32)
    imag_b = (imag_b * win[None, :]).astype(np.float32)
    return np.ascontiguousarray(real_b.T), np.ascontiguousarray(imag_b.T)


def build_mel_params():
    """Host-side parameter prep, zero-padded to lane-dense shapes, bf16 for the MXU.

    Returns:
      fourier_basis : (1024, 1280) bf16  = [real(513->640) | imag(513->640)]
      mel_basis_t   : (640, 128)   bf16  = mel_basis^T, cutoff 513->640, mels 80->128
    Padding is numerically exact: padded FFT-bin columns are zero (=> mag 0) and
    padded mel rows/columns are zero.
    """
    rb, ib = make_stft_forward_basis(FILTER_LENGTH, WIN_LENGTH)       # (1024, 513)
    melb = librosa_mel_fn(SAMPLING_RATE, FILTER_LENGTH, N_MEL_CHANNELS,
                          MEL_FMIN, MEL_FMAX)                         # (80, 513)
    rb_p = np.zeros((FILTER_LENGTH, C_PAD), np.float32); rb_p[:, :CUTOFF] = rb
    ib_p = np.zeros((FILTER_LENGTH, C_PAD), np.float32); ib_p[:, :CUTOFF] = ib
    fb = np.concatenate([rb_p, ib_p], axis=1)                         # (1024, 1280)
    mel_t = np.zeros((C_PAD, M_PAD), np.float32)
    mel_t[:CUTOFF, :N_MEL_CHANNELS] = melb.T
    return (jnp.asarray(fb, dtype=jnp.bfloat16),
            jnp.asarray(mel_t, dtype=jnp.bfloat16))


def _round_up(x, m):
    return ((x + m - 1) // m) * m


# ------------------------------ Pallas kernel ------------------------------
def _mel_kernel(frames_ref, fb_ref, melT_ref, out_ref):
    # frames_ref: (TF, 1024) bf16    [batch dim squeezed by BlockSpec]
    # fb_ref:     (1024, 1280) bf16  fused [real | imag] windowed Fourier basis
    # melT_ref:   (640, 128) bf16    zero-padded mel_basis^T
    # out_ref:    (TF, 128) f32      log-mel (lane-dense; mels 80..127 are junk)
    ri = jnp.dot(frames_ref[...], fb_ref[...],
                 preferred_element_type=jnp.float32)          # (TF, 1280) f32
    re = ri[:, :C_PAD]                                        # lane-aligned split
    im = ri[:, C_PAD:]
    mag = jnp.sqrt(re * re + im * im)                         # (TF, 640) f32
    mel = jnp.dot(mag.astype(jnp.bfloat16), melT_ref[...],
                  preferred_element_type=jnp.float32)         # (TF, 128) f32
    # nvidia spectral normalization: log(clamp(x, 1e-5))
    out_ref[...] = jnp.log(jnp.maximum(mel, 1e-5))


def _mel_pallas(frames, fourier_basis, mel_basis_t, tf):
    B, F_pad, N = frames.shape                # N = 1024
    C2 = fourier_basis.shape[1]               # 1280
    Mp = mel_basis_t.shape[1]                 # 128
    num_tiles = F_pad // tf

    flops = 2 * B * F_pad * N * C2 + 2 * B * F_pad * (C2 // 2) * Mp
    bytes_accessed = (frames.size * frames.dtype.itemsize
                      + fourier_basis.size * fourier_basis.dtype.itemsize
                      + mel_basis_t.size * mel_basis_t.dtype.itemsize
                      + B * F_pad * Mp * 4)
    transcendentals = B * F_pad * (C2 // 2 + Mp)   # sqrt + log

    return pl.pallas_call(
        _mel_kernel,
        out_shape=jax.ShapeDtypeStruct((B, F_pad, Mp), jnp.float32),
        grid_spec=pltpu.PrefetchScalarGridSpec(
            num_scalar_prefetch=0,
            grid=(B, num_tiles),
            in_specs=[
                pl.BlockSpec((None, tf, N), lambda b, f: (b, f, 0)),
                pl.BlockSpec((N, C2), lambda b, f: (0, 0)),
                pl.BlockSpec((C2 // 2, Mp), lambda b, f: (0, 0)),
            ],
            out_specs=pl.BlockSpec((None, tf, Mp), lambda b, f: (b, f, 0)),
        ),
        compiler_params=pltpu.CompilerParams(
            dimension_semantics=("parallel", "parallel"),
            vmem_limit_bytes=32 * 1024 * 1024),
        cost_estimate=pl.CostEstimate(
            flops=int(flops),
            transcendentals=int(transcendentals),
            bytes_accessed=int(bytes_accessed)),
    )(frames, fourier_basis, mel_basis_t)


# ------------------------------ forward glue -------------------------------
def mel_transformer_forward(y, fourier_basis, mel_basis_t,
                            normalization_const=32768.0):
    """y: (B, T) float32 waveform. Returns (B, n_mel, n_frames) (squeezed if B==1)."""
    y = y.astype(jnp.float32)
    needs_scale = jnp.logical_or(jnp.min(y) <= -1.0, jnp.max(y) >= 1.0)
    y_norm = jnp.where(needs_scale, y / normalization_const, y)

    pad = FILTER_LENGTH // 2
    padded = jnp.pad(y_norm, ((0, 0), (pad, pad)), mode="reflect")
    B, T_pad = padded.shape
    n_frames = (T_pad - FILTER_LENGTH) // HOP_LENGTH + 1

    # Gather-free framing: filter_length == 4 * hop_length, so each (1024,) frame
    # is the concat of 4 hop-shifted, lane-aligned (256,) chunks.
    assert FILTER_LENGTH % HOP_LENGTH == 0
    n_sub = FILTER_LENGTH // HOP_LENGTH
    padded_bf16 = padded.astype(jnp.bfloat16)
    parts = [
        padded_bf16[:, k * HOP_LENGTH: k * HOP_LENGTH + n_frames * HOP_LENGTH]
        .reshape(B, n_frames, HOP_LENGTH)
        for k in range(n_sub)
    ]
    frames = jnp.concatenate(parts, axis=2)          # (B, n_frames, 1024) bf16
    # TODO(synk): dedup the 4x framed HBM read traffic by DMAing overlapping
    # chunked-waveform tiles (TF+3, 256) inside the kernel instead of
    # materializing full frames in HBM.

    # Frame tile: biggest of 256, padded so the grid has no ragged last tile.
    tf = min(256, _round_up(n_frames, 8))
    f_pad = _round_up(n_frames, tf)
    if f_pad != n_frames:
        frames = jnp.pad(frames, ((0, 0), (0, f_pad - n_frames), (0, 0)))

    out = _mel_pallas(frames, fourier_basis, mel_basis_t, tf)   # (B, F_pad, 128)
    mel = out[:, :n_frames, :N_MEL_CHANNELS]                    # drop padding
    mel = jnp.transpose(mel, (0, 2, 1))                         # (B, 80, n_frames)
    if mel.shape[0] == 1:                                       # torch .squeeze(0)
        mel = mel[0]
    return mel


# ---------------------------------- main -----------------------------------
if __name__ == "__main__":
    fourier_basis, mel_basis_t = build_mel_params()   # (1024,1280) bf16, (640,128) bf16

    key = jax.random.PRNGKey(0)
    B, T = 2, 2048
    y = jax.random.uniform(key, (B, T), minval=-0.5, maxval=0.5,
                           dtype=jnp.float32)

    fwd = jax.jit(mel_transformer_forward)
    out = fwd(y, fourier_basis, mel_basis_t)
    out = jax.block_until_ready(out)

    expected_frames = T // HOP_LENGTH + 1
    assert out.shape == (B, N_MEL_CHANNELS, expected_frames), out.shape
    assert out.dtype == jnp.float32
    assert bool(jnp.all(jnp.isfinite(out)))
    print("KERNEL_OK")
</pallas_src>

<mosaic_0001>
module attributes {stable_mosaic.version = 11 : i64} {
  func.func @_mel_kernel(%arg0: i32, %arg1: i32, %arg2: memref<1x16x1024xbf16, #tpu.memory_space<vmem>>, %arg3: memref<1024x1280xbf16, #tpu.memory_space<vmem>>, %arg4: memref<640x128xbf16, #tpu.memory_space<vmem>>, %arg5: memref<1x16x128xf32, #tpu.memory_space<vmem>>) attributes {dimension_semantics = [#tpu.dimension_semantics<parallel>, #tpu.dimension_semantics<parallel>], iteration_bounds = array<i64: 2, 1>, scalar_prefetch = 0 : i64, scratch_operands = 0 : i64, tpu.core_type = #tpu.core_type<tc>, window_params = [{transform_indices = @transform_0, window_bounds = array<i64: 1, 16, 1024>}, {pipeline_mode = #tpu.pipeline_mode<synchronous>, transform_indices = @transform_1, window_bounds = array<i64: 1024, 1280>}, {pipeline_mode = #tpu.pipeline_mode<synchronous>, transform_indices = @transform_2, window_bounds = array<i64: 640, 128>}, {transform_indices = @transform_3, window_bounds = array<i64: 1, 16, 128>}]} {
    %c0 = arith.constant 0 : index
    %c0_0 = arith.constant 0 : index
    %c0_1 = arith.constant 0 : index
    %0 = vector.load %arg2[%c0, %c0_0, %c0_1] : memref<1x16x1024xbf16, #tpu.memory_space<vmem>>, vector<1x16x1024xbf16>
    %1 = vector.shape_cast %0 : vector<1x16x1024xbf16> to vector<16x1024xbf16>
    %c0_2 = arith.constant 0 : index
    %c0_3 = arith.constant 0 : index
    %2 = vector.load %arg3[%c0_2, %c0_3] : memref<1024x1280xbf16, #tpu.memory_space<vmem>>, vector<1024x1280xbf16>
    %cst = arith.constant dense<0.000000e+00> : vector<16x1280xf32>
    %3 = tpu.matmul %1, %2, %cst {dimension_numbers = #tpu.dot_dimension_numbers<[1], [0], [0], [1], [0, 0, 1, 1], [], []>} : vector<16x1024xbf16>, vector<1024x1280xbf16>, vector<16x1280xf32> -> vector<16x1280xf32>
    %4 = vector.extract_strided_slice %3 {offsets = [0, 0], sizes = [16, 640], strides = [1, 1]} : vector<16x1280xf32> to vector<16x640xf32>
    %5 = vector.extract_strided_slice %3 {offsets = [0, 640], sizes = [16, 640], strides = [1, 1]} : vector<16x1280xf32> to vector<16x640xf32>
    %6 = arith.mulf %4, %4 : vector<16x640xf32>
    %7 = arith.mulf %5, %5 : vector<16x640xf32>
    %8 = arith.addf %6, %7 : vector<16x640xf32>
    %9 = math.sqrt %8 : vector<16x640xf32>
    %10 = arith.truncf %9 : vector<16x640xf32> to vector<16x640xbf16>
    %c0_4 = arith.constant 0 : index
    %c0_5 = arith.constant 0 : index
    %11 = vector.load %arg4[%c0_4, %c0_5] : memref<640x128xbf16, #tpu.memory_space<vmem>>, vector<640x128xbf16>
    %cst_6 = arith.constant dense<0.000000e+00> : vector<16x128xf32>
    %12 = tpu.matmul %10, %11, %cst_6 {dimension_numbers = #tpu.dot_dimension_numbers<[1], [0], [0], [1], [0, 0, 1, 1], [], []>} : vector<16x640xbf16>, vector<640x128xbf16>, vector<16x128xf32> -> vector<16x128xf32>
    %cst_7 = arith.constant 9.99999974E-6 : f32
    %13 = vector.broadcast %cst_7 : f32 to vector<16x128xf32>
    %14 = arith.maximumf %12, %13 : vector<16x128xf32>
    %15 = math.log %14 : vector<16x128xf32>
    %c0_8 = arith.constant 0 : index
    %c0_9 = arith.constant 0 : index
    %c0_10 = arith.constant 0 : index
    %16 = vector.load %arg5[%c0_8, %c0_9, %c0_10] : memref<1x16x128xf32, #tpu.memory_space<vmem>>, vector<1x16x128xf32>
    %17 = vector.shape_cast %16 : vector<1x16x128xf32> to vector<16x128xf32>
    %18 = vector.shape_cast %15 : vector<16x128xf32> to vector<1x16x128xf32>
    tpu.vector_store %arg5[%c0_8, %c0_9, %c0_10], %18 {strides = array<i32>} : memref<1x16x128xf32, #tpu.memory_space<vmem>>, vector<1x16x128xf32>,
    return
  }
  func.func @transform_0(%arg0: i32, %arg1: i32) -> (i32, i32, i32) {
    %c0_i32 = arith.constant 0 : i32
    %c0_i32_0 = arith.constant 0 : i32
    return %arg0, %arg1, %c0_i32 : i32, i32, i32
  }
  func.func @transform_1(%arg0: i32, %arg1: i32) -> (i32, i32) {
    %c0_i32 = arith.constant 0 : i32
    %c0_i32_0 = arith.constant 0 : i32
    %c0_i32_1 = arith.constant 0 : i32
    return %c0_i32, %c0_i32_0 : i32, i32
  }
  func.func @transform_2(%arg0: i32, %arg1: i32) -> (i32, i32) {
    %c0_i32 = arith.constant 0 : i32
    %c0_i32_0 = arith.constant 0 : i32
    %c0_i32_1 = arith.constant 0 : i32
    return %c0_i32, %c0_i32_0 : i32, i32
  }
  func.func @transform_3(%arg0: i32, %arg1: i32) -> (i32, i32, i32) {
    %c0_i32 = arith.constant 0 : i32
    %c0_i32_0 = arith.constant 0 : i32
    return %arg0, %arg1, %c0_i32 : i32, i32, i32
  }
}

</mosaic_0001>

<bundles_post_ra>
// kernel: mel_transformer_forward.1
= control target key start
LH: loop header
LB: loop body
LE: loop exit
PB: predicated region body
PF: predicated region fallthrough
CT: control target
= control target key end

     0   :  { %8 = vsyncpa [#allocation3], 0  ;;  %s7965_s0 = inlined_call_operand.vmem [shape: bf16[2,16,1024], index: 0, kind: input, shape index: {}]   ;;  %s7966_s1 = inlined_call_operand.hbm [shape: bf16[1024,1280], index: 1, kind: input, shape index: {}]   ;;  %s7967_s2 = inlined_call_operand.hbm [shape: bf16[640,128], index: 2, kind: input, shape index: {}]   ;;  %s7968_s3 = inlined_call_operand.vmem [shape: f32[2,16,128], index: 3, kind: output, shape index: {}]  }
   0x1   :  { %9 = vsyncpa [#allocation5], 0  ;;  %s7625_s12 = smov 0   ;;  %s7627_s13 = smov 0  }
   0x2   :  { %s7629_s14 = smov 0  }
   0x3 LB: > { %s5660_s15 = sadd.s32 4294967295, %s7595_s14   ;;  %s27_s16 = sadd.s32 1, %s7591_s13  ;;  %s7595_s14 = sphi %s7629_s14, %s15_s14   ;;  %s7591_s13 = sphi %s7627_s13, %s7973_s13   ;;  %s7587_s12 = sphi %s7625_s12, %s7972_s12  }
   0x4   : > { %p29_p0 = scmp.ge.s32.totalorder %s27_s16, 2  ;;  %p5662_p1 = scmp.ge.s32.totalorder %s7595_s14, 1 }
   0x5   : > { %p130_p2 = scmp.lt.s32.totalorder %s7595_s14, 3  ;;  %p7650_p4 = scmp.eq.s32.totalorder %s5660_s15, 0 }
   0x6   : > { %s7975_s16 = smov (%p29_p0, %s27_s16), 0  ;;  %s7597_s19 = smov [#allocation2]  }
   0x7   : > { %p7646_p3 = pnand %p5662_p1, %p130_p2  ;;  %s142_s20 = sshll.u32 %s7597_s19, 4  ;;  %s143_s20 = int_to_ptr.vmem [resolvable:$true] %s142_s20 }
   0x8   : > { %s7598_s22 = smov [#allocation4]   ;;  %s7524_s24 = scalar_lea.vmem %s143_s20, 81920 }
   0x9   : > { %p6446_p5 = pneg %p7646_p3  ;;  %s155_s23 = sshll.u32 %s7598_s22, 4  ;;  %s156_s23 = int_to_ptr.vmem [resolvable:$true] %s155_s23 }
   0xa   : > { %p7525_p8 = scmp.ne.s32.totalorder %s143_s20, %s7524_s24  ;;  %p7532_p11 = scmp.lt.s32.totalorder %s143_s20, %s143_s20 }
   0xb   : > { %p7658_p6 = pnand %p7650_p4, %p6446_p5  ;;  %p7533_p12 = scmp.lt.s32.totalorder %s7524_s24, %s7524_s24 }
   0xd   : > { %p7515_p7 = pneg %p7658_p6  ;;  %p7534_p13 = por %p7533_p12, %p7532_p11 }
   0xf   : > { %p7527_p9 = pnand %p7525_p8, %p7515_p7 }
  0x11   : > { %p7528_p10 = pneg %p7527_p9 }
  0x13   : > { %p7535_p0 = pnand %p7534_p13, %p7528_p10 }
  0x15   : > { %7538 = shalt.err (!%p7535_p0)
}
  0x16   : > { %s7599_s25 = smov 640   ;;  %s7600_s26 = smov 40  }
  0x17   : > { %6449 = dma.hbm_to_vmem [thread:$0]  (!%p7658_p6), %s7966_s1, 81920, %s143_s20, [#allocation3], %s7599_s25, %s7599_s25, %s7600_s26  }
  0x18   : > { %s7550_s29 = scalar_lea.vmem %s156_s23, 5120  ;;  %p7558_p8 = scmp.lt.s32.totalorder %s156_s23, %s156_s23 }
  0x19   : > { %p7551_p1 = scmp.ne.s32.totalorder %s156_s23, %s7550_s29  ;;  %p7559_p9 = scmp.lt.s32.totalorder %s7550_s29, %s7550_s29 }
  0x1b   : > { %p7553_p2 = pnand %p7551_p1, %p7515_p7  ;;  %p7560_p11 = por %p7559_p9, %p7558_p8 }
  0x1d   : > { %p7554_p5 = pneg %p7553_p2 }
  0x1f   : > { %p7561_p10 = pnand %p7560_p11, %p7554_p5 }
  0x21   : > { %7564 = shalt.err (!%p7561_p10)
}
  0x22   : > { %s7601_s30 = smov 64   ;;  %s7602_s4 = smov 4  }
  0x23   : > { %6452 = dma.hbm_to_vmem [thread:$0]  (!%p7658_p6), %s7967_s2, 5120, %s156_s23, [#allocation5], %s7601_s30, %s7601_s30, %s7602_s4  }
  0x24   : > { %185 = sbr.rel (%p7646_p3) target bundleno = 1135 (0x46f), region = 32 }
  0x29   : > { %7578 = dma.done.wait (%p7650_p4), [#allocation3], 81920  }
  0x2a   : > { %7580 = vsyncadd (%p7650_p4), [#allocation3], 4294885376 }
  0x2b   : > { %7582 = dma.done.wait (%p7650_p4), [#allocation5], 5120  }
  0x2c   : > { %7584 = vsyncadd (%p7650_p4), [#allocation5], 4294962176  ;;  %v6489_v0 = vld [vmem:[#allocation2 + $0x234] ss:$40 sps:$4 sm:$0xff]   ;;  %v6493_v2 = vld [vmem:[#allocation2 + $0x230] ss:$40 sps:$4 sm:$0xff]  }
  0x2d   : > { %v6491_v1 = vld [vmem:[#allocation2 + $0x734] ss:$40 sps:$4 sm:$0xff]   ;;  %4132 = vmatprep.subr.bf16.mxu0 %v6489_v0  ;;  %v6494_v3 = vld [vmem:[#allocation2 + $0x730] ss:$40 sps:$4 sm:$0xff]   ;;  %v6495_v4 = vld [vmem:[#allocation2 + $0x1e4] ss:$40 sps:$4 sm:$0xff]  }
  0x2e   : > { %4175 = vmatprep.subr.bf16.mxu1 %v6491_v1  ;;  %4133 = vmatpush1.bf16.msra.mxu0 %v6493_v2  ;;  %v6497_v5 = vld [vmem:[#allocation2 + $0x6e4] ss:$40 sps:$4 sm:$0xff]   ;;  %v6499_v6 = vld [vmem:[#allocation2 + $0x1e0] ss:$40 sps:$4 sm:$0xff]   ;;  %v6501_v8 = vld [vmem:[#allocation2 + $0x194] ss:$40 sps:$4 sm:$0xff]  }
  0x2f   : > { %4176 = vmatpush1.bf16.msra.mxu1 %v6494_v3  ;;  %4134 = vmatprep.subr.bf16.mxu0 %v6495_v4  ;;  %v6500_v7 = vld [vmem:[#allocation2 + $0x6e0] ss:$40 sps:$4 sm:$0xff]   ;;  %v6503_v9 = vld [vmem:[#allocation2 + $0x694] ss:$40 sps:$4 sm:$0xff]   ;;  %v6505_v10 = vld [vmem:[#allocation2 + $0x190] ss:$40 sps:$4 sm:$0xff]  }
  0x30   : > { %4177 = vmatprep.subr.bf16.mxu1 %v6497_v5  ;;  %v6506_v11 = vld [vmem:[#allocation2 + $0x690] ss:$40 sps:$4 sm:$0xff]   ;;  %v6507_v12 = vld [vmem:[#allocation2 + $0x144] ss:$40 sps:$4 sm:$0xff]   ;;  %v6511_v14 = vld [vmem:[#allocation2 + $0x140] ss:$40 sps:$4 sm:$0xff]  }
  0x31   : > { %v6509_v13 = vld [vmem:[#allocation2 + $0x644] ss:$40 sps:$4 sm:$0xff]   ;;  %v6512_v15 = vld [vmem:[#allocation2 + $0x640] ss:$40 sps:$4 sm:$0xff]   ;;  %v6513_v16 = vld [vmem:[#allocation2 + $0xf4] ss:$40 sps:$4 sm:$0xff]  }
  0x32   : > { %4135 = vmatpush1.bf16.msra.mxu0 %v6499_v6  ;;  %v6515_v17 = vld [vmem:[#allocation2 + $0x5f4] ss:$40 sps:$4 sm:$0xff]   ;;  %v6517_v18 = vld [vmem:[#allocation2 + $0xf0] ss:$40 sps:$4 sm:$0xff]   ;;  %v6519_v20 = vld [vmem:[#allocation2 + $0xa4] ss:$40 sps:$4 sm:$0xff]  }
  0x33   : > { %4178 = vmatpush1.bf16.msra.mxu1 %v6500_v7  ;;  %4136 = vmatprep.subr.bf16.mxu0 %v6501_v8  ;;  %v6518_v19 = vld [vmem:[#allocation2 + $0x5f0] ss:$40 sps:$4 sm:$0xff]   ;;  %v6521_v21 = vld [vmem:[#allocation2 + $0x5a4] ss:$40 sps:$4 sm:$0xff]   ;;  %v6523_v22 = vld [vmem:[#allocation2 + $0xa0] ss:$40 sps:$4 sm:$0xff]  }
  0x34   : > { %4179 = vmatprep.subr.bf16.mxu1 %v6503_v9  ;;  %v6524_v23 = vld [vmem:[#allocation2 + $0x5a0] ss:$40 sps:$4 sm:$0xff]   ;;  %v6525_v24 = vld [vmem:[#allocation2 + $0x54] ss:$40 sps:$4 sm:$0xff]   ;;  %v6529_v26 = vld [vmem:[#allocation2 + $0x50] ss:$40 sps:$4 sm:$0xff]  }
  0x35   : > { %v6527_v25 = vld [vmem:[#allocation2 + $0x554] ss:$40 sps:$4 sm:$0xff]   ;;  %v6530_v27 = vld [vmem:[#allocation2 + $0x550] ss:$40 sps:$4 sm:$0xff]   ;;  %v6531_v28 = vld [vmem:[#allocation2 + $0x4] ss:$40 sps:$4 sm:$0xff]  }
  0x36   : > { %4137 = vmatpush1.bf16.msra.mxu0 %v6505_v10  ;;  %v6533_v29 = vld [vmem:[#allocation2 + $0x504] ss:$40 sps:$4 sm:$0xff]   ;;  %v6535_v30 = vld [vmem:[#allocation2] ss:$40 sps:$4 sm:$0xff]   ;;  %v6537_v32 = vld [vmem:[#allocation2 + $0x4b4] ss:$40 sps:$4 sm:$0xff]  }
  0x37   : > { %4180 = vmatpush1.bf16.msra.mxu1 %v6506_v11  ;;  %4138 = vmatprep.subr.bf16.mxu0 %v6507_v12  ;;  %v6536_v31 = vld [vmem:[#allocation2 + $0x500] ss:$40 sps:$4 sm:$0xff]   ;;  %p223_p3 = scmp.lt.s32.totalorder %s7587_s12, 1  ;;  %v6539_v33 = vld [vmem:[#allocation2 + $0x9b4] ss:$40 sps:$4 sm:$0xff]   ;;  %vm7604_vm12 = vmmov 0  }
  0x38   : > { %4181 = vmatprep.subr.bf16.mxu1 %v6509_v13  ;;  %v6541_v34 = vld [vmem:[#allocation2 + $0x4b0] ss:$40 sps:$4 sm:$0xff]   ;;  %v6543_v36 = vld [vmem:[#allocation2 + $0x464] ss:$40 sps:$4 sm:$0xff]   ;;  %v6547_v38 = vld [vmem:[#allocation2 + $0x460] ss:$40 sps:$4 sm:$0xff]  }
  0x39   : > { %v6542_v35 = vld [vmem:[#allocation2 + $0x9b0] ss:$40 sps:$4 sm:$0xff]   ;;  %s7977_s12 = smov (!%p223_p3, %s7587_s12), 1  ;;  %v6545_v37 = vld [vmem:[#allocation2 + $0x964] ss:$40 sps:$4 sm:$0xff]  }
  0x3a   : > { %4139 = vmatpush1.bf16.msra.mxu0 %v6511_v14  ;;  %v6548_v39 = vld [vmem:[#allocation2 + $0x960] ss:$40 sps:$4 sm:$0xff]   ;;  %v6549_v40 = vld [vmem:[#allocation2 + $0x414] ss:$40 sps:$4 sm:$0xff]   ;;  %s6363_s7 = sshll.u32 %s7977_s12, 6  ;;  %s6364_s11 = sshll.u32 %s7977_s12, 4 }
  0x3b   : > { %4182 = vmatpush1.bf16.msra.mxu1 %v6512_v15  ;;  %4140 = vmatprep.subr.bf16.mxu0 %v6513_v16  ;;  %v6551_v41 = vld [vmem:[#allocation2 + $0x914] ss:$40 sps:$4 sm:$0xff]   ;;  %v6553_v42 = vld [vmem:[#allocation2 + $0x410] ss:$40 sps:$4 sm:$0xff]   ;;  %s7698_s10 = scalar_lea.vmem %s7965_s0, %s6363_s7  ;;  %v6555_v44 = vld [vmem:[#allocation2 + $0x3c4] ss:$40 sps:$4 sm:$0xff]   ;;  %s241_s18 = scalar_lea.vmem %s7968_s3, %s6364_s11 }
  0x3c   : > { %4183 = vmatprep.subr.bf16.mxu1 %v6515_v17  ;;  %v6554_v43 = vld [vmem:[#allocation2 + $0x910] ss:$40 sps:$4 sm:$0xff]   ;;  %v6557_v45 = vld [vmem:[#allocation2 + $0x8c4] ss:$40 sps:$4 sm:$0xff]   ;;  %v6559_v46 = vld [vmem:[#allocation2 + $0x3c0] ss:$40 sps:$4 sm:$0xff]  }
  0x3d   : > { %v6560_v47 = vld [vmem:[#allocation2 + $0x8c0] ss:$40 sps:$4 sm:$0xff]   ;;  %v6561_v52 = vld [vmem:[#allocation2 + $0x374] ss:$40 sps:$4 sm:$0xff]   ;;  %v6565_v56 = vld [vmem:[#allocation2 + $0x370] ss:$40 sps:$4 sm:$0xff]  }
  0x3e   : > { %4141 = vmatpush1.bf16.msra.mxu0 %v6517_v18  ;;  %v244_v48 = vld [vmem:[%s7698_s10] sm:$0xff]  ;;  %v245_v50 = vld [vmem:[%s7698_s10 + $0x8] sm:$0xff]  ;;  %v6563_v55 = vld [vmem:[#allocation2 + $0x874] ss:$40 sps:$4 sm:$0xff]  }
  0x3f   : > { %4184 = vmatpush1.bf16.msra.mxu1 %v6518_v19  ;;  %4142 = vmatprep.subr.bf16.mxu0 %v6519_v20  ;;  %v248_v49 = vld [vmem:[%s7698_s10 + $0x20] sm:$0xff]  ;;  %v249_v51 = vld [vmem:[%s7698_s10 + $0x28] sm:$0xff]  ;;  %v6566_v57 = vld [vmem:[#allocation2 + $0x870] ss:$40 sps:$4 sm:$0xff]  }
  0x40   : > { %4185 = vmatprep.subr.bf16.mxu1 %v6521_v21  ;;  %v7704_v53 = vcombine.high %v244_v48, %v248_v49  ;;  %v7706_v54 = vcombine.high %v245_v50, %v249_v51  ;;  %v6567_v58 = vld [vmem:[#allocation2 + $0x324] ss:$40 sps:$4 sm:$0xff]   ;;  %v6571_v60 = vld [vmem:[#allocation2 + $0x320] ss:$40 sps:$4 sm:$0xff]   ;;  %v6573_v62 = vld [vmem:[#allocation2 + $0x2d4] ss:$40 sps:$4 sm:$0xff]   ;;  %v7710_v8 = vcombine.low %v244_v48, %v248_v49  ;;  %v7712_v9 = vcombine.low %v245_v50, %v249_v51 }
  0x41   : > { %v6569_v59 = vld [vmem:[#allocation2 + $0x824] ss:$40 sps:$4 sm:$0xff]   ;;  %v6572_v61 = vld [vmem:[#allocation2 + $0x820] ss:$40 sps:$4 sm:$0xff]   ;;  %v6575_v63 = vld [vmem:[#allocation2 + $0x7d4] ss:$40 sps:$4 sm:$0xff]  }
  0x42   : > { %4143 = vmatpush1.bf16.msra.mxu0 %v6523_v22  ;;  %4164 = vmatprep.mubr.bf16.mxu0 %v7704_v53  ;;  %v6577_v0 = vld [vmem:[#allocation2 + $0x2d0] ss:$40 sps:$4 sm:$0xff]   ;;  %v6579_v2 = vld [vmem:[#allocation2 + $0x284] ss:$40 sps:$4 sm:$0xff]   ;;  %v6583_v4 = vld [vmem:[#allocation2 + $0x280] ss:$40 sps:$4 sm:$0xff]  }
  0x43   : > { %4186 = vmatpush1.bf16.msra.mxu1 %v6524_v23  ;;  %4144 = vmatprep.subr.bf16.mxu0 %v6525_v24  ;;  %v6578_v1 = vld [vmem:[#allocation2 + $0x7d0] ss:$40 sps:$4 sm:$0xff]   ;;  %v6581_v3 = vld [vmem:[#allocation2 + $0x784] ss:$40 sps:$4 sm:$0xff]   ;;  %v6584_v5 = vld [vmem:[#allocation2 + $0x780] ss:$40 sps:$4 sm:$0xff]  }
  0x44   : > { %4187 = vmatprep.subr.bf16.mxu1 %v6527_v25  ;;  %4207 = vmatprep.mubr.bf16.mxu1 %v7706_v54  ;;  %v6587_v6 = vld [vmem:[#allocation2 + $0xc34] ss:$40 sps:$4 sm:$0xff]   ;;  %v6585_v10 = vld [vmem:[#allocation2 + $0xc30] ss:$40 sps:$4 sm:$0xff]   ;;  %v6593_v12 = vld [vmem:[#allocation2 + $0xbe4] ss:$40 sps:$4 sm:$0xff]  }
  0x45   : > { %v6590_v7 = vld [vmem:[#allocation2 + $0x1134] ss:$40 sps:$4 sm:$0xff]   ;;  %v6588_v11 = vld [vmem:[#allocation2 + $0x1130] ss:$40 sps:$4 sm:$0xff]   ;;  %v6596_v13 = vld [vmem:[#allocation2 + $0x10e4] ss:$40 sps:$4 sm:$0xff]  }
  0x46   : > { %4145 = vmatpush1.bf16.msra.mxu0 %v6529_v26  ;;  %v6591_v14 = vld [vmem:[#allocation2 + $0xbe0] ss:$40 sps:$4 sm:$0xff]   ;;  %v6599_v16 = vld [vmem:[#allocation2 + $0xb94] ss:$40 sps:$4 sm:$0xff]   ;;  %v6597_v18 = vld [vmem:[#allocation2 + $0xb90] ss:$40 sps:$4 sm:$0xff]  }
  0x47   : > { %4188 = vmatpush1.bf16.msra.mxu1 %v6530_v27  ;;  %4146 = vmatprep.subr.bf16.mxu0 %v6531_v28  ;;  %v6594_v15 = vld [vmem:[#allocation2 + $0x10e0] ss:$40 sps:$4 sm:$0xff]   ;;  %v6602_v17 = vld [vmem:[#allocation2 + $0x1094] ss:$40 sps:$4 sm:$0xff]   ;;  %v6600_v19 = vld [vmem:[#allocation2 + $0x1090] ss:$40 sps:$4 sm:$0xff]  }
  0x48   : > { %4189 = vmatprep.subr.bf16.mxu1 %v6533_v29  ;;  %v6605_v20 = vld [vmem:[#allocation2 + $0xb44] ss:$40 sps:$4 sm:$0xff]   ;;  %v6603_v22 = vld [vmem:[#allocation2 + $0xb40] ss:$40 sps:$4 sm:$0xff]   ;;  %v6611_v24 = vld [vmem:[#allocation2 + $0xaf4] ss:$40 sps:$4 sm:$0xff]  }
  0x49   : > { %v6608_v21 = vld [vmem:[#allocation2 + $0x1044] ss:$40 sps:$4 sm:$0xff]   ;;  %v6606_v23 = vld [vmem:[#allocation2 + $0x1040] ss:$40 sps:$4 sm:$0xff]   ;;  %v6614_v25 = vld [vmem:[#allocation2 + $0xff4] ss:$40 sps:$4 sm:$0xff]  }
  0x4a   : > { %4147 = vmatpush1.bf16.msra.mxu0 %v6535_v30  ;;  %v6609_v26 = vld [vmem:[#allocation2 + $0xaf0] ss:$40 sps:$4 sm:$0xff]   ;;  %v6617_v28 = vld [vmem:[#allocation2 + $0xaa4] ss:$40 sps:$4 sm:$0xff]   ;;  %v6615_v30 = vld [vmem:[#allocation2 + $0xaa0] ss:$40 sps:$4 sm:$0xff]  }
  0x4b   : > { %4190 = vmatpush1.bf16.msra.mxu1 %v6536_v31  ;;  %4148 = vmatprep.subr.bf16.mxu0 %v6537_v32  ;;  %v6612_v27 = vld [vmem:[#allocation2 + $0xff0] ss:$40 sps:$4 sm:$0xff]   ;;  %v6620_v29 = vld [vmem:[#allocation2 + $0xfa4] ss:$40 sps:$4 sm:$0xff]   ;;  %v6618_v31 = vld [vmem:[#allocation2 + $0xfa0] ss:$40 sps:$4 sm:$0xff]  }
  0x4c   : > { %4191 = vmatprep.subr.bf16.mxu1 %v6539_v33  ;;  %v6623_v32 = vld [vmem:[#allocation2 + $0xa54] ss:$40 sps:$4 sm:$0xff]   ;;  %v6633_v48 = vld [vmem:[#allocation2 + $0xeb0] ss:$40 sps:$4 sm:$0xff]   ;;  %v6641_v50 = vld [vmem:[#allocation2 + $0xe64] ss:$40 sps:$4 sm:$0xff]  }
  0x4d   : > { %v6626_v33 = vld [vmem:[#allocation2 + $0xf54] ss:$40 sps:$4 sm:$0xff]   ;;  %v6636_v49 = vld [vmem:[#allocation2 + $0x13b0] ss:$40 sps:$4 sm:$0xff]   ;;  %v6644_v51 = vld [vmem:[#allocation2 + $0x1364] ss:$40 sps:$4 sm:$0xff]  }
  0x4e   : > { %4149 = vmatpush2.bf16.msra.mxu0 %v6541_v34  ;;  %v6621_v34 = vld [vmem:[#allocation2 + $0xa50] ss:$40 sps:$4 sm:$0xff]  }
  0x4f   : > { %4192 = vmatpush2.bf16.msra.mxu1 %v6542_v35  ;;  %4150 = vmatprep.subr.bf16.mxu0 %v6543_v36  ;;  %v6624_v35 = vld [vmem:[#allocation2 + $0xf50] ss:$40 sps:$4 sm:$0xff]  }
  0x50   : > { %4193 = vmatprep.subr.bf16.mxu1 %v6545_v37  ;;  %v7717_v36 = vld [vmem:[%s7698_s10 + $0x10] sm:$0xff] }
  0x51   : > { %v7720_v37 = vld [vmem:[%s7698_s10 + $0x30] sm:$0xff] }
  0x52   : > { %4151 = vmatpush2.bf16.msra.mxu0 %v6547_v38  ;;  %v7723_v38 = vld [vmem:[%s7698_s10 + $0x18] sm:$0xff] }
  0x53   : > { %4194 = vmatpush2.bf16.msra.mxu1 %v6548_v39  ;;  %4152 = vmatprep.subr.bf16.mxu0 %v6549_v40  ;;  %v7726_v39 = vld [vmem:[%s7698_s10 + $0x38] sm:$0xff]  ;;  %v6629_v40 = vld [vmem:[#allocation2 + $0xa04] ss:$40 sps:$4 sm:$0xff]  }
  0x54   : > { %4195 = vmatprep.subr.bf16.mxu1 %v6551_v41  ;;  %v7730_v41 = vcombine.high %v7717_v36, %v7720_v37 }
  0x56   : > { %4153 = vmatpush2.bf16.msra.mxu0 %v6553_v42  ;;  %v7734_v42 = vcombine.high %v7723_v38, %v7726_v39 }
  0x57   : > { %4196 = vmatpush2.bf16.msra.mxu1 %v6554_v43  ;;  %4154 = vmatprep.subr.bf16.mxu0 %v6555_v44  ;;  %v6632_v43 = vld [vmem:[#allocation2 + $0xf04] ss:$40 sps:$4 sm:$0xff]   ;;  %v6627_v44 = vld [vmem:[#allocation2 + $0xa00] ss:$40 sps:$4 sm:$0xff]  }
  0x58   : > { %4197 = vmatprep.subr.bf16.mxu1 %v6557_v45  ;;  %v6630_v45 = vld [vmem:[#allocation2 + $0xf00] ss:$40 sps:$4 sm:$0xff]  }
  0x5a   : > { %4155 = vmatpush2.bf16.msra.mxu0 %v6559_v46  ;;  %v6635_v46 = vld [vmem:[#allocation2 + $0xeb4] ss:$40 sps:$4 sm:$0xff]  }
  0x5b   : > { %4198 = vmatpush2.bf16.msra.mxu1 %v6560_v47  ;;  %4156 = vmatprep.subr.bf16.mxu0 %v6561_v52  ;;  %v6638_v47 = vld [vmem:[#allocation2 + $0x13b4] ss:$40 sps:$4 sm:$0xff]   ;;  %v6639_v52 = vld [vmem:[#allocation2 + $0xe60] ss:$40 sps:$4 sm:$0xff]  }
  0x5c   : > { %4199 = vmatprep.subr.bf16.mxu1 %v6563_v55  ;;  %v6642_v55 = vld [vmem:[#allocation2 + $0x1360] ss:$40 sps:$4 sm:$0xff]  }
  0x5e   : > { %4157 = vmatpush2.bf16.msra.mxu0 %v6565_v56  ;;  %v6647_v56 = vld [vmem:[#allocation2 + $0xe14] ss:$40 sps:$4 sm:$0xff]  }
  0x5f   : > { %4200 = vmatpush2.bf16.msra.mxu1 %v6566_v57  ;;  %4158 = vmatprep.subr.bf16.mxu0 %v6567_v58  ;;  %v6650_v57 = vld [vmem:[#allocation2 + $0x1314] ss:$40 sps:$4 sm:$0xff]   ;;  %v6645_v58 = vld [vmem:[#allocation2 + $0xe10] ss:$40 sps:$4 sm:$0xff]  }
  0x60   : > { %4201 = vmatprep.subr.bf16.mxu1 %v6569_v59  ;;  %v6648_v59 = vld [vmem:[#allocation2 + $0x1310] ss:$40 sps:$4 sm:$0xff]  }
  0x62   : > { %4159 = vmatpush2.bf16.msra.mxu0 %v6571_v60  ;;  %v6653_v60 = vld [vmem:[#allocation2 + $0xdc4] ss:$40 sps:$4 sm:$0xff]  }
  0x63   : > { %4202 = vmatpush2.bf16.msra.mxu1 %v6572_v61  ;;  %4160 = vmatprep.subr.bf16.mxu0 %v6573_v62  ;;  %v6656_v61 = vld [vmem:[#allocation2 + $0x12c4] ss:$40 sps:$4 sm:$0xff]   ;;  %v6651_v62 = vld [vmem:[#allocation2 + $0xdc0] ss:$40 sps:$4 sm:$0xff]  }
  0x64   : > { %4203 = vmatprep.subr.bf16.mxu1 %v6575_v63  ;;  %v6654_v63 = vld [vmem:[#allocation2 + $0x12c0] ss:$40 sps:$4 sm:$0xff]  }
  0x66   : > { %4161 = vmatpush2.bf16.msra.mxu0 %v6577_v0  ;;  %v6659_v0 = vld [vmem:[#allocation2 + $0xd74] ss:$40 sps:$4 sm:$0xff]  }
  0x67   : > { %4204 = vmatpush2.bf16.msra.mxu1 %v6578_v1  ;;  %4162 = vmatprep.subr.bf16.mxu0 %v6579_v2  ;;  %v6662_v1 = vld [vmem:[#allocation2 + $0x1274] ss:$40 sps:$4 sm:$0xff]   ;;  %v6657_v2 = vld [vmem:[#allocation2 + $0xd70] ss:$40 sps:$4 sm:$0xff]  }
  0x68   : > { %4205 = vmatprep.subr.bf16.mxu1 %v6581_v3  ;;  %v6660_v3 = vld [vmem:[#allocation2 + $0x1270] ss:$40 sps:$4 sm:$0xff]  }
  0x6a   : > { %4163 = vmatpush2.bf16.msra.mxu0 %v6583_v4  ;;  %v6665_v4 = vld [vmem:[#allocation2 + $0xd24] ss:$40 sps:$4 sm:$0xff]  }
  0x6b   : > { %4206 = vmatpush2.bf16.msra.mxu1 %v6584_v5  ;;  %4218 = vmatprep.subr.bf16.mxu0 %v6587_v6  ;;  %v6668_v5 = vld [vmem:[#allocation2 + $0x1224] ss:$40 sps:$4 sm:$0xff]   ;;  %v6663_v6 = vld [vmem:[#allocation2 + $0xd20] ss:$40 sps:$4 sm:$0xff]  }
  0x6c   : > { %4261 = vmatprep.subr.bf16.mxu1 %v6590_v7  ;;  %v6666_v7 = vld [vmem:[#allocation2 + $0x1220] ss:$40 sps:$4 sm:$0xff]  }
  0x6d   : > { %4165 = vmatmul.mubr.bf16.vlgmr.msra.gmra.mxu0 %v7710_v8 }
  0x6e   : > { %4208 = vmatmul.mubr.bf16.vlgmr.msra.gmra.mxu1 %v7712_v9  ;;  %4219 = vmatpush1.bf16.msra.mxu0 %v6585_v10  ;;  %v6671_v10 = vld [vmem:[#allocation2 + $0xcd4] ss:$40 sps:$4 sm:$0xff]  }
  0x6f   : > { %4262 = vmatpush1.bf16.msra.mxu1 %v6588_v11  ;;  %4220 = vmatprep.subr.bf16.mxu0 %v6593_v12  ;;  %v6674_v11 = vld [vmem:[#allocation2 + $0x11d4] ss:$40 sps:$4 sm:$0xff]   ;;  %v6669_v12 = vld [vmem:[#allocation2 + $0xcd0] ss:$40 sps:$4 sm:$0xff]  }
  0x70   : > { %4263 = vmatprep.subr.bf16.mxu1 %v6596_v13  ;;  %4250 = vmatprep.mubr.bf16.mxu0 %v7730_v41  ;;  %v6672_v13 = vld [vmem:[#allocation2 + $0x11d0] ss:$40 sps:$4 sm:$0xff]  }
  0x71   : > { %4293 = vmatprep.mubr.bf16.mxu1 %v7734_v42 }
  0x72   : > { %4221 = vmatpush1.bf16.msra.mxu0 %v6591_v14  ;;  %v6677_v14 = vld [vmem:[#allocation2 + $0xc84] ss:$40 sps:$4 sm:$0xff]  }
  0x73   : > { %4264 = vmatpush1.bf16.msra.mxu1 %v6594_v15  ;;  %4222 = vmatprep.subr.bf16.mxu0 %v6599_v16  ;;  %v6680_v15 = vld [vmem:[#allocation2 + $0x1184] ss:$40 sps:$4 sm:$0xff]   ;;  %v6675_v16 = vld [vmem:[#allocation2 + $0xc80] ss:$40 sps:$4 sm:$0xff]  }
  0x74   : > { %4265 = vmatprep.subr.bf16.mxu1 %v6602_v17  ;;  %v6678_v17 = vld [vmem:[#allocation2 + $0x1180] ss:$40 sps:$4 sm:$0xff]  }
  0x76   : > { %4223 = vmatpush1.bf16.msra.mxu0 %v6597_v18  ;;  %v6683_v18 = vld [vmem:[#allocation2 + $0x23c] ss:$40 sps:$4 sm:$0xff]  }
  0x77   : > { %4266 = vmatpush1.bf16.msra.mxu1 %v6600_v19  ;;  %4224 = vmatprep.subr.bf16.mxu0 %v6605_v20  ;;  %v6686_v19 = vld [vmem:[#allocation2 + $0x73c] ss:$40 sps:$4 sm:$0xff]   ;;  %v7740_v20 = vcombine.low %v7717_v36, %v7720_v37 }
  0x78   : > { %4267 = vmatprep.subr.bf16.mxu1 %v6608_v21  ;;  %v7744_v21 = vcombine.low %v7723_v38, %v7726_v39  ;;  %v6707_v36 = vld [vmem:[#allocation2 + $0xfc] ss:$40 sps:$4 sm:$0xff]   ;;  %v6705_v38 = vld [vmem:[#allocation2 + $0xf8] ss:$40 sps:$4 sm:$0xff]  }
  0x79   : > { %v6710_v37 = vld [vmem:[#allocation2 + $0x5fc] ss:$40 sps:$4 sm:$0xff]   ;;  %v6708_v39 = vld [vmem:[#allocation2 + $0x5f8] ss:$40 sps:$4 sm:$0xff]  }
  0x7a   : > { %4225 = vmatpush1.bf16.msra.mxu0 %v6603_v22  ;;  %v6681_v22 = vld [vmem:[#allocation2 + $0x238] ss:$40 sps:$4 sm:$0xff]  }
  0x7b   : > { %4268 = vmatpush1.bf16.msra.mxu1 %v6606_v23  ;;  %4226 = vmatprep.subr.bf16.mxu0 %v6611_v24  ;;  %v6684_v23 = vld [vmem:[#allocation2 + $0x738] ss:$40 sps:$4 sm:$0xff]   ;;  %v6689_v24 = vld [vmem:[#allocation2 + $0x1ec] ss:$40 sps:$4 sm:$0xff]  }
  0x7c   : > { %4269 = vmatprep.subr.bf16.mxu1 %v6614_v25  ;;  %v6692_v25 = vld [vmem:[#allocation2 + $0x6ec] ss:$40 sps:$4 sm:$0xff]  }
  0x7e   : > { %4227 = vmatpush1.bf16.msra.mxu0 %v6609_v26  ;;  %v6687_v26 = vld [vmem:[#allocation2 + $0x1e8] ss:$40 sps:$4 sm:$0xff]  }
  0x7f   : > { %4270 = vmatpush1.bf16.msra.mxu1 %v6612_v27  ;;  %4228 = vmatprep.subr.bf16.mxu0 %v6617_v28  ;;  %v6690_v27 = vld [vmem:[#allocation2 + $0x6e8] ss:$40 sps:$4 sm:$0xff]   ;;  %v6695_v28 = vld [vmem:[#allocation2 + $0x19c] ss:$40 sps:$4 sm:$0xff]  }
  0x80   : > { %4271 = vmatprep.subr.bf16.mxu1 %v6620_v29  ;;  %v6698_v29 = vld [vmem:[#allocation2 + $0x69c] ss:$40 sps:$4 sm:$0xff]  }
  0x82   : > { %4229 = vmatpush1.bf16.msra.mxu0 %v6615_v30  ;;  %v6693_v30 = vld [vmem:[#allocation2 + $0x198] ss:$40 sps:$4 sm:$0xff]  }
  0x83   : > { %4272 = vmatpush1.bf16.msra.mxu1 %v6618_v31  ;;  %4230 = vmatprep.subr.bf16.mxu0 %v6623_v32  ;;  %v6696_v31 = vld [vmem:[#allocation2 + $0x698] ss:$40 sps:$4 sm:$0xff]   ;;  %v6701_v32 = vld [vmem:[#allocation2 + $0x14c] ss:$40 sps:$4 sm:$0xff]  }
  0x84   : > { %4273 = vmatprep.subr.bf16.mxu1 %v6626_v33  ;;  %v6704_v33 = vld [vmem:[#allocation2 + $0x64c] ss:$40 sps:$4 sm:$0xff]  }
  0x86   : > { %4231 = vmatpush1.bf16.msra.mxu0 %v6621_v34  ;;  %v6699_v34 = vld [vmem:[#allocation2 + $0x148] ss:$40 sps:$4 sm:$0xff]  }
  0x87   : > { %4274 = vmatpush1.bf16.msra.mxu1 %v6624_v35  ;;  %4232 = vmatprep.subr.bf16.mxu0 %v6629_v40  ;;  %v6702_v35 = vld [vmem:[#allocation2 + $0x648] ss:$40 sps:$4 sm:$0xff]   ;;  %v6713_v40 = vld [vmem:[#allocation2 + $0xac] ss:$40 sps:$4 sm:$0xff]  }
  0x88   : > { %4275 = vmatprep.subr.bf16.mxu1 %v6632_v43  ;;  %v6716_v43 = vld [vmem:[#allocation2 + $0x5ac] ss:$40 sps:$4 sm:$0xff]  }
  0x8a   : > { %4233 = vmatpush1.bf16.msra.mxu0 %v6627_v44  ;;  %v6711_v44 = vld [vmem:[#allocation2 + $0xa8] ss:$40 sps:$4 sm:$0xff]  }
  0x8b   : > { %4276 = vmatpush1.bf16.msra.mxu1 %v6630_v45  ;;  %4234 = vmatprep.subr.bf16.mxu0 %v6635_v46  ;;  %v6714_v45 = vld [vmem:[#allocation2 + $0x5a8] ss:$40 sps:$4 sm:$0xff]   ;;  %v6719_v46 = vld [vmem:[#allocation2 + $0x5c] ss:$40 sps:$4 sm:$0xff]  }
  0x8c   : > { %4277 = vmatprep.subr.bf16.mxu1 %v6638_v47  ;;  %v6722_v47 = vld [vmem:[#allocation2 + $0x55c] ss:$40 sps:$4 sm:$0xff]  }
  0x8e   : > { %4235 = vmatpush2.bf16.msra.mxu0 %v6633_v48  ;;  %v6717_v48 = vld [vmem:[#allocation2 + $0x58] ss:$40 sps:$4 sm:$0xff]  }
  0x8f   : > { %4278 = vmatpush2.bf16.msra.mxu1 %v6636_v49  ;;  %4236 = vmatprep.subr.bf16.mxu0 %v6641_v50  ;;  %v6720_v49 = vld [vmem:[#allocation2 + $0x558] ss:$40 sps:$4 sm:$0xff]   ;;  %v6725_v50 = vld [vmem:[#allocation2 + $0xc] ss:$40 sps:$4 sm:$0xff]  }
  0x90   : > { %4279 = vmatprep.subr.bf16.mxu1 %v6644_v51  ;;  %v6728_v51 = vld [vmem:[#allocation2 + $0x50c] ss:$40 sps:$4 sm:$0xff]  }
  0x92   : > { %4237 = vmatpush2.bf16.msra.mxu0 %v6639_v52  ;;  %v6723_v52 = vld [vmem:[#allocation2 + $0x8] ss:$40 sps:$4 sm:$0xff]  }
  0x93   : > { %4280 = vmatpush2.bf16.msra.mxu1 %v6642_v55  ;;  %4238 = vmatprep.subr.bf16.mxu0 %v6647_v56  ;;  %v6726_v55 = vld [vmem:[#allocation2 + $0x508] ss:$40 sps:$4 sm:$0xff]   ;;  %v6731_v56 = vld [vmem:[#allocation2 + $0x4bc] ss:$40 sps:$4 sm:$0xff]  }
  0x94   : > { %4281 = vmatprep.subr.bf16.mxu1 %v6650_v57  ;;  %v6734_v57 = vld [vmem:[#allocation2 + $0x9bc] ss:$40 sps:$4 sm:$0xff]  }
  0x96   : > { %4239 = vmatpush2.bf16.msra.mxu0 %v6645_v58  ;;  %v6729_v58 = vld [vmem:[#allocation2 + $0x4b8] ss:$40 sps:$4 sm:$0xff]  }
  0x97   : > { %4282 = vmatpush2.bf16.msra.mxu1 %v6648_v59  ;;  %4240 = vmatprep.subr.bf16.mxu0 %v6653_v60  ;;  %v6732_v59 = vld [vmem:[#allocation2 + $0x9b8] ss:$40 sps:$4 sm:$0xff]   ;;  %v6737_v60 = vld [vmem:[#allocation2 + $0x46c] ss:$40 sps:$4 sm:$0xff]  }
  0x98   : > { %4283 = vmatprep.subr.bf16.mxu1 %v6656_v61  ;;  %v6740_v61 = vld [vmem:[#allocation2 + $0x96c] ss:$40 sps:$4 sm:$0xff]  }
  0x9a   : > { %4241 = vmatpush2.bf16.msra.mxu0 %v6651_v62  ;;  %v6735_v62 = vld [vmem:[#allocation2 + $0x468] ss:$40 sps:$4 sm:$0xff]  }
  0x9b   : > { %4284 = vmatpush2.bf16.msra.mxu1 %v6654_v63  ;;  %4242 = vmatprep.subr.bf16.mxu0 %v6659_v0  ;;  %v6738_v63 = vld [vmem:[#allocation2 + $0x968] ss:$40 sps:$4 sm:$0xff]   ;;  %v6743_v0 = vld [vmem:[#allocation2 + $0x41c] ss:$40 sps:$4 sm:$0xff]  }
  0x9c   : > { %4285 = vmatprep.subr.bf16.mxu1 %v6662_v1  ;;  %v6746_v1 = vld [vmem:[#allocation2 + $0x91c] ss:$40 sps:$4 sm:$0xff]  }
  0x9e   : > { %4243 = vmatpush2.bf16.msra.mxu0 %v6657_v2  ;;  %v6741_v2 = vld [vmem:[#allocation2 + $0x418] ss:$40 sps:$4 sm:$0xff]  }
  0x9f   : > { %4286 = vmatpush2.bf16.msra.mxu1 %v6660_v3  ;;  %4244 = vmatprep.subr.bf16.mxu0 %v6665_v4  ;;  %v6744_v3 = vld [vmem:[#allocation2 + $0x918] ss:$40 sps:$4 sm:$0xff]   ;;  %v6749_v4 = vld [vmem:[#allocation2 + $0x3cc] ss:$40 sps:$4 sm:$0xff]  }
  0xa0   : > { %4287 = vmatprep.subr.bf16.mxu1 %v6668_v5  ;;  %v6752_v5 = vld [vmem:[#allocation2 + $0x8cc] ss:$40 sps:$4 sm:$0xff]  }
  0xa2   : > { %4245 = vmatpush2.bf16.msra.mxu0 %v6663_v6  ;;  %v6747_v6 = vld [vmem:[#allocation2 + $0x3c8] ss:$40 sps:$4 sm:$0xff]  }
  0xa3   : > { %4288 = vmatpush2.bf16.msra.mxu1 %v6666_v7  ;;  %4246 = vmatprep.subr.bf16.mxu0 %v6671_v10  ;;  %v6750_v7 = vld [vmem:[#allocation2 + $0x8c8] ss:$40 sps:$4 sm:$0xff]   ;;  %v6755_v10 = vld [vmem:[#allocation2 + $0x37c] ss:$40 sps:$4 sm:$0xff]  }
  0xa4   : > { %4289 = vmatprep.subr.bf16.mxu1 %v6674_v11  ;;  %v6758_v11 = vld [vmem:[#allocation2 + $0x87c] ss:$40 sps:$4 sm:$0xff]  }
  0xa6   : > { %4247 = vmatpush2.bf16.msra.mxu0 %v6669_v12  ;;  %v6753_v12 = vld [vmem:[#allocation2 + $0x378] ss:$40 sps:$4 sm:$0xff]  }
  0xa7   : > { %4290 = vmatpush2.bf16.msra.mxu1 %v6672_v13  ;;  %4248 = vmatprep.subr.bf16.mxu0 %v6677_v14  ;;  %v6756_v13 = vld [vmem:[#allocation2 + $0x878] ss:$40 sps:$4 sm:$0xff]   ;;  %v6761_v14 = vld [vmem:[#allocation2 + $0x32c] ss:$40 sps:$4 sm:$0xff]  }
  0xa8   : > { %4291 = vmatprep.subr.bf16.mxu1 %v6680_v15  ;;  %v6764_v15 = vld [vmem:[#allocation2 + $0x82c] ss:$40 sps:$4 sm:$0xff]  }
  0xaa   : > { %4249 = vmatpush2.bf16.msra.mxu0 %v6675_v16  ;;  %v6759_v16 = vld [vmem:[#allocation2 + $0x328] ss:$40 sps:$4 sm:$0xff]  }
  0xab   : > { %4292 = vmatpush2.bf16.msra.mxu1 %v6678_v17  ;;  %4304 = vmatprep.subr.bf16.mxu0 %v6683_v18  ;;  %v6762_v17 = vld [vmem:[#allocation2 + $0x828] ss:$40 sps:$4 sm:$0xff]   ;;  %v6767_v18 = vld [vmem:[#allocation2 + $0x2dc] ss:$40 sps:$4 sm:$0xff]  }
  0xac   : > { %4347 = vmatprep.subr.bf16.mxu1 %v6686_v19  ;;  %v6770_v19 = vld [vmem:[#allocation2 + $0x7dc] ss:$40 sps:$4 sm:$0xff]  }
  0xad   : > { %4251 = vmatmul.mubr.bf16.vlgmr.msra.gmra.mxu0 %v7740_v20 }
  0xae   : > { %4294 = vmatmul.mubr.bf16.vlgmr.msra.gmra.mxu1 %v7744_v21  ;;  %4305 = vmatpush1.bf16.msra.mxu0 %v6681_v22  ;;  %v6765_v22 = vld [vmem:[#allocation2 + $0x2d8] ss:$40 sps:$4 sm:$0xff]  }
  0xaf   : > { %4348 = vmatpush1.bf16.msra.mxu1 %v6684_v23  ;;  %4306 = vmatprep.subr.bf16.mxu0 %v6689_v24  ;;  %v6768_v23 = vld [vmem:[#allocation2 + $0x7d8] ss:$40 sps:$4 sm:$0xff]   ;;  %v6773_v24 = vld [vmem:[#allocation2 + $0x28c] ss:$40 sps:$4 sm:$0xff]  }
  0xb0   : > { %4349 = vmatprep.subr.bf16.mxu1 %v6692_v25  ;;  %4336 = vmatprep.mubr.bf16.mxu0 %v7704_v53  ;;  %v6776_v25 = vld [vmem:[#allocation2 + $0x78c] ss:$40 sps:$4 sm:$0xff]  }
  0xb1   : > { %4379 = vmatprep.mubr.bf16.mxu1 %v7706_v54 }
  0xb2   : > { %4307 = vmatpush1.bf16.msra.mxu0 %v6687_v26  ;;  %v6771_v26 = vld [vmem:[#allocation2 + $0x288] ss:$40 sps:$4 sm:$0xff]  }
  0xb3   : > { %4350 = vmatpush1.bf16.msra.mxu1 %v6690_v27  ;;  %4308 = vmatprep.subr.bf16.mxu0 %v6695_v28  ;;  %v6774_v27 = vld [vmem:[#allocation2 + $0x788] ss:$40 sps:$4 sm:$0xff]   ;;  %v6779_v28 = vld [vmem:[#allocation2 + $0xc3c] ss:$40 sps:$4 sm:$0xff]  }
  0xb4   : > { %4351 = vmatprep.subr.bf16.mxu1 %v6698_v29  ;;  %v6782_v29 = vld [vmem:[#allocation2 + $0x113c] ss:$40 sps:$4 sm:$0xff]  }
  0xb6   : > { %4309 = vmatpush1.bf16.msra.mxu0 %v6693_v30  ;;  %v6777_v30 = vld [vmem:[#allocation2 + $0xc38] ss:$40 sps:$4 sm:$0xff]  }
  0xb7   : > { %4352 = vmatpush1.bf16.msra.mxu1 %v6696_v31  ;;  %4310 = vmatprep.subr.bf16.mxu0 %v6701_v32  ;;  %v6780_v31 = vld [vmem:[#allocation2 + $0x1138] ss:$40 sps:$4 sm:$0xff]   ;;  %v6785_v32 = vld [vmem:[#allocation2 + $0xbec] ss:$40 sps:$4 sm:$0xff]  }
  0xb8   : > { %4353 = vmatprep.subr.bf16.mxu1 %v6704_v33  ;;  %v6788_v33 = vld [vmem:[#allocation2 + $0x10ec] ss:$40 sps:$4 sm:$0xff]  }
  0xba   : > { %4311 = vmatpush1.bf16.msra.mxu0 %v6699_v34  ;;  %v6783_v34 = vld [vmem:[#allocation2 + $0xbe8] ss:$40 sps:$4 sm:$0xff]  }
  0xbb   : > { %4354 = vmatpush1.bf16.msra.mxu1 %v6702_v35  ;;  %4312 = vmatprep.subr.bf16.mxu0 %v6707_v36  ;;  %v6786_v35 = vld [vmem:[#allocation2 + $0x10e8] ss:$40 sps:$4 sm:$0xff]   ;;  %v6791_v36 = vld [vmem:[#allocation2 + $0xb9c] ss:$40 sps:$4 sm:$0xff]  }
  0xbc   : > { %4355 = vmatprep.subr.bf16.mxu1 %v6710_v37  ;;  %v6794_v37 = vld [vmem:[#allocation2 + $0x109c] ss:$40 sps:$4 sm:$0xff]  }
  0xbe   : > { %4313 = vmatpush1.bf16.msra.mxu0 %v6705_v38  ;;  %v6789_v38 = vld [vmem:[#allocation2 + $0xb98] ss:$40 sps:$4 sm:$0xff]  }
  0xbf   : > { %4356 = vmatpush1.bf16.msra.mxu1 %v6708_v39  ;;  %4314 = vmatprep.subr.bf16.mxu0 %v6713_v40  ;;  %v6792_v39 = vld [vmem:[#allocation2 + $0x1098] ss:$40 sps:$4 sm:$0xff]   ;;  %v6797_v40 = vld [vmem:[#allocation2 + $0xb4c] ss:$40 sps:$4 sm:$0xff]  }
  0xc0   : > { %4357 = vmatprep.subr.bf16.mxu1 %v6716_v43  ;;  %v6800_v43 = vld [vmem:[#allocation2 + $0x104c] ss:$40 sps:$4 sm:$0xff]  }
  0xc2   : > { %4315 = vmatpush1.bf16.msra.mxu0 %v6711_v44  ;;  %v6795_v44 = vld [vmem:[#allocation2 + $0xb48] ss:$40 sps:$4 sm:$0xff]  }
  0xc3   : > { %4358 = vmatpush1.bf16.msra.mxu1 %v6714_v45  ;;  %4316 = vmatprep.subr.bf16.mxu0 %v6719_v46  ;;  %v6798_v45 = vld [vmem:[#allocation2 + $0x1048] ss:$40 sps:$4 sm:$0xff]   ;;  %v6803_v46 = vld [vmem:[#allocation2 + $0xafc] ss:$40 sps:$4 sm:$0xff]  }
  0xc4   : > { %4359 = vmatprep.subr.bf16.mxu1 %v6722_v47  ;;  %v6806_v47 = vld [vmem:[#allocation2 + $0xffc] ss:$40 sps:$4 sm:$0xff]  }
  0xc6   : > { %4317 = vmatpush1.bf16.msra.mxu0 %v6717_v48  ;;  %v6801_v48 = vld [vmem:[#allocation2 + $0xaf8] ss:$40 sps:$4 sm:$0xff]  }
  0xc7   : > { %4360 = vmatpush1.bf16.msra.mxu1 %v6720_v49  ;;  %4318 = vmatprep.subr.bf16.mxu0 %v6725_v50  ;;  %v6804_v49 = vld [vmem:[#allocation2 + $0xff8] ss:$40 sps:$4 sm:$0xff]   ;;  %v6809_v50 = vld [vmem:[#allocation2 + $0xaac] ss:$40 sps:$4 sm:$0xff]  }
  0xc8   : > { %4361 = vmatprep.subr.bf16.mxu1 %v6728_v51  ;;  %v6812_v51 = vld [vmem:[#allocation2 + $0xfac] ss:$40 sps:$4 sm:$0xff]  }
  0xca   : > { %4319 = vmatpush1.bf16.msra.mxu0 %v6723_v52  ;;  %v6807_v52 = vld [vmem:[#allocation2 + $0xaa8] ss:$40 sps:$4 sm:$0xff]  }
  0xcb   : > { %4362 = vmatpush1.bf16.msra.mxu1 %v6726_v55  ;;  %4320 = vmatprep.subr.bf16.mxu0 %v6731_v56  ;;  %v6810_v55 = vld [vmem:[#allocation2 + $0xfa8] ss:$40 sps:$4 sm:$0xff]   ;;  %v6815_v56 = vld [vmem:[#allocation2 + $0xa5c] ss:$40 sps:$4 sm:$0xff]  }
  0xcc   : > { %4363 = vmatprep.subr.bf16.mxu1 %v6734_v57  ;;  %v6818_v57 = vld [vmem:[#allocation2 + $0xf5c] ss:$40 sps:$4 sm:$0xff]  }
  0xce   : > { %4321 = vmatpush2.bf16.msra.mxu0 %v6729_v58  ;;  %v6813_v58 = vld [vmem:[#allocation2 + $0xa58] ss:$40 sps:$4 sm:$0xff]  }
  0xcf   : > { %4364 = vmatpush2.bf16.msra.mxu1 %v6732_v59  ;;  %4322 = vmatprep.subr.bf16.mxu0 %v6737_v60  ;;  %v6816_v59 = vld [vmem:[#allocation2 + $0xf58] ss:$40 sps:$4 sm:$0xff]   ;;  %v6821_v60 = vld [vmem:[#allocation2 + $0xa0c] ss:$40 sps:$4 sm:$0xff]  }
  0xd0   : > { %4365 = vmatprep.subr.bf16.mxu1 %v6740_v61  ;;  %v6824_v61 = vld [vmem:[#allocation2 + $0xf0c] ss:$40 sps:$4 sm:$0xff]  }
  0xd2   : > { %4323 = vmatpush2.bf16.msra.mxu0 %v6735_v62  ;;  %v6819_v62 = vld [vmem:[#allocation2 + $0xa08] ss:$40 sps:$4 sm:$0xff]  }
  0xd3   : > { %4366 = vmatpush2.bf16.msra.mxu1 %v6738_v63  ;;  %4324 = vmatprep.subr.bf16.mxu0 %v6743_v0  ;;  %v6822_v63 = vld [vmem:[#allocation2 + $0xf08] ss:$40 sps:$4 sm:$0xff]   ;;  %v6827_v0 = vld [vmem:[#allocation2 + $0xebc] ss:$40 sps:$4 sm:$0xff]  }
  0xd4   : > { %4367 = vmatprep.subr.bf16.mxu1 %v6746_v1  ;;  %v6830_v1 = vld [vmem:[#allocation2 + $0x13bc] ss:$40 sps:$4 sm:$0xff]  }
  0xd6   : > { %4325 = vmatpush2.bf16.msra.mxu0 %v6741_v2  ;;  %v6825_v2 = vld [vmem:[#allocation2 + $0xeb8] ss:$40 sps:$4 sm:$0xff]  }
  0xd7   : > { %4368 = vmatpush2.bf16.msra.mxu1 %v6744_v3  ;;  %4326 = vmatprep.subr.bf16.mxu0 %v6749_v4  ;;  %v6828_v3 = vld [vmem:[#allocation2 + $0x13b8] ss:$40 sps:$4 sm:$0xff]   ;;  %v6833_v4 = vld [vmem:[#allocation2 + $0xe6c] ss:$40 sps:$4 sm:$0xff]  }
  0xd8   : > { %4369 = vmatprep.subr.bf16.mxu1 %v6752_v5  ;;  %v6836_v5 = vld [vmem:[#allocation2 + $0x136c] ss:$40 sps:$4 sm:$0xff]  }
  0xda   : > { %4327 = vmatpush2.bf16.msra.mxu0 %v6747_v6  ;;  %v6831_v6 = vld [vmem:[#allocation2 + $0xe68] ss:$40 sps:$4 sm:$0xff]  }
  0xdb   : > { %4370 = vmatpush2.bf16.msra.mxu1 %v6750_v7  ;;  %4328 = vmatprep.subr.bf16.mxu0 %v6755_v10  ;;  %v6834_v7 = vld [vmem:[#allocation2 + $0x1368] ss:$40 sps:$4 sm:$0xff]   ;;  %v6839_v10 = vld [vmem:[#allocation2 + $0xe1c] ss:$40 sps:$4 sm:$0xff]  }
  0xdc   : > { %4371 = vmatprep.subr.bf16.mxu1 %v6758_v11  ;;  %v6842_v11 = vld [vmem:[#allocation2 + $0x131c] ss:$40 sps:$4 sm:$0xff]  }
  0xde   : > { %4329 = vmatpush2.bf16.msra.mxu0 %v6753_v12  ;;  %v6837_v12 = vld [vmem:[#allocation2 + $0xe18] ss:$40 sps:$4 sm:$0xff]  }
  0xdf   : > { %4372 = vmatpush2.bf16.msra.mxu1 %v6756_v13  ;;  %4330 = vmatprep.subr.bf16.mxu0 %v6761_v14  ;;  %v6840_v13 = vld [vmem:[#allocation2 + $0x1318] ss:$40 sps:$4 sm:$0xff]   ;;  %v6845_v14 = vld [vmem:[#allocation2 + $0xdcc] ss:$40 sps:$4 sm:$0xff]  }
  0xe0   : > { %4373 = vmatprep.subr.bf16.mxu1 %v6764_v15  ;;  %v6848_v15 = vld [vmem:[#allocation2 + $0x12cc] ss:$40 sps:$4 sm:$0xff]  }
  0xe2   : > { %4331 = vmatpush2.bf16.msra.mxu0 %v6759_v16  ;;  %v6843_v16 = vld [vmem:[#allocation2 + $0xdc8] ss:$40 sps:$4 sm:$0xff]  }
  0xe3   : > { %4374 = vmatpush2.bf16.msra.mxu1 %v6762_v17  ;;  %4332 = vmatprep.subr.bf16.mxu0 %v6767_v18  ;;  %v6846_v17 = vld [vmem:[#allocation2 + $0x12c8] ss:$40 sps:$4 sm:$0xff]   ;;  %v6851_v18 = vld [vmem:[#allocation2 + $0xd7c] ss:$40 sps:$4 sm:$0xff]  }
  0xe4   : > { %4375 = vmatprep.subr.bf16.mxu1 %v6770_v19  ;;  %v6854_v19 = vld [vmem:[#allocation2 + $0x127c] ss:$40 sps:$4 sm:$0xff]  }
  0xe6   : > { %4333 = vmatpush2.bf16.msra.mxu0 %v6765_v22  ;;  %v6849_v22 = vld [vmem:[#allocation2 + $0xd78] ss:$40 sps:$4 sm:$0xff]  }
  0xe7   : > { %4376 = vmatpush2.bf16.msra.mxu1 %v6768_v23  ;;  %4334 = vmatprep.subr.bf16.mxu0 %v6773_v24  ;;  %v6852_v23 = vld [vmem:[#allocation2 + $0x1278] ss:$40 sps:$4 sm:$0xff]   ;;  %v6857_v24 = vld [vmem:[#allocation2 + $0xd2c] ss:$40 sps:$4 sm:$0xff]  }
  0xe8   : > { %4377 = vmatprep.subr.bf16.mxu1 %v6776_v25  ;;  %v6860_v25 = vld [vmem:[#allocation2 + $0x122c] ss:$40 sps:$4 sm:$0xff]  }
  0xea   : > { %4335 = vmatpush2.bf16.msra.mxu0 %v6771_v26  ;;  %v6855_v26 = vld [vmem:[#allocation2 + $0xd28] ss:$40 sps:$4 sm:$0xff]  }
  0xeb   : > { %4378 = vmatpush2.bf16.msra.mxu1 %v6774_v27  ;;  %4390 = vmatprep.subr.bf16.mxu0 %v6779_v28  ;;  %v6858_v27 = vld [vmem:[#allocation2 + $0x1228] ss:$40 sps:$4 sm:$0xff]   ;;  %v6863_v28 = vld [vmem:[#allocation2 + $0xcdc] ss:$40 sps:$4 sm:$0xff]  }
  0xec   : > { %4433 = vmatprep.subr.bf16.mxu1 %v6782_v29  ;;  %v6866_v29 = vld [vmem:[#allocation2 + $0x11dc] ss:$40 sps:$4 sm:$0xff]  }
  0xed   : > { %4337 = vmatmul.mubr.bf16.vlgmr.msra.gmra.mxu0 %v7710_v8 }
  0xee   : > { %4380 = vmatmul.mubr.bf16.vlgmr.msra.gmra.mxu1 %v7712_v9  ;;  %4391 = vmatpush1.bf16.msra.mxu0 %v6777_v30  ;;  %v6861_v30 = vld [vmem:[#allocation2 + $0xcd8] ss:$40 sps:$4 sm:$0xff]  }
  0xef   : > { %4434 = vmatpush1.bf16.msra.mxu1 %v6780_v31  ;;  %4392 = vmatprep.subr.bf16.mxu0 %v6785_v32  ;;  %v6864_v31 = vld [vmem:[#allocation2 + $0x11d8] ss:$40 sps:$4 sm:$0xff]   ;;  %v6869_v32 = vld [vmem:[#allocation2 + $0xc8c] ss:$40 sps:$4 sm:$0xff]  }
  0xf0   : > { %4435 = vmatprep.subr.bf16.mxu1 %v6788_v33  ;;  %4422 = vmatprep.mubr.bf16.mxu0 %v7730_v41  ;;  %v6872_v33 = vld [vmem:[#allocation2 + $0x118c] ss:$40 sps:$4 sm:$0xff]  }
  0xf1   : > { %4465 = vmatprep.mubr.bf16.mxu1 %v7734_v42 }
  0xf2   : > { %4393 = vmatpush1.bf16.msra.mxu0 %v6783_v34  ;;  %v6867_v34 = vld [vmem:[#allocation2 + $0xc88] ss:$40 sps:$4 sm:$0xff]  }
  0xf3   : > { %4436 = vmatpush1.bf16.msra.mxu1 %v6786_v35  ;;  %4394 = vmatprep.subr.bf16.mxu0 %v6791_v36  ;;  %v6870_v35 = vld [vmem:[#allocation2 + $0x1188] ss:$40 sps:$4 sm:$0xff]   ;;  %v6875_v36 = vld [vmem:[#allocation2 + $0x244] ss:$40 sps:$4 sm:$0xff]  }
  0xf4   : > { %4437 = vmatprep.subr.bf16.mxu1 %v6794_v37  ;;  %v6878_v37 = vld [vmem:[#allocation2 + $0x744] ss:$40 sps:$4 sm:$0xff]  }
  0xf6   : > { %4395 = vmatpush1.bf16.msra.mxu0 %v6789_v38  ;;  %v6873_v38 = vld [vmem:[#allocation2 + $0x240] ss:$40 sps:$4 sm:$0xff]  }
  0xf7   : > { %4438 = vmatpush1.bf16.msra.mxu1 %v6792_v39  ;;  %4396 = vmatprep.subr.bf16.mxu0 %v6797_v40  ;;  %v6876_v39 = vld [vmem:[#allocation2 + $0x740] ss:$40 sps:$4 sm:$0xff]   ;;  %v6881_v40 = vld [vmem:[#allocation2 + $0x1f4] ss:$40 sps:$4 sm:$0xff]  }
  0xf8   : > { %4439 = vmatprep.subr.bf16.mxu1 %v6800_v43  ;;  %v6884_v43 = vld [vmem:[#allocation2 + $0x6f4] ss:$40 sps:$4 sm:$0xff]  }
  0xfa   : > { %4397 = vmatpush1.bf16.msra.mxu0 %v6795_v44  ;;  %v6879_v44 = vld [vmem:[#allocation2 + $0x1f0] ss:$40 sps:$4 sm:$0xff]  }
  0xfb   : > { %4440 = vmatpush1.bf16.msra.mxu1 %v6798_v45  ;;  %4398 = vmatprep.subr.bf16.mxu0 %v6803_v46  ;;  %v6882_v45 = vld [vmem:[#allocation2 + $0x6f0] ss:$40 sps:$4 sm:$0xff]   ;;  %v6887_v46 = vld [vmem:[#allocation2 + $0x1a4] ss:$40 sps:$4 sm:$0xff]  }
  0xfc   : > { %4441 = vmatprep.subr.bf16.mxu1 %v6806_v47  ;;  %v6890_v47 = vld [vmem:[#allocation2 + $0x6a4] ss:$40 sps:$4 sm:$0xff]  }
  0xfe   : > { %4399 = vmatpush1.bf16.msra.mxu0 %v6801_v48  ;;  %v6885_v48 = vld [vmem:[#allocation2 + $0x1a0] ss:$40 sps:$4 sm:$0xff]  }
  0xff   : > { %4442 = vmatpush1.bf16.msra.mxu1 %v6804_v49  ;;  %4400 = vmatprep.subr.bf16.mxu0 %v6809_v50  ;;  %v6888_v49 = vld [vmem:[#allocation2 + $0x6a0] ss:$40 sps:$4 sm:$0xff]   ;;  %v6893_v50 = vld [vmem:[#allocation2 + $0x154] ss:$40 sps:$4 sm:$0xff]  }
 0x100   : > { %4443 = vmatprep.subr.bf16.mxu1 %v6812_v51  ;;  %v6896_v51 = vld [vmem:[#allocation2 + $0x654] ss:$40 sps:$4 sm:$0xff]  }
 0x102   : > { %4401 = vmatpush1.bf16.msra.mxu0 %v6807_v52  ;;  %v6891_v52 = vld [vmem:[#allocation2 + $0x150] ss:$40 sps:$4 sm:$0xff]  }
 0x103   : > { %4444 = vmatpush1.bf16.msra.mxu1 %v6810_v55  ;;  %4402 = vmatprep.subr.bf16.mxu0 %v6815_v56  ;;  %v6894_v55 = vld [vmem:[#allocation2 + $0x650] ss:$40 sps:$4 sm:$0xff]   ;;  %v6899_v56 = vld [vmem:[#allocation2 + $0x104] ss:$40 sps:$4 sm:$0xff]  }
 0x104   : > { %4445 = vmatprep.subr.bf16.mxu1 %v6818_v57  ;;  %v6902_v57 = vld [vmem:[#allocation2 + $0x604] ss:$40 sps:$4 sm:$0xff]  }
 0x106   : > { %4403 = vmatpush1.bf16.msra.mxu0 %v6813_v58  ;;  %v6897_v58 = vld [vmem:[#allocation2 + $0x100] ss:$40 sps:$4 sm:$0xff]  }
 0x107   : > { %4446 = vmatpush1.bf16.msra.mxu1 %v6816_v59  ;;  %4404 = vmatprep.subr.bf16.mxu0 %v6821_v60  ;;  %v6900_v59 = vld [vmem:[#allocation2 + $0x600] ss:$40 sps:$4 sm:$0xff]   ;;  %v6905_v60 = vld [vmem:[#allocation2 + $0xb4] ss:$40 sps:$4 sm:$0xff]  }
 0x108   : > { %4447 = vmatprep.subr.bf16.mxu1 %v6824_v61  ;;  %v6908_v61 = vld [vmem:[#allocation2 + $0x5b4] ss:$40 sps:$4 sm:$0xff]  }
 0x10a   : > { %4405 = vmatpush1.bf16.msra.mxu0 %v6819_v62  ;;  %v6903_v62 = vld [vmem:[#allocation2 + $0xb0] ss:$40 sps:$4 sm:$0xff]  }
 0x10b   : > { %4448 = vmatpush1.bf16.msra.mxu1 %v6822_v63  ;;  %4406 = vmatprep.subr.bf16.mxu0 %v6827_v0  ;;  %v6906_v63 = vld [vmem:[#allocation2 + $0x5b0] ss:$40 sps:$4 sm:$0xff]   ;;  %v6911_v0 = vld [vmem:[#allocation2 + $0x64] ss:$40 sps:$4 sm:$0xff]  }
 0x10c   : > { %4449 = vmatprep.subr.bf16.mxu1 %v6830_v1  ;;  %v6914_v1 = vld [vmem:[#allocation2 + $0x564] ss:$40 sps:$4 sm:$0xff]  }
 0x10e   : > { %4407 = vmatpush2.bf16.msra.mxu0 %v6825_v2  ;;  %v6909_v2 = vld [vmem:[#allocation2 + $0x60] ss:$40 sps:$4 sm:$0xff]  }
 0x10f   : > { %4450 = vmatpush2.bf16.msra.mxu1 %v6828_v3  ;;  %4408 = vmatprep.subr.bf16.mxu0 %v6833_v4  ;;  %v6912_v3 = vld [vmem:[#allocation2 + $0x560] ss:$40 sps:$4 sm:$0xff]   ;;  %v6917_v4 = vld [vmem:[#allocation2 + $0x14] ss:$40 sps:$4 sm:$0xff]  }
 0x110   : > { %4451 = vmatprep.subr.bf16.mxu1 %v6836_v5  ;;  %v6920_v5 = vld [vmem:[#allocation2 + $0x514] ss:$40 sps:$4 sm:$0xff]  }
 0x112   : > { %4409 = vmatpush2.bf16.msra.mxu0 %v6831_v6  ;;  %v6915_v6 = vld [vmem:[#allocation2 + $0x10] ss:$40 sps:$4 sm:$0xff]  }
 0x113   : > { %4452 = vmatpush2.bf16.msra.mxu1 %v6834_v7  ;;  %4410 = vmatprep.subr.bf16.mxu0 %v6839_v10  ;;  %v6918_v7 = vld [vmem:[#allocation2 + $0x510] ss:$40 sps:$4 sm:$0xff]   ;;  %v6923_v10 = vld [vmem:[#allocation2 + $0x4c4] ss:$40 sps:$4 sm:$0xff]  }
 0x114   : > { %4453 = vmatprep.subr.bf16.mxu1 %v6842_v11  ;;  %v6926_v11 = vld [vmem:[#allocation2 + $0x9c4] ss:$40 sps:$4 sm:$0xff]  }
 0x116   : > { %4411 = vmatpush2.bf16.msra.mxu0 %v6837_v12  ;;  %v6921_v12 = vld [vmem:[#allocation2 + $0x4c0] ss:$40 sps:$4 sm:$0xff]  }
 0x117   : > { %4454 = vmatpush2.bf16.msra.mxu1 %v6840_v13  ;;  %4412 = vmatprep.subr.bf16.mxu0 %v6845_v14  ;;  %v6924_v13 = vld [vmem:[#allocation2 + $0x9c0] ss:$40 sps:$4 sm:$0xff]   ;;  %v6929_v14 = vld [vmem:[#allocation2 + $0x474] ss:$40 sps:$4 sm:$0xff]  }
 0x118   : > { %4455 = vmatprep.subr.bf16.mxu1 %v6848_v15  ;;  %v6932_v15 = vld [vmem:[#allocation2 + $0x974] ss:$40 sps:$4 sm:$0xff]  }
 0x11a   : > { %4413 = vmatpush2.bf16.msra.mxu0 %v6843_v16  ;;  %v6927_v16 = vld [vmem:[#allocation2 + $0x470] ss:$40 sps:$4 sm:$0xff]  }
 0x11b   : > { %4456 = vmatpush2.bf16.msra.mxu1 %v6846_v17  ;;  %4414 = vmatprep.subr.bf16.mxu0 %v6851_v18  ;;  %v6930_v17 = vld [vmem:[#allocation2 + $0x970] ss:$40 sps:$4 sm:$0xff]   ;;  %v6935_v18 = vld [vmem:[#allocation2 + $0x424] ss:$40 sps:$4 sm:$0xff]  }
 0x11c   : > { %4457 = vmatprep.subr.bf16.mxu1 %v6854_v19  ;;  %v6938_v19 = vld [vmem:[#allocation2 + $0x924] ss:$40 sps:$4 sm:$0xff]  }
 0x11e   : > { %4415 = vmatpush2.bf16.msra.mxu0 %v6849_v22  ;;  %v6933_v22 = vld [vmem:[#allocation2 + $0x420] ss:$40 sps:$4 sm:$0xff]  }
 0x11f   : > { %4458 = vmatpush2.bf16.msra.mxu1 %v6852_v23  ;;  %4416 = vmatprep.subr.bf16.mxu0 %v6857_v24  ;;  %v6936_v23 = vld [vmem:[#allocation2 + $0x920] ss:$40 sps:$4 sm:$0xff]   ;;  %v6941_v24 = vld [vmem:[#allocation2 + $0x3d4] ss:$40 sps:$4 sm:$0xff]  }
 0x120   : > { %4459 = vmatprep.subr.bf16.mxu1 %v6860_v25  ;;  %v6944_v25 = vld [vmem:[#allocation2 + $0x8d4] ss:$40 sps:$4 sm:$0xff]  }
 0x122   : > { %4417 = vmatpush2.bf16.msra.mxu0 %v6855_v26  ;;  %v6939_v26 = vld [vmem:[#allocation2 + $0x3d0] ss:$40 sps:$4 sm:$0xff]  }
 0x123   : > { %4460 = vmatpush2.bf16.msra.mxu1 %v6858_v27  ;;  %4418 = vmatprep.subr.bf16.mxu0 %v6863_v28  ;;  %v6942_v27 = vld [vmem:[#allocation2 + $0x8d0] ss:$40 sps:$4 sm:$0xff]   ;;  %v6947_v28 = vld [vmem:[#allocation2 + $0x384] ss:$40 sps:$4 sm:$0xff]  }
 0x124   : > { %4461 = vmatprep.subr.bf16.mxu1 %v6866_v29  ;;  %v6950_v29 = vld [vmem:[#allocation2 + $0x884] ss:$40 sps:$4 sm:$0xff]  }
 0x126   : > { %4419 = vmatpush2.bf16.msra.mxu0 %v6861_v30  ;;  %v6945_v30 = vld [vmem:[#allocation2 + $0x380] ss:$40 sps:$4 sm:$0xff]  }
 0x127   : > { %4462 = vmatpush2.bf16.msra.mxu1 %v6864_v31  ;;  %4420 = vmatprep.subr.bf16.mxu0 %v6869_v32  ;;  %v6948_v31 = vld [vmem:[#allocation2 + $0x880] ss:$40 sps:$4 sm:$0xff]   ;;  %v6953_v32 = vld [vmem:[#allocation2 + $0x334] ss:$40 sps:$4 sm:$0xff]  }
 0x128   : > { %4463 = vmatprep.subr.bf16.mxu1 %v6872_v33  ;;  %v6956_v33 = vld [vmem:[#allocation2 + $0x834] ss:$40 sps:$4 sm:$0xff]  }
 0x12a   : > { %4421 = vmatpush2.bf16.msra.mxu0 %v6867_v34  ;;  %v6951_v34 = vld [vmem:[#allocation2 + $0x330] ss:$40 sps:$4 sm:$0xff]  }
 0x12b   : > { %4464 = vmatpush2.bf16.msra.mxu1 %v6870_v35  ;;  %4476 = vmatprep.subr.bf16.mxu0 %v6875_v36  ;;  %v6954_v35 = vld [vmem:[#allocation2 + $0x830] ss:$40 sps:$4 sm:$0xff]   ;;  %v6959_v36 = vld [vmem:[#allocation2 + $0x2e4] ss:$40 sps:$4 sm:$0xff]  }
 0x12c   : > { %4519 = vmatprep.subr.bf16.mxu1 %v6878_v37  ;;  %v6962_v37 = vld [vmem:[#allocation2 + $0x7e4] ss:$40 sps:$4 sm:$0xff]  }
 0x12d   : > { %4423 = vmatmul.mubr.bf16.vlgmr.msra.gmra.mxu0 %v7740_v20 }
 0x12e   : > { %4466 = vmatmul.mubr.bf16.vlgmr.msra.gmra.mxu1 %v7744_v21  ;;  %4477 = vmatpush1.bf16.msra.mxu0 %v6873_v38  ;;  %v6957_v38 = vld [vmem:[#allocation2 + $0x2e0] ss:$40 sps:$4 sm:$0xff]  }
 0x12f   : > { %4520 = vmatpush1.bf16.msra.mxu1 %v6876_v39  ;;  %4478 = vmatprep.subr.bf16.mxu0 %v6881_v40  ;;  %v6960_v39 = vld [vmem:[#allocation2 + $0x7e0] ss:$40 sps:$4 sm:$0xff]   ;;  %v6965_v40 = vld [vmem:[#allocation2 + $0x294] ss:$40 sps:$4 sm:$0xff]  }
 0x130   : > { %4521 = vmatprep.subr.bf16.mxu1 %v6884_v43  ;;  %4508 = vmatprep.mubr.bf16.mxu0 %v7704_v53  ;;  %v6968_v43 = vld [vmem:[#allocation2 + $0x794] ss:$40 sps:$4 sm:$0xff]  }
 0x131   : > { %4551 = vmatprep.mubr.bf16.mxu1 %v7706_v54 }
 0x132   : > { %4479 = vmatpush1.bf16.msra.mxu0 %v6879_v44  ;;  %v6963_v44 = vld [vmem:[#allocation2 + $0x290] ss:$40 sps:$4 sm:$0xff]  }
 0x133   : > { %4522 = vmatpush1.bf16.msra.mxu1 %v6882_v45  ;;  %4480 = vmatprep.subr.bf16.mxu0 %v6887_v46  ;;  %v6966_v45 = vld [vmem:[#allocation2 + $0x790] ss:$40 sps:$4 sm:$0xff]   ;;  %v6971_v46 = vld [vmem:[#allocation2 + $0xc44] ss:$40 sps:$4 sm:$0xff]  }
 0x134   : > { %4523 = vmatprep.subr.bf16.mxu1 %v6890_v47  ;;  %v6974_v47 = vld [vmem:[#allocation2 + $0x1144] ss:$40 sps:$4 sm:$0xff]  }
 0x136   : > { %4481 = vmatpush1.bf16.msra.mxu0 %v6885_v48  ;;  %v6969_v48 = vld [vmem:[#allocation2 + $0xc40] ss:$40 sps:$4 sm:$0xff]  }
 0x137   : > { %4524 = vmatpush1.bf16.msra.mxu1 %v6888_v49  ;;  %4482 = vmatprep.subr.bf16.mxu0 %v6893_v50  ;;  %v6972_v49 = vld [vmem:[#allocation2 + $0x1140] ss:$40 sps:$4 sm:$0xff]   ;;  %v6977_v50 = vld [vmem:[#allocation2 + $0xbf4] ss:$40 sps:$4 sm:$0xff]  }
 0x138   : > { %4525 = vmatprep.subr.bf16.mxu1 %v6896_v51  ;;  %v6980_v51 = vld [vmem:[#allocation2 + $0x10f4] ss:$40 sps:$4 sm:$0xff]  }
 0x13a   : > { %4483 = vmatpush1.bf16.msra.mxu0 %v6891_v52  ;;  %v6975_v52 = vld [vmem:[#allocation2 + $0xbf0] ss:$40 sps:$4 sm:$0xff]  }
 0x13b   : > { %4526 = vmatpush1.bf16.msra.mxu1 %v6894_v55  ;;  %4484 = vmatprep.subr.bf16.mxu0 %v6899_v56  ;;  %v6978_v55 = vld [vmem:[#allocation2 + $0x10f0] ss:$40 sps:$4 sm:$0xff]   ;;  %v6983_v56 = vld [vmem:[#allocation2 + $0xba4] ss:$40 sps:$4 sm:$0xff]  }
 0x13c   : > { %4527 = vmatprep.subr.bf16.mxu1 %v6902_v57  ;;  %v6986_v57 = vld [vmem:[#allocation2 + $0x10a4] ss:$40 sps:$4 sm:$0xff]  }
 0x13e   : > { %4485 = vmatpush1.bf16.msra.mxu0 %v6897_v58  ;;  %v6981_v58 = vld [vmem:[#allocation2 + $0xba0] ss:$40 sps:$4 sm:$0xff]  }
 0x13f   : > { %4528 = vmatpush1.bf16.msra.mxu1 %v6900_v59  ;;  %4486 = vmatprep.subr.bf16.mxu0 %v6905_v60  ;;  %v6984_v59 = vld [vmem:[#allocation2 + $0x10a0] ss:$40 sps:$4 sm:$0xff]   ;;  %v6989_v60 = vld [vmem:[#allocation2 + $0xb54] ss:$40 sps:$4 sm:$0xff]  }
 0x140   : > { %4529 = vmatprep.subr.bf16.mxu1 %v6908_v61  ;;  %v6992_v61 = vld [vmem:[#allocation2 + $0x1054] ss:$40 sps:$4 sm:$0xff]  }
 0x142   : > { %4487 = vmatpush1.bf16.msra.mxu0 %v6903_v62  ;;  %v6987_v62 = vld [vmem:[#allocation2 + $0xb50] ss:$40 sps:$4 sm:$0xff]  }
 0x143   : > { %4530 = vmatpush1.bf16.msra.mxu1 %v6906_v63  ;;  %4488 = vmatprep.subr.bf16.mxu0 %v6911_v0  ;;  %v6990_v63 = vld [vmem:[#allocation2 + $0x1050] ss:$40 sps:$4 sm:$0xff]   ;;  %v6995_v0 = vld [vmem:[#allocation2 + $0xb04] ss:$40 sps:$4 sm:$0xff]  }
 0x144   : > { %4531 = vmatprep.subr.bf16.mxu1 %v6914_v1  ;;  %v6998_v1 = vld [vmem:[#allocation2 + $0x1004] ss:$40 sps:$4 sm:$0xff]  }
 0x146   : > { %4489 = vmatpush1.bf16.msra.mxu0 %v6909_v2  ;;  %v6993_v2 = vld [vmem:[#allocation2 + $0xb00] ss:$40 sps:$4 sm:$0xff]  }
 0x147   : > { %4532 = vmatpush1.bf16.msra.mxu1 %v6912_v3  ;;  %4490 = vmatprep.subr.bf16.mxu0 %v6917_v4  ;;  %v6996_v3 = vld [vmem:[#allocation2 + $0x1000] ss:$40 sps:$4 sm:$0xff]   ;;  %v7001_v4 = vld [vmem:[#allocation2 + $0xab4] ss:$40 sps:$4 sm:$0xff]  }
 0x148   : > { %4533 = vmatprep.subr.bf16.mxu1 %v6920_v5  ;;  %v7004_v5 = vld [vmem:[#allocation2 + $0xfb4] ss:$40 sps:$4 sm:$0xff]  }
 0x14a   : > { %4491 = vmatpush1.bf16.msra.mxu0 %v6915_v6  ;;  %v6999_v6 = vld [vmem:[#allocation2 + $0xab0] ss:$40 sps:$4 sm:$0xff]  }
 0x14b   : > { %4534 = vmatpush1.bf16.msra.mxu1 %v6918_v7  ;;  %4492 = vmatprep.subr.bf16.mxu0 %v6923_v10  ;;  %v7002_v7 = vld [vmem:[#allocation2 + $0xfb0] ss:$40 sps:$4 sm:$0xff]   ;;  %v7007_v10 = vld [vmem:[#allocation2 + $0xa64] ss:$40 sps:$4 sm:$0xff]  }
 0x14c   : > { %4535 = vmatprep.subr.bf16.mxu1 %v6926_v11  ;;  %v7010_v11 = vld [vmem:[#allocation2 + $0xf64] ss:$40 sps:$4 sm:$0xff]  }
 0x14e   : > { %4493 = vmatpush2.bf16.msra.mxu0 %v6921_v12  ;;  %v7005_v12 = vld [vmem:[#allocation2 + $0xa60] ss:$40 sps:$4 sm:$0xff]  }
 0x14f   : > { %4536 = vmatpush2.bf16.msra.mxu1 %v6924_v13  ;;  %4494 = vmatprep.subr.bf16.mxu0 %v6929_v14  ;;  %v7008_v13 = vld [vmem:[#allocation2 + $0xf60] ss:$40 sps:$4 sm:$0xff]   ;;  %v7013_v14 = vld [vmem:[#allocation2 + $0xa14] ss:$40 sps:$4 sm:$0xff]  }
 0x150   : > { %4537 = vmatprep.subr.bf16.mxu1 %v6932_v15  ;;  %v7016_v15 = vld [vmem:[#allocation2 + $0xf14] ss:$40 sps:$4 sm:$0xff]  }
 0x152   : > { %4495 = vmatpush2.bf16.msra.mxu0 %v6927_v16  ;;  %v7011_v16 = vld [vmem:[#allocation2 + $0xa10] ss:$40 sps:$4 sm:$0xff]  }
 0x153   : > { %4538 = vmatpush2.bf16.msra.mxu1 %v6930_v17  ;;  %4496 = vmatprep.subr.bf16.mxu0 %v6935_v18  ;;  %v7014_v17 = vld [vmem:[#allocation2 + $0xf10] ss:$40 sps:$4 sm:$0xff]   ;;  %v7019_v18 = vld [vmem:[#allocation2 + $0xec4] ss:$40 sps:$4 sm:$0xff]  }
 0x154   : > { %4539 = vmatprep.subr.bf16.mxu1 %v6938_v19  ;;  %v7022_v19 = vld [vmem:[#allocation2 + $0x13c4] ss:$40 sps:$4 sm:$0xff]  }
 0x156   : > { %4497 = vmatpush2.bf16.msra.mxu0 %v6933_v22  ;;  %v7017_v22 = vld [vmem:[#allocation2 + $0xec0] ss:$40 sps:$4 sm:$0xff]  }
 0x157   : > { %4540 = vmatpush2.bf16.msra.mxu1 %v6936_v23  ;;  %4498 = vmatprep.subr.bf16.mxu0 %v6941_v24  ;;  %v7020_v23 = vld [vmem:[#allocation2 + $0x13c0] ss:$40 sps:$4 sm:$0xff]   ;;  %v7025_v24 = vld [vmem:[#allocation2 + $0xe74] ss:$40 sps:$4 sm:$0xff]  }
 0x158   : > { %4541 = vmatprep.subr.bf16.mxu1 %v6944_v25  ;;  %v7028_v25 = vld [vmem:[#allocation2 + $0x1374] ss:$40 sps:$4 sm:$0xff]  }
 0x15a   : > { %4499 = vmatpush2.bf16.msra.mxu0 %v6939_v26  ;;  %v7023_v26 = vld [vmem:[#allocation2 + $0xe70] ss:$40 sps:$4 sm:$0xff]  }
 0x15b   : > { %4542 = vmatpush2.bf16.msra.mxu1 %v6942_v27  ;;  %4500 = vmatprep.subr.bf16.mxu0 %v6947_v28  ;;  %v7026_v27 = vld [vmem:[#allocation2 + $0x1370] ss:$40 sps:$4 sm:$0xff]   ;;  %v7031_v28 = vld [vmem:[#allocation2 + $0xe24] ss:$40 sps:$4 sm:$0xff]  }
 0x15c   : > { %4543 = vmatprep.subr.bf16.mxu1 %v6950_v29  ;;  %v7034_v29 = vld [vmem:[#allocation2 + $0x1324] ss:$40 sps:$4 sm:$0xff]  }
 0x15e   : > { %4501 = vmatpush2.bf16.msra.mxu0 %v6945_v30  ;;  %v7762_v30 = vpop.f32.mrf.mxu0 }
 0x15f   : > { %4544 = vmatpush2.bf16.msra.mxu1 %v6948_v31  ;;  %4502 = vmatprep.subr.bf16.mxu0 %v6953_v32  ;;  %v7764_v31 = vpop.f32.mrf.mxu1  ;;  %v7029_v32 = vld [vmem:[#allocation2 + $0xe20] ss:$40 sps:$4 sm:$0xff]  }
 0x160   : > { %4545 = vmatprep.subr.bf16.mxu1 %v6956_v33  ;;  %v7032_v33 = vld [vmem:[#allocation2 + $0x1320] ss:$40 sps:$4 sm:$0xff]  }
 0x162   : > { %4503 = vmatpush2.bf16.msra.mxu0 %v6951_v34  ;;  %v7037_v34 = vld [vmem:[#allocation2 + $0xdd4] ss:$40 sps:$4 sm:$0xff]  }
 0x163   : > { %4546 = vmatpush2.bf16.msra.mxu1 %v6954_v35  ;;  %4504 = vmatprep.subr.bf16.mxu0 %v6959_v36  ;;  %v7040_v35 = vld [vmem:[#allocation2 + $0x12d4] ss:$40 sps:$4 sm:$0xff]   ;;  %v7766_v36 = vpop.f32.mrf.mxu0 }
 0x164   : > { %4547 = vmatprep.subr.bf16.mxu1 %v6962_v37  ;;  %v7768_v37 = vpop.f32.mrf.mxu1 }
 0x166   : > { %4505 = vmatpush2.bf16.msra.mxu0 %v6957_v38  ;;  %v7035_v38 = vld [vmem:[#allocation2 + $0xdd0] ss:$40 sps:$4 sm:$0xff]  }
 0x167   : > { %4548 = vmatpush2.bf16.msra.mxu1 %v6960_v39  ;;  %4506 = vmatprep.subr.bf16.mxu0 %v6965_v40  ;;  %v7038_v39 = vld [vmem:[#allocation2 + $0x12d0] ss:$40 sps:$4 sm:$0xff]   ;;  %v7043_v40 = vld [vmem:[#allocation2 + $0xd84] ss:$40 sps:$4 sm:$0xff]  }
 0x168   : > { %4549 = vmatprep.subr.bf16.mxu1 %v6968_v43  ;;  %v7046_v43 = vld [vmem:[#allocation2 + $0x1284] ss:$40 sps:$4 sm:$0xff]  }
 0x16a   : > { %4507 = vmatpush2.bf16.msra.mxu0 %v6963_v44  ;;  %v7770_v44 = vpop.f32.mrf.mxu0 }
 0x16b   : > { %4550 = vmatpush2.bf16.msra.mxu1 %v6966_v45  ;;  %4562 = vmatprep.subr.bf16.mxu0 %v6971_v46  ;;  %v7772_v45 = vpop.f32.mrf.mxu1  ;;  %v7041_v46 = vld [vmem:[#allocation2 + $0xd80] ss:$40 sps:$4 sm:$0xff]  }
 0x16c   : > { %4605 = vmatprep.subr.bf16.mxu1 %v6974_v47  ;;  %v7044_v47 = vld [vmem:[#allocation2 + $0x1280] ss:$40 sps:$4 sm:$0xff]  }
 0x16d   : > { %4509 = vmatmul.mubr.bf16.vlgmr.msra.gmra.mxu0 %v7710_v8 }
 0x16e   : > { %4552 = vmatmul.mubr.bf16.vlgmr.msra.gmra.mxu1 %v7712_v9  ;;  %4563 = vmatpush1.bf16.msra.mxu0 %v6969_v48  ;;  %v7049_v48 = vld [vmem:[#allocation2 + $0xd34] ss:$40 sps:$4 sm:$0xff]  }
 0x16f   : > { %4606 = vmatpush1.bf16.msra.mxu1 %v6972_v49  ;;  %4564 = vmatprep.subr.bf16.mxu0 %v6977_v50  ;;  %v7052_v49 = vld [vmem:[#allocation2 + $0x1234] ss:$40 sps:$4 sm:$0xff]   ;;  %v7774_v50 = vpop.f32.mrf.mxu0 }
 0x170   : > { %4607 = vmatprep.subr.bf16.mxu1 %v6980_v51  ;;  %4594 = vmatprep.mubr.bf16.mxu0 %v7730_v41  ;;  %v7776_v51 = vpop.f32.mrf.mxu1 }
 0x171   : > { %4637 = vmatprep.mubr.bf16.mxu1 %v7734_v42 }
 0x172   : > { %4565 = vmatpush1.bf16.msra.mxu0 %v6975_v52  ;;  %v7047_v52 = vld [vmem:[#allocation2 + $0xd30] ss:$40 sps:$4 sm:$0xff]  }
 0x173   : > { %4608 = vmatpush1.bf16.msra.mxu1 %v6978_v55  ;;  %4566 = vmatprep.subr.bf16.mxu0 %v6983_v56  ;;  %v7050_v55 = vld [vmem:[#allocation2 + $0x1230] ss:$40 sps:$4 sm:$0xff]   ;;  %v7778_v56 = vpop.f32.mrf.mxu0 }
 0x174   : > { %4609 = vmatprep.subr.bf16.mxu1 %v6986_v57  ;;  %v7780_v57 = vpop.f32.mrf.mxu1 }
 0x176   : > { %4567 = vmatpush1.bf16.msra.mxu0 %v6981_v58  ;;  %v7055_v58 = vld [vmem:[#allocation2 + $0xce4] ss:$40 sps:$4 sm:$0xff]  }
 0x177   : > { %4610 = vmatpush1.bf16.msra.mxu1 %v6984_v59  ;;  %4568 = vmatprep.subr.bf16.mxu0 %v6989_v60  ;;  %v7058_v59 = vld [vmem:[#allocation2 + $0x11e4] ss:$40 sps:$4 sm:$0xff]   ;;  %v7053_v60 = vld [vmem:[#allocation2 + $0xce0] ss:$40 sps:$4 sm:$0xff]  }
 0x178   : > { %4611 = vmatprep.subr.bf16.mxu1 %v6992_v61  ;;  %v7056_v61 = vld [vmem:[#allocation2 + $0x11e0] ss:$40 sps:$4 sm:$0xff]  }
 0x17a   : > { %4569 = vmatpush1.bf16.msra.mxu0 %v6987_v62  ;;  %v7782_v62 = vpop.f32.mrf.mxu0 }
 0x17b   : > { %4612 = vmatpush1.bf16.msra.mxu1 %v6990_v63  ;;  %4570 = vmatprep.subr.bf16.mxu0 %v6995_v0  ;;  %v7784_v63 = vpop.f32.mrf.mxu1  ;;  %v7061_v0 = vld [vmem:[#allocation2 + $0xc94] ss:$40 sps:$4 sm:$0xff]  }
 0x17c   : > { %4613 = vmatprep.subr.bf16.mxu1 %v6998_v1  ;;  %v7064_v1 = vld [vmem:[#allocation2 + $0x1194] ss:$40 sps:$4 sm:$0xff]  }
 0x17e   : > { %4571 = vmatpush1.bf16.msra.mxu0 %v6993_v2  ;;  %v7059_v2 = vld [vmem:[#allocation2 + $0xc90] ss:$40 sps:$4 sm:$0xff]  }
 0x17f   : > { %4614 = vmatpush1.bf16.msra.mxu1 %v6996_v3  ;;  %4572 = vmatprep.subr.bf16.mxu0 %v7001_v4  ;;  %v7062_v3 = vld [vmem:[#allocation2 + $0x1190] ss:$40 sps:$4 sm:$0xff]   ;;  %v7786_v4 = vpop.f32.mrf.mxu0 }
 0x180   : > { %4615 = vmatprep.subr.bf16.mxu1 %v7004_v5  ;;  %v7788_v5 = vpop.f32.mrf.mxu1 }
 0x182   : > { %4573 = vmatpush1.bf16.msra.mxu0 %v6999_v6  ;;  %v7067_v6 = vld [vmem:[#allocation2 + $0x24c] ss:$40 sps:$4 sm:$0xff]  }
 0x183   : > { %4616 = vmatpush1.bf16.msra.mxu1 %v7002_v7  ;;  %4574 = vmatprep.subr.bf16.mxu0 %v7007_v10  ;;  %v7070_v7 = vld [vmem:[#allocation2 + $0x74c] ss:$40 sps:$4 sm:$0xff]   ;;  %v7065_v10 = vld [vmem:[#allocation2 + $0x248] ss:$40 sps:$4 sm:$0xff]  }
 0x184   : > { %4617 = vmatprep.subr.bf16.mxu1 %v7010_v11  ;;  %v7068_v11 = vld [vmem:[#allocation2 + $0x748] ss:$40 sps:$4 sm:$0xff]  }
 0x186   : > { %4575 = vmatpush1.bf16.msra.mxu0 %v7005_v12  ;;  %v7790_v12 = vpop.f32.mrf.mxu0 }
 0x187   : > { %4618 = vmatpush1.bf16.msra.mxu1 %v7008_v13  ;;  %4576 = vmatprep.subr.bf16.mxu0 %v7013_v14  ;;  %v7792_v13 = vpop.f32.mrf.mxu1  ;;  %v7073_v14 = vld [vmem:[#allocation2 + $0x1fc] ss:$40 sps:$4 sm:$0xff]  }
 0x188   : > { %4619 = vmatprep.subr.bf16.mxu1 %v7016_v15  ;;  %v7076_v15 = vld [vmem:[#allocation2 + $0x6fc] ss:$40 sps:$4 sm:$0xff]  }
 0x18a   : > { %4577 = vmatpush1.bf16.msra.mxu0 %v7011_v16  ;;  %v7071_v16 = vld [vmem:[#allocation2 + $0x1f8] ss:$40 sps:$4 sm:$0xff]  }
 0x18b   : > { %4620 = vmatpush1.bf16.msra.mxu1 %v7014_v17  ;;  %4578 = vmatprep.subr.bf16.mxu0 %v7019_v18  ;;  %v7074_v17 = vld [vmem:[#allocation2 + $0x6f8] ss:$40 sps:$4 sm:$0xff]  }
 0x18c   : > { %4621 = vmatprep.subr.bf16.mxu1 %v7022_v19 }
 0x18e   : > { %4579 = vmatpush2.bf16.msra.mxu0 %v7017_v22 }
 0x18f   : > { %4622 = vmatpush2.bf16.msra.mxu1 %v7020_v23  ;;  %4580 = vmatprep.subr.bf16.mxu0 %v7025_v24 }
 0x190   : > { %4623 = vmatprep.subr.bf16.mxu1 %v7028_v25  ;;  %v7079_v25 = vld [vmem:[#allocation2 + $0x1ac] ss:$40 sps:$4 sm:$0xff]  }
 0x192   : > { %4581 = vmatpush2.bf16.msra.mxu0 %v7023_v26  ;;  %v7082_v26 = vld [vmem:[#allocation2 + $0x6ac] ss:$40 sps:$4 sm:$0xff]  }
 0x193   : > { %4624 = vmatpush2.bf16.msra.mxu1 %v7026_v27  ;;  %4582 = vmatprep.subr.bf16.mxu0 %v7031_v28  ;;  %v7077_v28 = vld [vmem:[#allocation2 + $0x1a8] ss:$40 sps:$4 sm:$0xff]  }
 0x194   : > { %4625 = vmatprep.subr.bf16.mxu1 %v7034_v29  ;;  %v7080_v29 = vld [vmem:[#allocation2 + $0x6a8] ss:$40 sps:$4 sm:$0xff]  }
 0x196   : > { %4583 = vmatpush2.bf16.msra.mxu0 %v7029_v32 }
 0x197   : > { %4626 = vmatpush2.bf16.msra.mxu1 %v7032_v33  ;;  %4584 = vmatprep.subr.bf16.mxu0 %v7037_v34 }
 0x198   : > { %4627 = vmatprep.subr.bf16.mxu1 %v7040_v35 }
 0x19a   : > { %4585 = vmatpush2.bf16.msra.mxu0 %v7035_v38 }
 0x19b   : > { %4628 = vmatpush2.bf16.msra.mxu1 %v7038_v39  ;;  %4586 = vmatprep.subr.bf16.mxu0 %v7043_v40  ;;  %v7085_v39 = vld [vmem:[#allocation2 + $0x15c] ss:$40 sps:$4 sm:$0xff]  }
 0x19c   : > { %4629 = vmatprep.subr.bf16.mxu1 %v7046_v43  ;;  %v7088_v40 = vld [vmem:[#allocation2 + $0x65c] ss:$40 sps:$4 sm:$0xff]  }
 0x19e   : > { %4587 = vmatpush2.bf16.msra.mxu0 %v7041_v46  ;;  %v7083_v46 = vld [vmem:[#allocation2 + $0x158] ss:$40 sps:$4 sm:$0xff]  }
 0x19f   : > { %4630 = vmatpush2.bf16.msra.mxu1 %v7044_v47  ;;  %4588 = vmatprep.subr.bf16.mxu0 %v7049_v48  ;;  %v7086_v47 = vld [vmem:[#allocation2 + $0x658] ss:$40 sps:$4 sm:$0xff]   ;;  %v7091_v48 = vld [vmem:[#allocation2 + $0x10c] ss:$40 sps:$4 sm:$0xff]  }
 0x1a0   : > { %4631 = vmatprep.subr.bf16.mxu1 %v7052_v49  ;;  %v7094_v49 = vld [vmem:[#allocation2 + $0x60c] ss:$40 sps:$4 sm:$0xff]  }
 0x1a2   : > { %4589 = vmatpush2.bf16.msra.mxu0 %v7047_v52  ;;  %v7089_v52 = vld [vmem:[#allocation2 + $0x108] ss:$40 sps:$4 sm:$0xff]  }
 0x1a3   : > { %4632 = vmatpush2.bf16.msra.mxu1 %v7050_v55  ;;  %4590 = vmatprep.subr.bf16.mxu0 %v7055_v58  ;;  %v7092_v55 = vld [vmem:[#allocation2 + $0x608] ss:$40 sps:$4 sm:$0xff]   ;;  %v7097_v58 = vld [vmem:[#allocation2 + $0xbc] ss:$40 sps:$4 sm:$0xff]  }
 0x1a4   : > { %4633 = vmatprep.subr.bf16.mxu1 %v7058_v59  ;;  %v7100_v59 = vld [vmem:[#allocation2 + $0x5bc] ss:$40 sps:$4 sm:$0xff]  }
 0x1a6   : > { %4591 = vmatpush2.bf16.msra.mxu0 %v7053_v60  ;;  %v7095_v60 = vld [vmem:[#allocation2 + $0xb8] ss:$40 sps:$4 sm:$0xff]  }
 0x1a7   : > { %4634 = vmatpush2.bf16.msra.mxu1 %v7056_v61  ;;  %4592 = vmatprep.subr.bf16.mxu0 %v7061_v0  ;;  %v7098_v61 = vld [vmem:[#allocation2 + $0x5b8] ss:$40 sps:$4 sm:$0xff]   ;;  %v7103_v0 = vld [vmem:[#allocation2 + $0x6c] ss:$40 sps:$4 sm:$0xff]  }
 0x1a8   : > { %4635 = vmatprep.subr.bf16.mxu1 %v7064_v1  ;;  %v7106_v1 = vld [vmem:[#allocation2 + $0x56c] ss:$40 sps:$4 sm:$0xff]  }
 0x1aa   : > { %4593 = vmatpush2.bf16.msra.mxu0 %v7059_v2  ;;  %v7101_v2 = vld [vmem:[#allocation2 + $0x68] ss:$40 sps:$4 sm:$0xff]  }
 0x1ab   : > { %4636 = vmatpush2.bf16.msra.mxu1 %v7062_v3  ;;  %4648 = vmatprep.subr.bf16.mxu0 %v7067_v6  ;;  %v7104_v3 = vld [vmem:[#allocation2 + $0x568] ss:$40 sps:$4 sm:$0xff]   ;;  %v7109_v6 = vld [vmem:[#allocation2 + $0x1c] ss:$40 sps:$4 sm:$0xff]  }
 0x1ac   : > { %4691 = vmatprep.subr.bf16.mxu1 %v7070_v7  ;;  %v7112_v7 = vld [vmem:[#allocation2 + $0x51c] ss:$40 sps:$4 sm:$0xff]  }
 0x1ad   : > { %v4338_v18 = vpop.f32.mrf.mxu0  ;;  %4595 = vmatmul.mubr.bf16.vlgmr.msra.gmra.mxu0 %v7740_v20 }
 0x1ae   : > { %v4381_v19 = vpop.f32.mrf.mxu1  ;;  %4638 = vmatmul.mubr.bf16.vlgmr.msra.gmra.mxu1 %v7744_v21  ;;  %4649 = vmatpush1.bf16.msra.mxu0 %v7065_v10  ;;  %v7107_v10 = vld [vmem:[#allocation2 + $0x18] ss:$40 sps:$4 sm:$0xff]  }
 0x1af   : > { %v7796_v22 = vadd.f32 %v4381_v19, %v4338_v18  ;;  %4692 = vmatpush1.bf16.msra.mxu1 %v7068_v11  ;;  %v4340_v23 = vpop.f32.mrf.mxu0  ;;  %4650 = vmatprep.subr.bf16.mxu0 %v7073_v14  ;;  %v7110_v11 = vld [vmem:[#allocation2 + $0x518] ss:$40 sps:$4 sm:$0xff]   ;;  %v7115_v14 = vld [vmem:[#allocation2 + $0x4cc] ss:$40 sps:$4 sm:$0xff]   ;;  %v7121_v18 = vld [vmem:[#allocation2 + $0x47c] ss:$40 sps:$4 sm:$0xff]  }
 0x1b0   : > { %v4383_v24 = vpop.f32.mrf.mxu1  ;;  %4693 = vmatprep.subr.bf16.mxu1 %v7076_v15  ;;  %4680 = vmatprep.mubr.bf16.mxu0 %v7704_v53  ;;  %v7118_v15 = vld [vmem:[#allocation2 + $0x9cc] ss:$40 sps:$4 sm:$0xff]   ;;  %v7124_v19 = vld [vmem:[#allocation2 + $0x97c] ss:$40 sps:$4 sm:$0xff]  }
 0x1b1   : > { %v7798_v27 = vadd.f32 %v4383_v24, %v4340_v23  ;;  %4723 = vmatprep.mubr.bf16.mxu1 %v7706_v54  ;;  %v4342_v32 = vpop.f32.mrf.mxu0  ;;  %v7119_v23 = vld [vmem:[#allocation2 + $0x478] ss:$40 sps:$4 sm:$0xff]  }
 0x1b2   : > { %v4385_v33 = vpop.f32.mrf.mxu1  ;;  %4651 = vmatpush1.bf16.msra.mxu0 %v7071_v16  ;;  %v7113_v16 = vld [vmem:[#allocation2 + $0x4c8] ss:$40 sps:$4 sm:$0xff]   ;;  %v7122_v24 = vld [vmem:[#allocation2 + $0x978] ss:$40 sps:$4 sm:$0xff]  }
 0x1b3   : > { %v7802_v34 = vadd.f32 %v4385_v33, %v4342_v32  ;;  %4694 = vmatpush1.bf16.msra.mxu1 %v7074_v17  ;;  %v4344_v35 = vpop.f32.mrf.mxu0  ;;  %4652 = vmatprep.subr.bf16.mxu0 %v7079_v25  ;;  %v7116_v17 = vld [vmem:[#allocation2 + $0x9c8] ss:$40 sps:$4 sm:$0xff]   ;;  %v7127_v25 = vld [vmem:[#allocation2 + $0x42c] ss:$40 sps:$4 sm:$0xff]   ;;  %v7133_v32 = vld [vmem:[#allocation2 + $0x3dc] ss:$40 sps:$4 sm:$0xff]  }
 0x1b4   : > { %v4387_v38 = vpop.f32.mrf.mxu1  ;;  %4695 = vmatprep.subr.bf16.mxu1 %v7082_v26  ;;  %v7130_v26 = vld [vmem:[#allocation2 + $0x92c] ss:$40 sps:$4 sm:$0xff]   ;;  %v7136_v33 = vld [vmem:[#allocation2 + $0x8dc] ss:$40 sps:$4 sm:$0xff]  }
 0x1b5   : > { %v7804_v43 = vadd.f32 %v4387_v38, %v4344_v35  ;;  %v7131_v35 = vld [vmem:[#allocation2 + $0x3d8] ss:$40 sps:$4 sm:$0xff]  }
 0x1b6   : > { %4653 = vmatpush1.bf16.msra.mxu0 %v7077_v28  ;;  %v7125_v28 = vld [vmem:[#allocation2 + $0x428] ss:$40 sps:$4 sm:$0xff]   ;;  %v7134_v38 = vld [vmem:[#allocation2 + $0x8d8] ss:$40 sps:$4 sm:$0xff]  }
 0x1b7   : > { %4696 = vmatpush1.bf16.msra.mxu1 %v7080_v29  ;;  %4654 = vmatprep.subr.bf16.mxu0 %v7085_v39  ;;  %v7128_v29 = vld [vmem:[#allocation2 + $0x928] ss:$40 sps:$4 sm:$0xff]   ;;  %v7139_v39 = vld [vmem:[#allocation2 + $0x38c] ss:$40 sps:$4 sm:$0xff]  }
 0x1b8   : > { %4697 = vmatprep.subr.bf16.mxu1 %v7088_v40  ;;  %v7142_v40 = vld [vmem:[#allocation2 + $0x88c] ss:$40 sps:$4 sm:$0xff]  }
 0x1ba   : > { %4655 = vmatpush1.bf16.msra.mxu0 %v7083_v46  ;;  %v7137_v46 = vld [vmem:[#allocation2 + $0x388] ss:$40 sps:$4 sm:$0xff]  }
 0x1bb   : > { %4698 = vmatpush1.bf16.msra.mxu1 %v7086_v47  ;;  %4656 = vmatprep.subr.bf16.mxu0 %v7091_v48  ;;  %v7140_v47 = vld [vmem:[#allocation2 + $0x888] ss:$40 sps:$4 sm:$0xff]   ;;  %v7145_v48 = vld [vmem:[#allocation2 + $0x33c] ss:$40 sps:$4 sm:$0xff]  }
 0x1bc   : > { %4699 = vmatprep.subr.bf16.mxu1 %v7094_v49  ;;  %v7148_v49 = vld [vmem:[#allocation2 + $0x83c] ss:$40 sps:$4 sm:$0xff]  }
 0x1be   : > { %4657 = vmatpush1.bf16.msra.mxu0 %v7089_v52  ;;  %v7143_v52 = vld [vmem:[#allocation2 + $0x338] ss:$40 sps:$4 sm:$0xff]  }
 0x1bf   : > { %4700 = vmatpush1.bf16.msra.mxu1 %v7092_v55  ;;  %4658 = vmatprep.subr.bf16.mxu0 %v7097_v58  ;;  %v7146_v55 = vld [vmem:[#allocation2 + $0x838] ss:$40 sps:$4 sm:$0xff]   ;;  %v7151_v58 = vld [vmem:[#allocation2 + $0x2ec] ss:$40 sps:$4 sm:$0xff]  }
 0x1c0   : > { %4701 = vmatprep.subr.bf16.mxu1 %v7100_v59  ;;  %v7154_v59 = vld [vmem:[#allocation2 + $0x7ec] ss:$40 sps:$4 sm:$0xff]  }
 0x1c2   : > { %4659 = vmatpush1.bf16.msra.mxu0 %v7095_v60  ;;  %v7149_v60 = vld [vmem:[#allocation2 + $0x2e8] ss:$40 sps:$4 sm:$0xff]  }
 0x1c3   : > { %4702 = vmatpush1.bf16.msra.mxu1 %v7098_v61  ;;  %4660 = vmatprep.subr.bf16.mxu0 %v7103_v0  ;;  %v7152_v61 = vld [vmem:[#allocation2 + $0x7e8] ss:$40 sps:$4 sm:$0xff]   ;;  %v7157_v0 = vld [vmem:[#allocation2 + $0x29c] ss:$40 sps:$4 sm:$0xff]  }
 0x1c4   : > { %4703 = vmatprep.subr.bf16.mxu1 %v7106_v1  ;;  %v7160_v1 = vld [vmem:[#allocation2 + $0x79c] ss:$40 sps:$4 sm:$0xff]  }
 0x1c6   : > { %4661 = vmatpush1.bf16.msra.mxu0 %v7101_v2  ;;  %v7155_v2 = vld [vmem:[#allocation2 + $0x298] ss:$40 sps:$4 sm:$0xff]  }
 0x1c7   : > { %4704 = vmatpush1.bf16.msra.mxu1 %v7104_v3  ;;  %4662 = vmatprep.subr.bf16.mxu0 %v7109_v6  ;;  %v7158_v3 = vld [vmem:[#allocation2 + $0x798] ss:$40 sps:$4 sm:$0xff]   ;;  %v7163_v6 = vld [vmem:[#allocation2 + $0xc4c] ss:$40 sps:$4 sm:$0xff]  }
 0x1c8   : > { %4705 = vmatprep.subr.bf16.mxu1 %v7112_v7  ;;  %v7166_v7 = vld [vmem:[#allocation2 + $0x114c] ss:$40 sps:$4 sm:$0xff]  }
 0x1ca   : > { %4663 = vmatpush1.bf16.msra.mxu0 %v7107_v10  ;;  %v7161_v10 = vld [vmem:[#allocation2 + $0xc48] ss:$40 sps:$4 sm:$0xff]  }
 0x1cb   : > { %4706 = vmatpush1.bf16.msra.mxu1 %v7110_v11  ;;  %4664 = vmatprep.subr.bf16.mxu0 %v7115_v14  ;;  %v7164_v11 = vld [vmem:[#allocation2 + $0x1148] ss:$40 sps:$4 sm:$0xff]   ;;  %v7169_v14 = vld [vmem:[#allocation2 + $0xbfc] ss:$40 sps:$4 sm:$0xff]  }
 0x1cc   : > { %4707 = vmatprep.subr.bf16.mxu1 %v7118_v15  ;;  %v7172_v15 = vld [vmem:[#allocation2 + $0x10fc] ss:$40 sps:$4 sm:$0xff]  }
 0x1ce   : > { %4665 = vmatpush2.bf16.msra.mxu0 %v7113_v16 }
 0x1cf   : > { %4708 = vmatpush2.bf16.msra.mxu1 %v7116_v17  ;;  %4666 = vmatprep.subr.bf16.mxu0 %v7121_v18 }
 0x1d0   : > { %4709 = vmatprep.subr.bf16.mxu1 %v7124_v19  ;;  %v7167_v19 = vld [vmem:[#allocation2 + $0xbf8] ss:$40 sps:$4 sm:$0xff]  }
 0x1d2   : > { %4667 = vmatpush2.bf16.msra.mxu0 %v7119_v23  ;;  %v7170_v23 = vld [vmem:[#allocation2 + $0x10f8] ss:$40 sps:$4 sm:$0xff]  }
 0x1d3   : > { %4710 = vmatpush2.bf16.msra.mxu1 %v7122_v24  ;;  %4668 = vmatprep.subr.bf16.mxu0 %v7127_v25 }
 0x1d4   : > { %4711 = vmatprep.subr.bf16.mxu1 %v7130_v26  ;;  %v7175_v26 = vld [vmem:[#allocation2 + $0xbac] ss:$40 sps:$4 sm:$0xff]  }
 0x1d6   : > { %4669 = vmatpush2.bf16.msra.mxu0 %v7125_v28  ;;  %v7178_v28 = vld [vmem:[#allocation2 + $0x10ac] ss:$40 sps:$4 sm:$0xff]  }
 0x1d7   : > { %4712 = vmatpush2.bf16.msra.mxu1 %v7128_v29  ;;  %4670 = vmatprep.subr.bf16.mxu0 %v7133_v32 }
 0x1d8   : > { %4713 = vmatprep.subr.bf16.mxu1 %v7136_v33 }
 0x1da   : > { %4671 = vmatpush2.bf16.msra.mxu0 %v7131_v35 }
 0x1db   : > { %4714 = vmatpush2.bf16.msra.mxu1 %v7134_v38  ;;  %4672 = vmatprep.subr.bf16.mxu0 %v7139_v39  ;;  %v7173_v39 = vld [vmem:[#allocation2 + $0xba8] ss:$40 sps:$4 sm:$0xff]  }
 0x1dc   : > { %4715 = vmatprep.subr.bf16.mxu1 %v7142_v40  ;;  %v7176_v40 = vld [vmem:[#allocation2 + $0x10a8] ss:$40 sps:$4 sm:$0xff]  }
 0x1de   : > { %4673 = vmatpush2.bf16.msra.mxu0 %v7137_v46 }
 0x1df   : > { %4716 = vmatpush2.bf16.msra.mxu1 %v7140_v47  ;;  %4674 = vmatprep.subr.bf16.mxu0 %v7145_v48  ;;  %v7181_v47 = vld [vmem:[#allocation2 + $0xb5c] ss:$40 sps:$4 sm:$0xff]  }
 0x1e0   : > { %4717 = vmatprep.subr.bf16.mxu1 %v7148_v49  ;;  %v7184_v48 = vld [vmem:[#allocation2 + $0x105c] ss:$40 sps:$4 sm:$0xff]  }
 0x1e2   : > { %4675 = vmatpush2.bf16.msra.mxu0 %v7143_v52 }
 0x1e3   : > { %4718 = vmatpush2.bf16.msra.mxu1 %v7146_v55  ;;  %4676 = vmatprep.subr.bf16.mxu0 %v7151_v58  ;;  %v7179_v58 = vld [vmem:[#allocation2 + $0xb58] ss:$40 sps:$4 sm:$0xff]  }
 0x1e4   : > { %4719 = vmatprep.subr.bf16.mxu1 %v7154_v59  ;;  %v7187_v59 = vld [vmem:[#allocation2 + $0xb0c] ss:$40 sps:$4 sm:$0xff]  }
 0x1e6   : > { %4677 = vmatpush2.bf16.msra.mxu0 %v7149_v60  ;;  %v7190_v60 = vld [vmem:[#allocation2 + $0x100c] ss:$40 sps:$4 sm:$0xff]  }
 0x1e7   : > { %4720 = vmatpush2.bf16.msra.mxu1 %v7152_v61  ;;  %4678 = vmatprep.subr.bf16.mxu0 %v7157_v0  ;;  %v7185_v61 = vld [vmem:[#allocation2 + $0xb08] ss:$40 sps:$4 sm:$0xff]  }
 0x1e8   : > { %4721 = vmatprep.subr.bf16.mxu1 %v7160_v1  ;;  %v7188_v0 = vld [vmem:[#allocation2 + $0x1008] ss:$40 sps:$4 sm:$0xff]   ;;  %v7193_v1 = vld [vmem:[#allocation2 + $0xabc] ss:$40 sps:$4 sm:$0xff]  }
 0x1ea   : > { %4679 = vmatpush2.bf16.msra.mxu0 %v7155_v2  ;;  %v7196_v2 = vld [vmem:[#allocation2 + $0xfbc] ss:$40 sps:$4 sm:$0xff]  }
 0x1eb   : > { %4722 = vmatpush2.bf16.msra.mxu1 %v7158_v3  ;;  %4734 = vmatprep.subr.bf16.mxu0 %v7163_v6  ;;  %v7194_v3 = vld [vmem:[#allocation2 + $0xfb8] ss:$40 sps:$4 sm:$0xff]   ;;  %v7199_v6 = vld [vmem:[#allocation2 + $0xa6c] ss:$40 sps:$4 sm:$0xff]  }
 0x1ec   : > { %4777 = vmatprep.subr.bf16.mxu1 %v7166_v7  ;;  %v7202_v7 = vld [vmem:[#allocation2 + $0xf6c] ss:$40 sps:$4 sm:$0xff]  }
 0x1ed   : > { %v4424_v16 = vpop.f32.mrf.mxu0  ;;  %4681 = vmatmul.mubr.bf16.vlgmr.msra.gmra.mxu0 %v7710_v8 }
 0x1ee   : > { %v4467_v17 = vpop.f32.mrf.mxu1  ;;  %4724 = vmatmul.mubr.bf16.vlgmr.msra.gmra.mxu1 %v7712_v9  ;;  %v4425_v18 = vadd.f32 %v4424_v16, %v7796_v22  ;;  %4735 = vmatpush1.bf16.msra.mxu0 %v7161_v10  ;;  %v7197_v10 = vld [vmem:[#allocation2 + $0xa68] ss:$40 sps:$4 sm:$0xff]   ;;  %v7203_v16 = vld [vmem:[#allocation2 + $0xa18] ss:$40 sps:$4 sm:$0xff]  }
 0x1ef   : > { %4778 = vmatpush1.bf16.msra.mxu1 %v7164_v11  ;;  %v4426_v24 = vpop.f32.mrf.mxu0  ;;  %4736 = vmatprep.subr.bf16.mxu0 %v7169_v14  ;;  %v7200_v11 = vld [vmem:[#allocation2 + $0xf68] ss:$40 sps:$4 sm:$0xff]   ;;  %v7205_v14 = vld [vmem:[#allocation2 + $0xa1c] ss:$40 sps:$4 sm:$0xff]  }
 0x1f0   : > { %v4469_v25 = vpop.f32.mrf.mxu1  ;;  %4779 = vmatprep.subr.bf16.mxu1 %v7172_v15  ;;  %v7809_v29 = vadd.f32 %v4467_v17, %v4425_v18  ;;  %v4427_v32 = vadd.f32 %v4426_v24, %v7798_v27  ;;  %4766 = vmatprep.mubr.bf16.mxu0 %v7730_v41  ;;  %v7208_v15 = vld [vmem:[#allocation2 + $0xf1c] ss:$40 sps:$4 sm:$0xff]   ;;  %v7206_v17 = vld [vmem:[#allocation2 + $0xf18] ss:$40 sps:$4 sm:$0xff]   ;;  %v7211_v18 = vld [vmem:[#allocation2 + $0xecc] ss:$40 sps:$4 sm:$0xff]  }
 0x1f1   : > { %4809 = vmatprep.mubr.bf16.mxu1 %v7734_v42  ;;  %v4428_v33 = vpop.f32.mrf.mxu0  ;;  %v7212_v24 = vld [vmem:[#allocation2 + $0x13c8] ss:$40 sps:$4 sm:$0xff]  }
 0x1f2   : > { %v4471_v22 = vpop.f32.mrf.mxu1  ;;  %v7814_v35 = vadd.f32 %v4469_v25, %v4427_v32  ;;  %v4429_v38 = vadd.f32 %v4428_v33, %v7802_v34  ;;  %4737 = vmatpush1.bf16.msra.mxu0 %v7167_v19  ;;  %v7182_v34 = vld [vmem:[#allocation2 + $0x1058] ss:$40 sps:$4 sm:$0xff]   ;;  %v7214_v19 = vld [vmem:[#allocation2 + $0x13cc] ss:$40 sps:$4 sm:$0xff]   ;;  %v7217_v25 = vld [vmem:[#allocation2 + $0xe7c] ss:$40 sps:$4 sm:$0xff]  }
 0x1f3   : > { %4780 = vmatpush1.bf16.msra.mxu1 %v7170_v23  ;;  %v4430_v46 = vpop.f32.mrf.mxu0  ;;  %4738 = vmatprep.subr.bf16.mxu0 %v7175_v26  ;;  %v7209_v23 = vld [vmem:[#allocation2 + $0xec8] ss:$40 sps:$4 sm:$0xff]   ;;  %v7220_v26 = vld [vmem:[#allocation2 + $0x137c] ss:$40 sps:$4 sm:$0xff]   ;;  %v7218_v32 = vld [vmem:[#allocation2 + $0x1378] ss:$40 sps:$4 sm:$0xff]  }
 0x1f4   : > { %4781 = vmatprep.subr.bf16.mxu1 %v7178_v28  ;;  %v7817_v27 = vadd.f32 %v4471_v22, %v4429_v38  ;;  %v4431_v49 = vadd.f32 %v4430_v46, %v7804_v43  ;;  %v4473_v52 = vpop.f32.mrf.mxu1  ;;  %v7191_v43 = vld [vmem:[#allocation2 + $0xab8] ss:$40 sps:$4 sm:$0xff]   ;;  %v7223_v33 = vld [vmem:[#allocation2 + $0xe2c] ss:$40 sps:$4 sm:$0xff]   ;;  %v7221_v38 = vld [vmem:[#allocation2 + $0xe28] ss:$40 sps:$4 sm:$0xff]  }
 0x1f5   : > { %v7215_v28 = vld [vmem:[#allocation2 + $0xe78] ss:$40 sps:$4 sm:$0xff]   ;;  %v7226_v22 = vld [vmem:[#allocation2 + $0x132c] ss:$40 sps:$4 sm:$0xff]   ;;  %v7232_v46 = vld [vmem:[#allocation2 + $0x12dc] ss:$40 sps:$4 sm:$0xff]  }
 0x1f6   : > { %v7820_v55 = vadd.f32 %v4473_v52, %v4431_v49  ;;  %4739 = vmatpush1.bf16.msra.mxu0 %v7173_v39  ;;  %v7224_v39 = vld [vmem:[#allocation2 + $0x1328] ss:$40 sps:$4 sm:$0xff]   ;;  %v7235_v49 = vld [vmem:[#allocation2 + $0xd8c] ss:$40 sps:$4 sm:$0xff]  }
 0x1f7   : > { %4782 = vmatpush1.bf16.msra.mxu1 %v7176_v40  ;;  %4740 = vmatprep.subr.bf16.mxu0 %v7181_v47  ;;  %v7229_v40 = vld [vmem:[#allocation2 + $0xddc] ss:$40 sps:$4 sm:$0xff]   ;;  %v7227_v47 = vld [vmem:[#allocation2 + $0xdd8] ss:$40 sps:$4 sm:$0xff]   ;;  %v7238_v52 = vld [vmem:[#allocation2 + $0x128c] ss:$40 sps:$4 sm:$0xff]  }
 0x1f8   : > { %4783 = vmatprep.subr.bf16.mxu1 %v7184_v48  ;;  %v7230_v48 = vld [vmem:[#allocation2 + $0x12d8] ss:$40 sps:$4 sm:$0xff]  }
 0x1fa   : > { %4741 = vmatpush1.bf16.msra.mxu0 %v7179_v58  ;;  %v7233_v58 = vld [vmem:[#allocation2 + $0xd88] ss:$40 sps:$4 sm:$0xff]  }
 0x1fb   : > { %4784 = vmatpush1.bf16.msra.mxu1 %v7182_v34  ;;  %4742 = vmatprep.subr.bf16.mxu0 %v7187_v59  ;;  %v7236_v34 = vld [vmem:[#allocation2 + $0x1288] ss:$40 sps:$4 sm:$0xff]   ;;  %v7241_v59 = vld [vmem:[#allocation2 + $0xd3c] ss:$40 sps:$4 sm:$0xff]  }
 0x1fc   : > { %4785 = vmatprep.subr.bf16.mxu1 %v7190_v60  ;;  %v7244_v60 = vld [vmem:[#allocation2 + $0x123c] ss:$40 sps:$4 sm:$0xff]  }
 0x1fe   : > { %4743 = vmatpush1.bf16.msra.mxu0 %v7185_v61  ;;  %v7239_v61 = vld [vmem:[#allocation2 + $0xd38] ss:$40 sps:$4 sm:$0xff]  }
 0x1ff   : > { %4786 = vmatpush1.bf16.msra.mxu1 %v7188_v0  ;;  %4744 = vmatprep.subr.bf16.mxu0 %v7193_v1  ;;  %v7242_v0 = vld [vmem:[#allocation2 + $0x1238] ss:$40 sps:$4 sm:$0xff]   ;;  %v7247_v1 = vld [vmem:[#allocation2 + $0xcec] ss:$40 sps:$4 sm:$0xff]  }
 0x200   : > { %4787 = vmatprep.subr.bf16.mxu1 %v7196_v2  ;;  %v7250_v2 = vld [vmem:[#allocation2 + $0x11ec] ss:$40 sps:$4 sm:$0xff]  }
 0x202   : > { %4745 = vmatpush1.bf16.msra.mxu0 %v7191_v43  ;;  %v7245_v43 = vld [vmem:[#allocation2 + $0xce8] ss:$40 sps:$4 sm:$0xff]  }
 0x203   : > { %4788 = vmatpush1.bf16.msra.mxu1 %v7194_v3  ;;  %4746 = vmatprep.subr.bf16.mxu0 %v7199_v6  ;;  %v7248_v3 = vld [vmem:[#allocation2 + $0x11e8] ss:$40 sps:$4 sm:$0xff]   ;;  %v7253_v6 = vld [vmem:[#allocation2 + $0xc9c] ss:$40 sps:$4 sm:$0xff]  }
 0x204   : > { %4789 = vmatprep.subr.bf16.mxu1 %v7202_v7  ;;  %v7256_v7 = vld [vmem:[#allocation2 + $0x119c] ss:$40 sps:$4 sm:$0xff]  }
 0x206   : > { %4747 = vmatpush1.bf16.msra.mxu0 %v7197_v10  ;;  %v7251_v10 = vld [vmem:[#allocation2 + $0xc98] ss:$40 sps:$4 sm:$0xff]  }
 0x207   : > { %4790 = vmatpush1.bf16.msra.mxu1 %v7200_v11  ;;  %4748 = vmatprep.subr.bf16.mxu0 %v7205_v14  ;;  %v7254_v11 = vld [vmem:[#allocation2 + $0x1198] ss:$40 sps:$4 sm:$0xff]   ;;  %v7259_v14 = vld [vmem:[#allocation2 + $0x254] ss:$40 sps:$4 sm:$0xff]  }
 0x208   : > { %4791 = vmatprep.subr.bf16.mxu1 %v7208_v15  ;;  %v7262_v15 = vld [vmem:[#allocation2 + $0x754] ss:$40 sps:$4 sm:$0xff]  }
 0x20a   : > { %4749 = vmatpush1.bf16.msra.mxu0 %v7203_v16  ;;  %v7257_v16 = vld [vmem:[#allocation2 + $0x250] ss:$40 sps:$4 sm:$0xff]  }
 0x20b   : > { %4792 = vmatpush1.bf16.msra.mxu1 %v7206_v17  ;;  %4750 = vmatprep.subr.bf16.mxu0 %v7211_v18  ;;  %v7260_v17 = vld [vmem:[#allocation2 + $0x750] ss:$40 sps:$4 sm:$0xff]   ;;  %v7265_v18 = vld [vmem:[#allocation2 + $0x204] ss:$40 sps:$4 sm:$0xff]  }
 0x20c   : > { %4793 = vmatprep.subr.bf16.mxu1 %v7214_v19  ;;  %v7268_v19 = vld [vmem:[#allocation2 + $0x704] ss:$40 sps:$4 sm:$0xff]  }
 0x20e   : > { %4751 = vmatpush2.bf16.msra.mxu0 %v7209_v23 }
 0x20f   : > { %4794 = vmatpush2.bf16.msra.mxu1 %v7212_v24  ;;  %4752 = vmatprep.subr.bf16.mxu0 %v7217_v25 }
 0x210   : > { %4795 = vmatprep.subr.bf16.mxu1 %v7220_v26  ;;  %v7263_v26 = vld [vmem:[#allocation2 + $0x200] ss:$40 sps:$4 sm:$0xff]  }
 0x212   : > { %4753 = vmatpush2.bf16.msra.mxu0 %v7215_v28  ;;  %v7266_v28 = vld [vmem:[#allocation2 + $0x700] ss:$40 sps:$4 sm:$0xff]  }
 0x213   : > { %4796 = vmatpush2.bf16.msra.mxu1 %v7218_v32  ;;  %4754 = vmatprep.subr.bf16.mxu0 %v7223_v33 }
 0x214   : > { %4797 = vmatprep.subr.bf16.mxu1 %v7226_v22  ;;  %v7271_v22 = vld [vmem:[#allocation2 + $0x1b4] ss:$40 sps:$4 sm:$0xff]  }
 0x216   : > { %4755 = vmatpush2.bf16.msra.mxu0 %v7221_v38  ;;  %v7274_v38 = vld [vmem:[#allocation2 + $0x6b4] ss:$40 sps:$4 sm:$0xff]  }
 0x217   : > { %4798 = vmatpush2.bf16.msra.mxu1 %v7224_v39  ;;  %4756 = vmatprep.subr.bf16.mxu0 %v7229_v40 }
 0x218   : > { %4799 = vmatprep.subr.bf16.mxu1 %v7232_v46 }
 0x21a   : > { %4757 = vmatpush2.bf16.msra.mxu0 %v7227_v47  ;;  %v7269_v47 = vld [vmem:[#allocation2 + $0x1b0] ss:$40 sps:$4 sm:$0xff]  }
 0x21b   : > { %4800 = vmatpush2.bf16.msra.mxu1 %v7230_v48  ;;  %4758 = vmatprep.subr.bf16.mxu0 %v7235_v49  ;;  %v7272_v48 = vld [vmem:[#allocation2 + $0x6b0] ss:$40 sps:$4 sm:$0xff]   ;;  %v7277_v49 = vld [vmem:[#allocation2 + $0x164] ss:$40 sps:$4 sm:$0xff]  }
 0x21c   : > { %4801 = vmatprep.subr.bf16.mxu1 %v7238_v52  ;;  %v7280_v52 = vld [vmem:[#allocation2 + $0x664] ss:$40 sps:$4 sm:$0xff]  }
 0x21e   : > { %4759 = vmatpush2.bf16.msra.mxu0 %v7233_v58  ;;  %v7275_v58 = vld [vmem:[#allocation2 + $0x160] ss:$40 sps:$4 sm:$0xff]  }
 0x21f   : > { %4802 = vmatpush2.bf16.msra.mxu1 %v7236_v34  ;;  %4760 = vmatprep.subr.bf16.mxu0 %v7241_v59  ;;  %v7278_v34 = vld [vmem:[#allocation2 + $0x660] ss:$40 sps:$4 sm:$0xff]   ;;  %v7281_v59 = vld [vmem:[#allocation2 + $0x110] ss:$40 sps:$4 sm:$0xff]  }
 0x220   : > { %4803 = vmatprep.subr.bf16.mxu1 %v7244_v60  ;;  %v7284_v60 = vld [vmem:[#allocation2 + $0x610] ss:$40 sps:$4 sm:$0xff]  }
 0x222   : > { %4761 = vmatpush2.bf16.msra.mxu0 %v7239_v61  ;;  %v7289_v61 = vld [vmem:[#allocation2 + $0xc4] ss:$40 sps:$4 sm:$0xff]  }
 0x223   : > { %4804 = vmatpush2.bf16.msra.mxu1 %v7242_v0  ;;  %4762 = vmatprep.subr.bf16.mxu0 %v7247_v1  ;;  %v7292_v0 = vld [vmem:[#allocation2 + $0x5c4] ss:$40 sps:$4 sm:$0xff]   ;;  %v7287_v1 = vld [vmem:[#allocation2 + $0xc0] ss:$40 sps:$4 sm:$0xff]  }
 0x224   : > { %4805 = vmatprep.subr.bf16.mxu1 %v7250_v2  ;;  %v7290_v2 = vld [vmem:[#allocation2 + $0x5c0] ss:$40 sps:$4 sm:$0xff]  }
 0x226   : > { %4763 = vmatpush2.bf16.msra.mxu0 %v7245_v43  ;;  %v7295_v43 = vld [vmem:[#allocation2 + $0x74] ss:$40 sps:$4 sm:$0xff]  }
 0x227   : > { %4806 = vmatpush2.bf16.msra.mxu1 %v7248_v3  ;;  %4764 = vmatprep.subr.bf16.mxu0 %v7253_v6  ;;  %v7298_v3 = vld [vmem:[#allocation2 + $0x574] ss:$40 sps:$4 sm:$0xff]   ;;  %v7293_v6 = vld [vmem:[#allocation2 + $0x70] ss:$40 sps:$4 sm:$0xff]  }
 0x228   : > { %4807 = vmatprep.subr.bf16.mxu1 %v7256_v7  ;;  %v7296_v7 = vld [vmem:[#allocation2 + $0x570] ss:$40 sps:$4 sm:$0xff]  }
 0x22a   : > { %4765 = vmatpush2.bf16.msra.mxu0 %v7251_v10  ;;  %v7301_v10 = vld [vmem:[#allocation2 + $0x24] ss:$40 sps:$4 sm:$0xff]  }
 0x22b   : > { %4808 = vmatpush2.bf16.msra.mxu1 %v7254_v11  ;;  %4820 = vmatprep.subr.bf16.mxu0 %v7259_v14  ;;  %v7304_v11 = vld [vmem:[#allocation2 + $0x524] ss:$40 sps:$4 sm:$0xff]   ;;  %v7299_v14 = vld [vmem:[#allocation2 + $0x20] ss:$40 sps:$4 sm:$0xff]  }
 0x22c   : > { %4863 = vmatprep.subr.bf16.mxu1 %v7262_v15  ;;  %v7302_v15 = vld [vmem:[#allocation2 + $0x520] ss:$40 sps:$4 sm:$0xff]  }
 0x22d   : > { %v4510_v23 = vpop.f32.mrf.mxu0  ;;  %4767 = vmatmul.mubr.bf16.vlgmr.msra.gmra.mxu0 %v7740_v20 }
 0x22e   : > { %v4553_v24 = vpop.f32.mrf.mxu1  ;;  %4810 = vmatmul.mubr.bf16.vlgmr.msra.gmra.mxu1 %v7744_v21  ;;  %4821 = vmatpush1.bf16.msra.mxu0 %v7257_v16  ;;  %v7307_v16 = vld [vmem:[#allocation2 + $0x4d4] ss:$40 sps:$4 sm:$0xff]  }
 0x22f   : > { %v7824_v25 = vadd.f32 %v4553_v24, %v4510_v23  ;;  %4864 = vmatpush1.bf16.msra.mxu1 %v7260_v17  ;;  %v7826_v32 = vpop.f32.mrf.mxu0  ;;  %4822 = vmatprep.subr.bf16.mxu0 %v7265_v18  ;;  %v7310_v17 = vld [vmem:[#allocation2 + $0x9d4] ss:$40 sps:$4 sm:$0xff]   ;;  %v7305_v18 = vld [vmem:[#allocation2 + $0x4d0] ss:$40 sps:$4 sm:$0xff]   ;;  %v7313_v23 = vld [vmem:[#allocation2 + $0x484] ss:$40 sps:$4 sm:$0xff]  }
 0x230   : > { %v7828_v33 = vpop.f32.mrf.mxu1  ;;  %4865 = vmatprep.subr.bf16.mxu1 %v7268_v19  ;;  %4852 = vmatprep.mubr.bf16.mxu0 %v7704_v53  ;;  %v7283_v53 = vld [vmem:[#allocation2 + $0x114] ss:$40 sps:$4 sm:$0xff]   ;;  %v7308_v19 = vld [vmem:[#allocation2 + $0x9d0] ss:$40 sps:$4 sm:$0xff]   ;;  %v7316_v24 = vld [vmem:[#allocation2 + $0x984] ss:$40 sps:$4 sm:$0xff]  }
 0x231   : > { %4895 = vmatprep.mubr.bf16.mxu1 %v7706_v54  ;;  %v4514_v39 = vpop.f32.mrf.mxu0  ;;  %v7286_v54 = vld [vmem:[#allocation2 + $0x614] ss:$40 sps:$4 sm:$0xff]  }
 0x232   : > { %v4557_v40 = vpop.f32.mrf.mxu1  ;;  %4823 = vmatpush1.bf16.msra.mxu0 %v7263_v26  ;;  %v7311_v26 = vld [vmem:[#allocation2 + $0x480] ss:$40 sps:$4 sm:$0xff]  }
 0x233   : > { %v7832_v46 = vadd.f32 %v4557_v40, %v4514_v39  ;;  %4866 = vmatpush1.bf16.msra.mxu1 %v7266_v28  ;;  %4824 = vmatprep.subr.bf16.mxu0 %v7271_v22  ;;  %v7314_v28 = vld [vmem:[#allocation2 + $0x980] ss:$40 sps:$4 sm:$0xff]   ;;  %v7319_v22 = vld [vmem:[#allocation2 + $0x434] ss:$40 sps:$4 sm:$0xff]   ;;  %v7317_v39 = vld [vmem:[#allocation2 + $0x430] ss:$40 sps:$4 sm:$0xff]  }
 0x234   : > { %4867 = vmatprep.subr.bf16.mxu1 %v7274_v38  ;;  %v7322_v38 = vld [vmem:[#allocation2 + $0x934] ss:$40 sps:$4 sm:$0xff]   ;;  %v7320_v40 = vld [vmem:[#allocation2 + $0x930] ss:$40 sps:$4 sm:$0xff]  }
 0x236   : > { %4825 = vmatpush1.bf16.msra.mxu0 %v7269_v47  ;;  %v7325_v47 = vld [vmem:[#allocation2 + $0x3e4] ss:$40 sps:$4 sm:$0xff]  }
 0x237   : > { %4868 = vmatpush1.bf16.msra.mxu1 %v7272_v48  ;;  %4826 = vmatprep.subr.bf16.mxu0 %v7277_v49  ;;  %v7328_v48 = vld [vmem:[#allocation2 + $0x8e4] ss:$40 sps:$4 sm:$0xff]   ;;  %v7323_v49 = vld [vmem:[#allocation2 + $0x3e0] ss:$40 sps:$4 sm:$0xff]  }
 0x238   : > { %4869 = vmatprep.subr.bf16.mxu1 %v7280_v52  ;;  %v7326_v52 = vld [vmem:[#allocation2 + $0x8e0] ss:$40 sps:$4 sm:$0xff]  }
 0x23a   : > { %4827 = vmatpush1.bf16.msra.mxu0 %v7275_v58  ;;  %v7331_v58 = vld [vmem:[#allocation2 + $0x394] ss:$40 sps:$4 sm:$0xff]  }
 0x23b   : > { %4870 = vmatpush1.bf16.msra.mxu1 %v7278_v34  ;;  %4828 = vmatprep.subr.bf16.mxu0 %v7283_v53  ;;  %v7334_v34 = vld [vmem:[#allocation2 + $0x894] ss:$40 sps:$4 sm:$0xff]   ;;  %v7329_v53 = vld [vmem:[#allocation2 + $0x390] ss:$40 sps:$4 sm:$0xff]  }
 0x23c   : > { %4871 = vmatprep.subr.bf16.mxu1 %v7286_v54  ;;  %v7332_v54 = vld [vmem:[#allocation2 + $0x890] ss:$40 sps:$4 sm:$0xff]  }
 0x23e   : > { %4829 = vmatpush1.bf16.msra.mxu0 %v7281_v59  ;;  %v7337_v59 = vld [vmem:[#allocation2 + $0x344] ss:$40 sps:$4 sm:$0xff]  }
 0x23f   : > { %4872 = vmatpush1.bf16.msra.mxu1 %v7284_v60  ;;  %4830 = vmatprep.subr.bf16.mxu0 %v7289_v61  ;;  %v7340_v60 = vld [vmem:[#allocation2 + $0x844] ss:$40 sps:$4 sm:$0xff]   ;;  %v7335_v61 = vld [vmem:[#allocation2 + $0x340] ss:$40 sps:$4 sm:$0xff]  }
 0x240   : > { %4873 = vmatprep.subr.bf16.mxu1 %v7292_v0  ;;  %v7338_v0 = vld [vmem:[#allocation2 + $0x840] ss:$40 sps:$4 sm:$0xff]  }
 0x242   : > { %4831 = vmatpush1.bf16.msra.mxu0 %v7287_v1  ;;  %v7343_v1 = vld [vmem:[#allocation2 + $0x2f4] ss:$40 sps:$4 sm:$0xff]  }
 0x243   : > { %4874 = vmatpush1.bf16.msra.mxu1 %v7290_v2  ;;  %4832 = vmatprep.subr.bf16.mxu0 %v7295_v43  ;;  %v7346_v2 = vld [vmem:[#allocation2 + $0x7f4] ss:$40 sps:$4 sm:$0xff]   ;;  %v7341_v43 = vld [vmem:[#allocation2 + $0x2f0] ss:$40 sps:$4 sm:$0xff]  }
 0x244   : > { %4875 = vmatprep.subr.bf16.mxu1 %v7298_v3  ;;  %v7344_v3 = vld [vmem:[#allocation2 + $0x7f0] ss:$40 sps:$4 sm:$0xff]  }
 0x246   : > { %4833 = vmatpush1.bf16.msra.mxu0 %v7293_v6  ;;  %v7349_v6 = vld [vmem:[#allocation2 + $0x2a4] ss:$40 sps:$4 sm:$0xff]  }
 0x247   : > { %4876 = vmatpush1.bf16.msra.mxu1 %v7296_v7  ;;  %4834 = vmatprep.subr.bf16.mxu0 %v7301_v10  ;;  %v7352_v7 = vld [vmem:[#allocation2 + $0x7a4] ss:$40 sps:$4 sm:$0xff]   ;;  %v7347_v10 = vld [vmem:[#allocation2 + $0x2a0] ss:$40 sps:$4 sm:$0xff]  }
 0x248   : > { %4877 = vmatprep.subr.bf16.mxu1 %v7304_v11  ;;  %v7350_v11 = vld [vmem:[#allocation2 + $0x7a0] ss:$40 sps:$4 sm:$0xff]  }
 0x24a   : > { %4835 = vmatpush1.bf16.msra.mxu0 %v7299_v14  ;;  %v7355_v14 = vld [vmem:[#allocation2 + $0xc54] ss:$40 sps:$4 sm:$0xff]  }
 0x24b   : > { %4878 = vmatpush1.bf16.msra.mxu1 %v7302_v15  ;;  %4836 = vmatprep.subr.bf16.mxu0 %v7307_v16  ;;  %v7358_v15 = vld [vmem:[#allocation2 + $0x1154] ss:$40 sps:$4 sm:$0xff]   ;;  %v7353_v16 = vld [vmem:[#allocation2 + $0xc50] ss:$40 sps:$4 sm:$0xff]  }
 0x24c   : > { %4879 = vmatprep.subr.bf16.mxu1 %v7310_v17  ;;  %v7356_v17 = vld [vmem:[#allocation2 + $0x1150] ss:$40 sps:$4 sm:$0xff]  }
 0x24e   : > { %4837 = vmatpush2.bf16.msra.mxu0 %v7305_v18  ;;  %v7834_v18 = vpop.f32.mrf.mxu0 }
 0x24f   : > { %4880 = vmatpush2.bf16.msra.mxu1 %v7308_v19  ;;  %4838 = vmatprep.subr.bf16.mxu0 %v7313_v23  ;;  %v7836_v19 = vpop.f32.mrf.mxu1  ;;  %v7361_v23 = vld [vmem:[#allocation2 + $0xc04] ss:$40 sps:$4 sm:$0xff]  }
 0x250   : > { %4881 = vmatprep.subr.bf16.mxu1 %v7316_v24  ;;  %v7364_v24 = vld [vmem:[#allocation2 + $0x1104] ss:$40 sps:$4 sm:$0xff]  }
 0x252   : > { %4839 = vmatpush2.bf16.msra.mxu0 %v7311_v26 }
 0x253   : > { %4882 = vmatpush2.bf16.msra.mxu1 %v7314_v28  ;;  %4840 = vmatprep.subr.bf16.mxu0 %v7319_v22 }
 0x254   : > { %4883 = vmatprep.subr.bf16.mxu1 %v7322_v38  ;;  %v7359_v38 = vld [vmem:[#allocation2 + $0xc00] ss:$40 sps:$4 sm:$0xff]  }
 0x256   : > { %4841 = vmatpush2.bf16.msra.mxu0 %v7317_v39  ;;  %v7362_v39 = vld [vmem:[#allocation2 + $0x1100] ss:$40 sps:$4 sm:$0xff]  }
 0x257   : > { %4884 = vmatpush2.bf16.msra.mxu1 %v7320_v40  ;;  %4842 = vmatprep.subr.bf16.mxu0 %v7325_v47 }
 0x258   : > { %4885 = vmatprep.subr.bf16.mxu1 %v7328_v48  ;;  %v7367_v48 = vld [vmem:[#allocation2 + $0xbb4] ss:$40 sps:$4 sm:$0xff]  }
 0x25a   : > { %4843 = vmatpush2.bf16.msra.mxu0 %v7323_v49  ;;  %v7370_v49 = vld [vmem:[#allocation2 + $0x10b4] ss:$40 sps:$4 sm:$0xff]  }
 0x25b   : > { %4886 = vmatpush2.bf16.msra.mxu1 %v7326_v52  ;;  %4844 = vmatprep.subr.bf16.mxu0 %v7331_v58  ;;  %v7368_v58 = vld [vmem:[#allocation2 + $0x10b0] ss:$40 sps:$4 sm:$0xff]  }
 0x25c   : > { %4887 = vmatprep.subr.bf16.mxu1 %v7334_v34 }
 0x25e   : > { %4845 = vmatpush2.bf16.msra.mxu0 %v7329_v53  ;;  %v7373_v53 = vld [vmem:[#allocation2 + $0xb64] ss:$40 sps:$4 sm:$0xff]  }
 0x25f   : > { %4888 = vmatpush2.bf16.msra.mxu1 %v7332_v54  ;;  %4846 = vmatprep.subr.bf16.mxu0 %v7337_v59  ;;  %v7376_v54 = vld [vmem:[#allocation2 + $0x1064] ss:$40 sps:$4 sm:$0xff]  }
 0x260   : > { %4889 = vmatprep.subr.bf16.mxu1 %v7340_v60  ;;  %v7371_v60 = vld [vmem:[#allocation2 + $0xb60] ss:$40 sps:$4 sm:$0xff]  }
 0x262   : > { %4847 = vmatpush2.bf16.msra.mxu0 %v7335_v61  ;;  %v7382_v61 = vld [vmem:[#allocation2 + $0x1014] ss:$40 sps:$4 sm:$0xff]  }
 0x263   : > { %4890 = vmatpush2.bf16.msra.mxu1 %v7338_v0  ;;  %4848 = vmatprep.subr.bf16.mxu0 %v7343_v1  ;;  %v7380_v0 = vld [vmem:[#allocation2 + $0x1010] ss:$40 sps:$4 sm:$0xff]   ;;  %v7385_v1 = vld [vmem:[#allocation2 + $0xac4] ss:$40 sps:$4 sm:$0xff]  }
 0x264   : > { %4891 = vmatprep.subr.bf16.mxu1 %v7346_v2  ;;  %v7388_v2 = vld [vmem:[#allocation2 + $0xfc4] ss:$40 sps:$4 sm:$0xff]  }
 0x266   : > { %4849 = vmatpush2.bf16.msra.mxu0 %v7341_v43  ;;  %v7383_v43 = vld [vmem:[#allocation2 + $0xac0] ss:$40 sps:$4 sm:$0xff]  }
 0x267   : > { %4892 = vmatpush2.bf16.msra.mxu1 %v7344_v3  ;;  %4850 = vmatprep.subr.bf16.mxu0 %v7349_v6  ;;  %v7386_v3 = vld [vmem:[#allocation2 + $0xfc0] ss:$40 sps:$4 sm:$0xff]   ;;  %v7391_v6 = vld [vmem:[#allocation2 + $0xa74] ss:$40 sps:$4 sm:$0xff]  }
 0x268   : > { %4893 = vmatprep.subr.bf16.mxu1 %v7352_v7  ;;  %v7394_v7 = vld [vmem:[#allocation2 + $0xf74] ss:$40 sps:$4 sm:$0xff]  }
 0x26a   : > { %4851 = vmatpush2.bf16.msra.mxu0 %v7347_v10  ;;  %v7389_v10 = vld [vmem:[#allocation2 + $0xa70] ss:$40 sps:$4 sm:$0xff]  }
 0x26b   : > { %4894 = vmatpush2.bf16.msra.mxu1 %v7350_v11  ;;  %4906 = vmatprep.subr.bf16.mxu0 %v7355_v14  ;;  %v7392_v11 = vld [vmem:[#allocation2 + $0xf70] ss:$40 sps:$4 sm:$0xff]   ;;  %v7397_v14 = vld [vmem:[#allocation2 + $0xa24] ss:$40 sps:$4 sm:$0xff]  }
 0x26c   : > { %4949 = vmatprep.subr.bf16.mxu1 %v7358_v15  ;;  %v7400_v15 = vld [vmem:[#allocation2 + $0xf24] ss:$40 sps:$4 sm:$0xff]  }
 0x26d   : > { %v4596_v26 = vpop.f32.mrf.mxu0  ;;  %4853 = vmatmul.mubr.bf16.vlgmr.msra.gmra.mxu0 %v7710_v8 }
 0x26e   : > { %v4639_v28 = vpop.f32.mrf.mxu1  ;;  %4896 = vmatmul.mubr.bf16.vlgmr.msra.gmra.mxu1 %v7712_v9  ;;  %v4597_v22 = vadd.f32 %v4596_v26, %v7824_v25  ;;  %4907 = vmatpush1.bf16.msra.mxu0 %v7353_v16  ;;  %v7365_v25 = vld [vmem:[#allocation2 + $0xbb0] ss:$40 sps:$4 sm:$0xff]   ;;  %v7395_v16 = vld [vmem:[#allocation2 + $0xa20] ss:$40 sps:$4 sm:$0xff]  }
 0x26f   : > { %4950 = vmatpush1.bf16.msra.mxu1 %v7356_v17  ;;  %v7841_v40 = vpop.f32.mrf.mxu0  ;;  %4908 = vmatprep.subr.bf16.mxu0 %v7361_v23  ;;  %v7398_v17 = vld [vmem:[#allocation2 + $0xf20] ss:$40 sps:$4 sm:$0xff]   ;;  %v7403_v23 = vld [vmem:[#allocation2 + $0xed4] ss:$40 sps:$4 sm:$0xff]   ;;  %v7401_v26 = vld [vmem:[#allocation2 + $0xed0] ss:$40 sps:$4 sm:$0xff]  }
 0x270   : > { %v7843_v47 = vpop.f32.mrf.mxu1  ;;  %4951 = vmatprep.subr.bf16.mxu1 %v7364_v24  ;;  %v7845_v52 = vadd.f32 %v4639_v28, %v4597_v22  ;;  %4938 = vmatprep.mubr.bf16.mxu0 %v7730_v41  ;;  %v7374_v41 = vld [vmem:[#allocation2 + $0x1060] ss:$40 sps:$4 sm:$0xff]   ;;  %v7406_v24 = vld [vmem:[#allocation2 + $0x13d4] ss:$40 sps:$4 sm:$0xff]   ;;  %v7404_v28 = vld [vmem:[#allocation2 + $0x13d0] ss:$40 sps:$4 sm:$0xff]  }
 0x271   : > { %4981 = vmatprep.mubr.bf16.mxu1 %v7734_v42  ;;  %v4600_v8 = vpop.f32.mrf.mxu0  ;;  %v7379_v42 = vld [vmem:[#allocation2 + $0xb14] ss:$40 sps:$4 sm:$0xff]   ;;  %v7409_v22 = vld [vmem:[#allocation2 + $0xe84] ss:$40 sps:$4 sm:$0xff]  }
 0x272   : > { %v4601_v9 = vadd.f32 %v4600_v8, %v7832_v46  ;;  %4909 = vmatpush1.bf16.msra.mxu0 %v7359_v38  ;;  %v4643_v34 = vpop.f32.mrf.mxu1  ;;  %v7377_v46 = vld [vmem:[#allocation2 + $0xb10] ss:$40 sps:$4 sm:$0xff]   ;;  %v7412_v38 = vld [vmem:[#allocation2 + $0x1384] ss:$40 sps:$4 sm:$0xff]   ;;  %v7418_v8 = vld [vmem:[#allocation2 + $0x1334] ss:$40 sps:$4 sm:$0xff]  }
 0x273   : > { %4952 = vmatpush1.bf16.msra.mxu1 %v7362_v39  ;;  %4910 = vmatprep.subr.bf16.mxu0 %v7367_v48  ;;  %v7407_v39 = vld [vmem:[#allocation2 + $0xe80] ss:$40 sps:$4 sm:$0xff]  }
 0x274   : > { %4953 = vmatprep.subr.bf16.mxu1 %v7370_v49  ;;  %v7850_v59 = vadd.f32 %v4643_v34, %v4601_v9  ;;  %v7410_v48 = vld [vmem:[#allocation2 + $0x1380] ss:$40 sps:$4 sm:$0xff]   ;;  %v7415_v49 = vld [vmem:[#allocation2 + $0xe34] ss:$40 sps:$4 sm:$0xff]   ;;  %v7413_v9 = vld [vmem:[#allocation2 + $0xe30] ss:$40 sps:$4 sm:$0xff]  }
 0x275   : > { %v7424_v34 = vld [vmem:[#allocation2 + $0x12e4] ss:$40 sps:$4 sm:$0xff]  }
 0x276   : > { %4911 = vmatpush1.bf16.msra.mxu0 %v7365_v25  ;;  %v7416_v25 = vld [vmem:[#allocation2 + $0x1330] ss:$40 sps:$4 sm:$0xff]  }
 0x277   : > { %4954 = vmatpush1.bf16.msra.mxu1 %v7368_v58  ;;  %4912 = vmatprep.subr.bf16.mxu0 %v7373_v53  ;;  %v7421_v58 = vld [vmem:[#allocation2 + $0xde4] ss:$40 sps:$4 sm:$0xff]   ;;  %v7419_v53 = vld [vmem:[#allocation2 + $0xde0] ss:$40 sps:$4 sm:$0xff]  }
 0x278   : > { %4955 = vmatprep.subr.bf16.mxu1 %v7376_v54  ;;  %v7422_v54 = vld [vmem:[#allocation2 + $0x12e0] ss:$40 sps:$4 sm:$0xff]  }
 0x27a   : > { %4913 = vmatpush1.bf16.msra.mxu0 %v7371_v60  ;;  %v7427_v60 = vld [vmem:[#allocation2 + $0xd94] ss:$40 sps:$4 sm:$0xff]  }
 0x27b   : > { %4956 = vmatpush1.bf16.msra.mxu1 %v7374_v41  ;;  %4914 = vmatprep.subr.bf16.mxu0 %v7379_v42  ;;  %v7430_v41 = vld [vmem:[#allocation2 + $0x1294] ss:$40 sps:$4 sm:$0xff]   ;;  %v7425_v42 = vld [vmem:[#allocation2 + $0xd90] ss:$40 sps:$4 sm:$0xff]  }
 0x27c   : > { %4957 = vmatprep.subr.bf16.mxu1 %v7382_v61  ;;  %v7428_v61 = vld [vmem:[#allocation2 + $0x1290] ss:$40 sps:$4 sm:$0xff]  }
 0x27e   : > { %4915 = vmatpush1.bf16.msra.mxu0 %v7377_v46  ;;  %v7433_v46 = vld [vmem:[#allocation2 + $0xd44] ss:$40 sps:$4 sm:$0xff]  }
 0x27f   : > { %4958 = vmatpush1.bf16.msra.mxu1 %v7380_v0  ;;  %4916 = vmatprep.subr.bf16.mxu0 %v7385_v1  ;;  %v7436_v0 = vld [vmem:[#allocation2 + $0x1244] ss:$40 sps:$4 sm:$0xff]   ;;  %v7431_v1 = vld [vmem:[#allocation2 + $0xd40] ss:$40 sps:$4 sm:$0xff]  }
 0x280   : > { %4959 = vmatprep.subr.bf16.mxu1 %v7388_v2  ;;  %v7434_v2 = vld [vmem:[#allocation2 + $0x1240] ss:$40 sps:$4 sm:$0xff]  }
 0x282   : > { %4917 = vmatpush1.bf16.msra.mxu0 %v7383_v43  ;;  %v7439_v43 = vld [vmem:[#allocation2 + $0xcf4] ss:$40 sps:$4 sm:$0xff]  }
 0x283   : > { %4960 = vmatpush1.bf16.msra.mxu1 %v7386_v3  ;;  %4918 = vmatprep.subr.bf16.mxu0 %v7391_v6  ;;  %v7442_v3 = vld [vmem:[#allocation2 + $0x11f4] ss:$40 sps:$4 sm:$0xff]   ;;  %v7437_v6 = vld [vmem:[#allocation2 + $0xcf0] ss:$40 sps:$4 sm:$0xff]  }
 0x284   : > { %4961 = vmatprep.subr.bf16.mxu1 %v7394_v7  ;;  %v7440_v7 = vld [vmem:[#allocation2 + $0x11f0] ss:$40 sps:$4 sm:$0xff]  }
 0x286   : > { %4919 = vmatpush1.bf16.msra.mxu0 %v7389_v10  ;;  %v7445_v10 = vld [vmem:[#allocation2 + $0xca4] ss:$40 sps:$4 sm:$0xff]  }
 0x287   : > { %4962 = vmatpush1.bf16.msra.mxu1 %v7392_v11  ;;  %4920 = vmatprep.subr.bf16.mxu0 %v7397_v14  ;;  %v7448_v11 = vld [vmem:[#allocation2 + $0x11a4] ss:$40 sps:$4 sm:$0xff]   ;;  %v7443_v14 = vld [vmem:[#allocation2 + $0xca0] ss:$40 sps:$4 sm:$0xff]  }
 0x288   : > { %4963 = vmatprep.subr.bf16.mxu1 %v7400_v15  ;;  %v7446_v15 = vld [vmem:[#allocation2 + $0x11a0] ss:$40 sps:$4 sm:$0xff]  }
 0x28a   : > { %4921 = vmatpush1.bf16.msra.mxu0 %v7395_v16  ;;  %v7449_v16 = vld [vmem:[#allocation4 + $0x78] sm:$0xff]  }
 0x28b   : > { %4964 = vmatpush1.bf16.msra.mxu1 %v7398_v17  ;;  %4922 = vmatprep.subr.bf16.mxu0 %v7403_v23  ;;  %v7450_v17 = vld [vmem:[#allocation4 + $0x38] sm:$0xff]   ;;  %v4602_v23 = vpop.f32.mrf.mxu0 }
 0x28c   : > { %4965 = vmatprep.subr.bf16.mxu1 %v7406_v24  ;;  %v4645_v24 = vpop.f32.mrf.mxu1 }
 0x28e   : > { %4923 = vmatpush2.bf16.msra.mxu0 %v7401_v26  ;;  %v7451_v26 = vld [vmem:[#allocation4 + $0x70] sm:$0xff]  }
 0x28f   : > { %4966 = vmatpush2.bf16.msra.mxu1 %v7404_v28  ;;  %4924 = vmatprep.subr.bf16.mxu0 %v7409_v22 }
 0x290   : > { %4967 = vmatprep.subr.bf16.mxu1 %v7412_v38  ;;  %v7452_v38 = vld [vmem:[#allocation4 + $0x30] sm:$0xff]  }
 0x292   : > { %4925 = vmatpush2.bf16.msra.mxu0 %v7407_v39 }
 0x293   : > { %4968 = vmatpush2.bf16.msra.mxu1 %v7410_v48  ;;  %4926 = vmatprep.subr.bf16.mxu0 %v7415_v49  ;;  %v7453_v49 = vld [vmem:[#allocation4 + $0x68] sm:$0xff]  }
 0x294   : > { %4969 = vmatprep.subr.bf16.mxu1 %v7418_v8 }
 0x296   : > { %4927 = vmatpush2.bf16.msra.mxu0 %v7413_v9 }
 0x297   : > { %4970 = vmatpush2.bf16.msra.mxu1 %v7416_v25  ;;  %4928 = vmatprep.subr.bf16.mxu0 %v7421_v58  ;;  %v7454_v58 = vld [vmem:[#allocation4 + $0x28] sm:$0xff]  }
 0x298   : > { %4971 = vmatprep.subr.bf16.mxu1 %v7424_v34 }
 0x29a   : > { %4929 = vmatpush2.bf16.msra.mxu0 %v7419_v53 }
 0x29b   : > { %4972 = vmatpush2.bf16.msra.mxu1 %v7422_v54  ;;  %4930 = vmatprep.subr.bf16.mxu0 %v7427_v60  ;;  %v7455_v54 = vld [vmem:[#allocation4 + $0x60] sm:$0xff]  }
 0x29c   : > { %4973 = vmatprep.subr.bf16.mxu1 %v7430_v41  ;;  %v7458_v41 = vld [vmem:[#allocation4 + $0x18] sm:$0xff]  }
 0x29e   : > { %4931 = vmatpush2.bf16.msra.mxu0 %v7425_v42  ;;  %v7459_v42 = vld [vmem:[#allocation4 + $0x50] sm:$0xff]  }
 0x29f   : > { %4974 = vmatpush2.bf16.msra.mxu1 %v7428_v61  ;;  %4932 = vmatprep.subr.bf16.mxu0 %v7433_v46  ;;  %v7460_v61 = vld [vmem:[#allocation4 + $0x10] sm:$0xff]   ;;  %v7461_v46 = vld [vmem:[#allocation4 + $0x48] sm:$0xff]  }
 0x2a0   : > { %4975 = vmatprep.subr.bf16.mxu1 %v7436_v0  ;;  %v7462_v0 = vld [vmem:[#allocation4 + $0x8] sm:$0xff]  }
 0x2a2   : > { %4933 = vmatpush2.bf16.msra.mxu0 %v7431_v1  ;;  %v7463_v1 = vld [vmem:[#allocation4 + $0x40] sm:$0xff]  }
 0x2a3   : > { %4976 = vmatpush2.bf16.msra.mxu1 %v7434_v2  ;;  %4934 = vmatprep.subr.bf16.mxu0 %v7439_v43  ;;  %v7464_v2 = vld [vmem:[#allocation4] sm:$0xff]   ;;  %v4556_v43 = vadd.f32 %v7828_v33, %v7826_v32 }
 0x2a4   : > { %4977 = vmatprep.subr.bf16.mxu1 %v7442_v3  ;;  %v4560_v3 = vadd.f32 %v7836_v19, %v7834_v18 }
 0x2a6   : > { %4935 = vmatpush2.bf16.msra.mxu0 %v7437_v6  ;;  %v4210_v6 = vadd.f32 %v7764_v31, %v7762_v30  ;;  %v4212_v30 = vadd.f32 %v7768_v37, %v7766_v36  ;;  %v7465_v37 = vld [vmem:[#allocation4 + $0xf8] sm:$0xff]  }
 0x2a7   : > { %4978 = vmatpush2.bf16.msra.mxu1 %v7440_v7  ;;  %4936 = vmatprep.subr.bf16.mxu0 %v7445_v10  ;;  %v4599_v7 = vadd.f32 %v7841_v40, %v4556_v43  ;;  %v4214_v10 = vadd.f32 %v7772_v45, %v7770_v44 }
 0x2a8   : > { %4979 = vmatprep.subr.bf16.mxu1 %v7448_v11  ;;  %v4603_v11 = vadd.f32 %v4602_v23, %v4560_v3  ;;  %v4255_v44 = vadd.f32 %v7782_v62, %v4212_v30 }
 0x2aa   : > { %4937 = vmatpush2.bf16.msra.mxu0 %v7443_v14  ;;  %v4253_v14 = vadd.f32 %v7778_v56, %v4210_v6  ;;  %v4216_v56 = vadd.f32 %v7776_v51, %v7774_v50  ;;  %v7474_v6 = vld [vmem:[#allocation4 + $0xe0] sm:$0xff]  }
 0x2ab   : > { %4980 = vmatpush2.bf16.msra.mxu1 %v7446_v15  ;;  %6365 = vmatprep.subr.bf16.mxu0 %v7449_v16  ;;  %v4257_v15 = vadd.f32 %v7786_v4, %v4214_v10  ;;  %v4642_v16 = vadd.f32 %v7843_v47, %v4599_v7  ;;  %v7475_v10 = vld [vmem:[#allocation4 + $0xa0] sm:$0xff]  }
 0x2ac   : > { %v4296_v32 = vadd.f32 %v7780_v57, %v4253_v14  ;;  %v4259_v57 = vadd.f32 %v7790_v12, %v4216_v56  ;;  %6387 = vmatprep.subr.bf16.mxu1 %v7465_v37  ;;  %v7477_v14 = vld [vmem:[#allocation4 + $0xd8] sm:$0xff]  }
 0x2ad   : > { %v4682_v28 = vpop.f32.mrf.mxu0  ;;  %4939 = vmatmul.mubr.bf16.vlgmr.msra.gmra.mxu0 %v7740_v20  ;;  %v7456_v20 = vld [vmem:[#allocation4 + $0x20] sm:$0xff]   ;;  %v4300_v33 = vadd.f32 %v7788_v5, %v4257_v15  ;;  %v5002_v18 = vmul.f32 %v4642_v16, %v4642_v16  ;;  %v7478_v15 = vld [vmem:[#allocation4 + $0x98] sm:$0xff]  }
 0x2ae   : > { %v4725_v22 = vpop.f32.mrf.mxu1  ;;  %4982 = vmatmul.mubr.bf16.vlgmr.msra.gmra.mxu1 %v7744_v21  ;;  %6366 = vmatpush3.bf16.msra.mxu0 %v7450_v17  ;;  %v7457_v21 = vld [vmem:[#allocation4 + $0x58] sm:$0xff]   ;;  %v4646_v17 = vadd.f32 %v4645_v24, %v4603_v11  ;;  %v4992_v31 = vmul.f32 %v4296_v32, %v4296_v32  ;;  %v4298_v24 = vadd.f32 %v7784_v63, %v4255_v44  ;;  %v7603_v63 = vmov 0.0   ;;  %v7481_v32 = vld [vmem:[#allocation4 + $0x90] sm:$0xff]  }
 0x2af   : > { %v4684_v39 = vpop.f32.mrf.mxu0  ;;  %6367 = vmatprep.subr.bf16.mxu0 %v7451_v26  ;;  %v4997_v40 = vmul.f32 %v4300_v33, %v4300_v33  ;;  %v4726_v47 = vadd.f32 %v4725_v22, %v4682_v28  ;;  %v4302_v12 = vadd.f32 %v7792_v13, %v4259_v57  ;;  %v7483_v33 = vld [vmem:[#allocation4 + $0xc8] sm:$0xff]   ;;  %v7486_v57 = vld [vmem:[#allocation4 + $0xc0] sm:$0xff]  }
 0x2b0   : > { %v4727_v48 = vpop.f32.mrf.mxu1  ;;  %v5007_v19 = vmul.f32 %v4646_v17, %v4646_v17  ;;  %v7875_v45 = vadd.f32 %v5002_v18, %v4992_v31 }
 0x2b1   : > { %v7854_v8 = vadd.f32 %v4727_v48, %v4684_v39  ;;  %v4686_v9 = vpop.f32.mrf.mxu0  ;;  %v4993_v48 = vmul.f32 %v4298_v24, %v4298_v24 }
 0x2b2   : > { %v4729_v25 = vpop.f32.mrf.mxu1  ;;  %6368 = vmatpush3.bf16.msra.mxu0 %v7452_v38  ;;  %v7879_v4 = vadd.f32 %v5007_v19, %v4997_v40  ;;  %7489 = vrsqrt.f32 %v7875_v45  ;;  %v7466_v38 = vld [vmem:[#allocation4 + $0xb8] sm:$0xff]   ;;  %vm5024_vm0 = vcmp.eq.f32.partialorder %v7875_v45, inf  ;;  %v5027_v44 = vand.u32 2147483648, %v7875_v45 }
 0x2b3   : > { %v4688_v34 = vpop.f32.mrf.mxu0  ;;  %6369 = vmatprep.subr.bf16.mxu0 %v7453_v49  ;;  %v4730_v39 = vadd.f32 %v4729_v25, %v4686_v9  ;;  %6388 = vmatpush3.bf16.msra.mxu1 %v7466_v38  ;;  %v4994_v9 = vmul.f32 %v7809_v29, %v7809_v29  ;;  %v7472_v29 = vld [vmem:[#allocation4 + $0xa8] sm:$0xff]   ;;  %vm5026_vm2 = vcmp.eq.f32.partialorder %v7875_v45, 0.0 }
 0x2b4   : > { %v4731_v53 = vpop.f32.mrf.mxu1  ;;  %7491 = vrsqrt.f32 %v7879_v4  ;;  %vm5059_vm1 = vcmp.eq.f32.partialorder %v7879_v4, inf  ;;  %v5062_v56 = vand.u32 2147483648, %v7879_v4  ;;  %vm5061_vm3 = vcmp.eq.f32.partialorder %v7879_v4, 0.0 }
 0x2b5   : > { %v7856_v60 = vadd.f32 %v4731_v53, %v4688_v34  ;;  %v7468_v53 = vld [vmem:[#allocation4 + $0xf0] sm:$0xff]  }
 0x2b6   : > { %6370 = vmatpush3.bf16.msra.mxu0 %v7454_v58  ;;  %6389 = vmatprep.subr.bf16.mxu1 %v7468_v53 }
 0x2b7   : > { %6371 = vmatprep.subr.bf16.mxu0 %v7455_v54  ;;  %v7469_v54 = vld [vmem:[#allocation4 + $0xb0] sm:$0xff]  }
 0x2b8   : > { %6390 = vmatpush3.bf16.msra.mxu1 %v7469_v54 }
 0x2ba   : > { %6372 = vmatpush3.bf16.msra.mxu0 %v7456_v20 }
 0x2bb   : > { %6373 = vmatprep.subr.bf16.mxu0 %v7457_v21 }
 0x2be   : > { %6374 = vmatpush3.bf16.msra.mxu0 %v7458_v41  ;;  %v4998_v41 = vmul.f32 %v4302_v12, %v4302_v12 }
 0x2bf   : > { %6375 = vmatprep.subr.bf16.mxu0 %v7459_v42  ;;  %v7490_v7 = vpop.eup %7489 }
 0x2c0   : > { %v5023_v16 = vmul.f32 %v7490_v7, %v7875_v45 }
 0x2c1   : > { %v7492_v11 = vpop.eup %7491 }
 0x2c2   : > { %6376 = vmatpush3.bf16.msra.mxu0 %v7460_v61  ;;  %v5058_v17 = vmul.f32 %v7492_v11, %v7879_v4  ;;  %v5025_v30 = vsel %vm5024_vm0, %v7875_v45, %v5023_v16 }
 0x2c3   : > { %6377 = vmatprep.subr.bf16.mxu0 %v7461_v46  ;;  %v5028_v24 = vsel %vm5026_vm2, %v5027_v44, %v5025_v30  ;;  %v4996_v44 = vmul.f32 %v7845_v52, %v7845_v52 }
 0x2c4   : > { %v5060_v31 = vsel %vm5059_vm1, %v7879_v4, %v5058_v17  ;;  %v7487_v4 = vld [vmem:[#allocation4 + $0x80] sm:$0xff]  }
 0x2c6   : > { %6378 = vmatpush3.bf16.msra.mxu0 %v7462_v0 }
 0x2c7   : > { %6379 = vmatprep.subr.bf16.mxu0 %v7463_v1  ;;  %v7471_v1 = vld [vmem:[#allocation4 + $0xe8] sm:$0xff]  }
 0x2c8   : > { %6391 = vmatprep.subr.bf16.mxu1 %v7471_v1 }
 0x2c9   : > { %6392 = vmatpush3.bf16.msra.mxu1 %v7472_v29 }
 0x2ca   : > { %6380 = vmatpush3.bf16.msra.mxu0 %v7464_v2  ;;  %v4999_v2 = vmul.f32 %v7817_v27, %v7817_v27  ;;  %6393 = vmatprep.subr.bf16.mxu1 %v7474_v6  ;;  %v7480_v27 = vld [vmem:[#allocation4 + $0xd0] sm:$0xff]  }
 0x2cb   : > { %6418 = vmatprep.subr.bf16.mxu0 %v7603_v63 }
 0x2cd   : > { %6394 = vmatpush3.bf16.msra.mxu1 %v7475_v10 }
 0x2ce   : > { %6395 = vmatprep.subr.bf16.mxu1 %v7477_v14 }
 0x2d1   : > { %6396 = vmatpush3.bf16.msra.mxu1 %v7478_v15 }
 0x2d2   : > { %6397 = vmatprep.subr.bf16.mxu1 %v7480_v27 }
 0x2d5   : > { %6398 = vmatpush3.bf16.msra.mxu1 %v7481_v32 }
 0x2d6   : > { %6399 = vmatprep.subr.bf16.mxu1 %v7483_v33 }
 0x2ed   : > { %v4768_v5 = vpop.f32.mrf.mxu0 }
 0x2ee   : > { %v4811_v23 = vpop.f32.mrf.mxu1  ;;  %v4769_v36 = vadd.f32 %v4768_v5, %v4726_v47  ;;  %v7484_v47 = vld [vmem:[#allocation4 + $0x88] sm:$0xff]  }
 0x2ef   : > { %v4770_v62 = vpop.f32.mrf.mxu0  ;;  %6400 = vmatpush3.bf16.msra.mxu1 %v7484_v47 }
 0x2f0   : > { %v4813_v26 = vpop.f32.mrf.mxu1  ;;  %v4812_v50 = vadd.f32 %v4811_v23, %v4769_v36  ;;  %v4771_v51 = vadd.f32 %v4770_v62, %v7854_v8  ;;  %v5063_v36 = vsel %vm5061_vm3, %v5062_v56, %v5060_v31  ;;  %6401 = vmatprep.subr.bf16.mxu1 %v7486_v57 }
 0x2f1   : > { %v4772_v28 = vpop.f32.mrf.mxu0  ;;  %v5092_v53 = vpack.c.bf16 %v5063_v36, %v5028_v24  ;;  %v5000_v24 = vmul.f32 %v7820_v55, %v7820_v55 }
 0x2f2   : > { %v4815_v22 = vpop.f32.mrf.mxu1  ;;  %v5003_v49 = vmul.f32 %v4812_v50, %v4812_v50  ;;  %v4814_v58 = vadd.f32 %v4813_v26, %v4771_v51  ;;  %v4773_v34 = vadd.f32 %v4772_v28, %v4730_v39 }
 0x2f3   : > { %v4774_v25 = vpop.f32.mrf.mxu0  ;;  %6402 = vmatpush3.bf16.msra.mxu1 %v7487_v4 }
 0x2f4   : > { %v7890_v8 = vadd.f32 %v5003_v49, %v4993_v48  ;;  %v5004_v20 = vmul.f32 %v4814_v58, %v4814_v58  ;;  %v4816_v13 = vadd.f32 %v4815_v22, %v4773_v34  ;;  %v4775_v21 = vadd.f32 %v4774_v25, %v7856_v60  ;;  %v4817_v42 = vpop.f32.mrf.mxu1  ;;  %v7467_v58 = vld [vmem:[#allocation4 + $0x138] sm:$0xff]  }
 0x2f6   : > { %7493 = vrsqrt.f32 %v7890_v8  ;;  %v7894_v61 = vadd.f32 %v5004_v20, %v4994_v9  ;;  %v5008_v46 = vmul.f32 %v4816_v13, %v4816_v13  ;;  %v4818_v0 = vadd.f32 %v4817_v42, %v4775_v21  ;;  %v7473_v20 = vld [vmem:[#allocation4 + $0x128] sm:$0xff]   ;;  %v7476_v13 = vld [vmem:[#allocation4 + $0x120] sm:$0xff]   ;;  %v7479_v21 = vld [vmem:[#allocation4 + $0x118] sm:$0xff]  }
 0x2f7   : > { %vm5031_vm4 = vcmp.eq.f32.partialorder %v7890_v8, inf  ;;  %vm5033_vm5 = vcmp.eq.f32.partialorder %v7890_v8, 0.0  ;;  %v5034_v62 = vand.u32 2147483648, %v7890_v8  ;;  %v7485_v42 = vld [vmem:[#allocation4 + $0x108] sm:$0xff]  }
 0x2f8   : > { %7495 = vrsqrt.f32 %v7894_v61  ;;  %v5018_v43 = vadd.f32 %v5008_v46, %v4998_v41  ;;  %v5009_v3 = vmul.f32 %v4818_v0, %v4818_v0  ;;  %vm5038_vm7 = vcmp.eq.f32.partialorder %v7894_v61, inf  ;;  %v7482_v41 = vld [vmem:[#allocation4 + $0x110] sm:$0xff]  }
 0x2f9   : > { %v5041_v39 = vand.u32 2147483648, %v7894_v61  ;;  %vm5040_vm10 = vcmp.eq.f32.partialorder %v7894_v61, 0.0 }
 0x2fa   : > { %7497 = vrsqrt.f32 %v5018_v43  ;;  %v7899_v60 = vadd.f32 %v5009_v3, %v4999_v2  ;;  %vm5066_vm6 = vcmp.eq.f32.partialorder %v5018_v43, inf  ;;  %v5069_v45 = vand.u32 2147483648, %v5018_v43 }
 0x2fb   : > { %vm5068_vm8 = vcmp.eq.f32.partialorder %v5018_v43, 0.0 }
 0x2fc   : > { %7499 = vrsqrt.f32 %v7899_v60  ;;  %vm5073_vm9 = vcmp.eq.f32.partialorder %v7899_v60, inf  ;;  %v5076_v48 = vand.u32 2147483648, %v7899_v60  ;;  %vm5075_vm11 = vcmp.eq.f32.partialorder %v7899_v60, 0.0 }
 0x303   : > { %v7494_v18 = vpop.eup %7493 }
 0x304   : > { %v5030_v19 = vmul.f32 %v7494_v18, %v7890_v8 }
 0x305   : > { %v7496_v40 = vpop.eup %7495 }
 0x306   : > { %v5037_v5 = vmul.f32 %v7496_v40, %v7894_v61  ;;  %v5032_v37 = vsel %vm5031_vm4, %v7890_v8, %v5030_v19  ;;  %v7470_v8 = vld [vmem:[#allocation4 + $0x130] sm:$0xff]  }
 0x307   : > { %v7498_v23 = vpop.eup %7497  ;;  %v5035_v28 = vsel %vm5033_vm5, %v5034_v62, %v5032_v37 }
 0x308   : > { %v5065_v26 = vmul.f32 %v7498_v23, %v5018_v43  ;;  %v5039_v51 = vsel %vm5038_vm7, %v7894_v61, %v5037_v5  ;;  %v7488_v61 = vld [vmem:[#allocation4 + $0x100] sm:$0xff]  }
 0x309   : > { %v7500_v38 = vpop.eup %7499  ;;  %v7927_v9 = vsel %vm5040_vm10, %v5041_v39, %v5039_v51 }
 0x30a   : > { %v5067_v50 = vsel %vm5066_vm6, %v5018_v43, %v5065_v26  ;;  %v5072_v12 = vmul.f32 %v7500_v38, %v7899_v60  ;;  %v5001_v26 = vmul.f32 %v7850_v59, %v7850_v59 }
 0x30b   : > { %v5070_v22 = vsel %vm5068_vm8, %v5069_v45, %v5067_v50 }
 0x30c   : > { %v5093_v49 = vpack.c.bf16 %v5070_v22, %v5035_v28  ;;  %v5074_v34 = vsel %vm5073_vm9, %v7899_v60, %v5072_v12 }
 0x30d   : > { %v7929_v25 = vsel %vm5075_vm11, %v5076_v48, %v5074_v34 }
 0x30e   : > { %5449 = vmatprep.mubr.bf16.mxu0 %v5093_v49  ;;  %v5094_v54 = vpack.c.bf16 %v7929_v25, %v7927_v9 }
 0x30f   : > { %5450 = vmatmul.mubr.bf16.vlgmr.msra.gmra.mxu0 %v5092_v53 }
 0x310   : > { %6419 = vmatpush3.bf16.msra.mxu0 %v7467_v58  ;;  %6434 = vmatprep.mubr.msk.bf16.mxu0 %vm7604_vm12, %v7603_v63 }
 0x311   : > { %6420 = vmatprep.subr.bf16.mxu0 %v7603_v63 }
 0x314   : > { %6421 = vmatpush3.bf16.msra.mxu0 %v7470_v8 }
 0x315   : > { %6422 = vmatprep.subr.bf16.mxu0 %v7603_v63 }
 0x318   : > { %6423 = vmatpush3.bf16.msra.mxu0 %v7473_v20 }
 0x319   : > { %6424 = vmatprep.subr.bf16.mxu0 %v7603_v63 }
 0x31c   : > { %6425 = vmatpush3.bf16.msra.mxu0 %v7476_v13 }
 0x31d   : > { %6426 = vmatprep.subr.bf16.mxu0 %v7603_v63 }
 0x320   : > { %6427 = vmatpush3.bf16.msra.mxu0 %v7479_v21 }
 0x321   : > { %6428 = vmatprep.subr.bf16.mxu0 %v7603_v63 }
 0x324   : > { %6429 = vmatpush3.bf16.msra.mxu0 %v7482_v41 }
 0x325   : > { %6430 = vmatprep.subr.bf16.mxu0 %v7603_v63 }
 0x328   : > { %6431 = vmatpush3.bf16.msra.mxu0 %v7485_v42 }
 0x329   : > { %6432 = vmatprep.subr.bf16.mxu0 %v7603_v63  ;;  %v4995_v63 = vmul.f32 %v7814_v35, %v7814_v35 }
 0x32c   : > { %6433 = vmatpush3.bf16.msra.mxu0 %v7488_v61 }
 0x32d   : > { %v4854_v46 = vpop.f32.mrf.mxu0 }
 0x32e   : > { %v4897_v0 = vpop.f32.mrf.mxu1 }
 0x32f   : > { %v4856_v1 = vpop.f32.mrf.mxu0  ;;  %v4898_v6 = vadd.f32 %v4897_v0, %v4854_v46 }
 0x330   : > { %v4899_v29 = vpop.f32.mrf.mxu1 }
 0x331   : > { %v4858_v2 = vpop.f32.mrf.mxu0  ;;  %v4900_v11 = vadd.f32 %v4899_v29, %v4856_v1 }
 0x332   : > { %v4901_v43 = vpop.f32.mrf.mxu1 }
 0x333   : > { %v4860_v3 = vpop.f32.mrf.mxu0  ;;  %v4902_v16 = vadd.f32 %v4901_v43, %v4858_v2 }
 0x334   : > { %v4903_v60 = vpop.f32.mrf.mxu1 }
 0x335   : > { %v4904_v19 = vadd.f32 %v4903_v60, %v4860_v3 }
 0x36d   : > { %v4940_v7 = vpop.f32.mrf.mxu0 }
 0x36e   : > { %v4983_v10 = vpop.f32.mrf.mxu1  ;;  %v4941_v14 = vadd.f32 %v4940_v7, %v4898_v6 }
 0x36f   : > { %v4942_v15 = vpop.f32.mrf.mxu0 }
 0x370   : > { %v4985_v27 = vpop.f32.mrf.mxu1  ;;  %v4984_v17 = vadd.f32 %v4983_v10, %v4941_v14  ;;  %v4943_v32 = vadd.f32 %v4942_v15, %v4900_v11 }
 0x371   : > { %v4944_v33 = vpop.f32.mrf.mxu0 }
 0x372   : > { %v4987_v18 = vpop.f32.mrf.mxu1  ;;  %v5005_v30 = vmul.f32 %v4984_v17, %v4984_v17  ;;  %v4986_v31 = vadd.f32 %v4985_v27, %v4943_v32  ;;  %v4945_v40 = vadd.f32 %v4944_v33, %v4902_v16 }
 0x373   : > { %v4946_v56 = vpop.f32.mrf.mxu0 }
 0x374   : > { %v5015_v47 = vadd.f32 %v5005_v30, %v4995_v63  ;;  %v5006_v57 = vmul.f32 %v4986_v31, %v4986_v31  ;;  %v4988_v5 = vadd.f32 %v4987_v18, %v4945_v40  ;;  %v4947_v23 = vadd.f32 %v4946_v56, %v4904_v19  ;;  %v4989_v36 = vpop.f32.mrf.mxu1 }
 0x376   : > { %7501 = vrsqrt.f32 %v5015_v47  ;;  %v5016_v35 = vadd.f32 %v5006_v57, %v4996_v44  ;;  %v5010_v37 = vmul.f32 %v4988_v5, %v4988_v5  ;;  %v4990_v62 = vadd.f32 %v4989_v36, %v4947_v23 }
 0x377   : > { %vm5045_vm13 = vcmp.eq.f32.partialorder %v5015_v47, inf  ;;  %vm5047_vm14 = vcmp.eq.f32.partialorder %v5015_v47, 0.0  ;;  %v5048_v28 = vand.u32 2147483648, %v5015_v47 }
 0x378   : > { %7503 = vrsqrt.f32 %v5016_v35  ;;  %v5020_v38 = vadd.f32 %v5010_v37, %v5000_v24  ;;  %v5011_v45 = vmul.f32 %v4990_v62, %v4990_v62  ;;  %vm5052_vm0 = vcmp.eq.f32.partialorder %v5016_v35, inf }
 0x379   : > { %v5055_v59 = vand.u32 2147483648, %v5016_v35  ;;  %vm5054_vm3 = vcmp.eq.f32.partialorder %v5016_v35, 0.0 }
 0x37a   : > { %7505 = vrsqrt.f32 %v5020_v38  ;;  %v5021_v52 = vadd.f32 %v5011_v45, %v5001_v26  ;;  %vm5080_vm15 = vcmp.eq.f32.partialorder %v5020_v38, inf  ;;  %v5083_v49 = vand.u32 2147483648, %v5020_v38 }
 0x37b   : > { %vm5082_vm1 = vcmp.eq.f32.partialorder %v5020_v38, 0.0 }
 0x37c   : > { %7507 = vrsqrt.f32 %v5021_v52  ;;  %vm5087_vm2 = vcmp.eq.f32.partialorder %v5021_v52, inf  ;;  %v5090_v13 = vand.u32 2147483648, %v5021_v52  ;;  %vm5089_vm4 = vcmp.eq.f32.partialorder %v5021_v52, 0.0 }
 0x383   : > { %v7502_v4 = vpop.eup %7501 }
 0x384   : > { %v5044_v39 = vmul.f32 %v7502_v4, %v5015_v47 }
 0x385   : > { %v7504_v50 = vpop.eup %7503 }
 0x386   : > { %v5051_v51 = vmul.f32 %v7504_v50, %v5016_v35  ;;  %v5046_v55 = vsel %vm5045_vm13, %v5015_v47, %v5044_v39 }
 0x387   : > { %v7506_v12 = vpop.eup %7505  ;;  %v5049_v8 = vsel %vm5047_vm14, %v5048_v28, %v5046_v55 }
 0x388   : > { %v5079_v22 = vmul.f32 %v7506_v12, %v5020_v38  ;;  %v5053_v34 = vsel %vm5052_vm0, %v5016_v35, %v5051_v51 }
 0x389   : > { %v7508_v48 = vpop.eup %7507  ;;  %v5056_v42 = vsel %vm5054_vm3, %v5055_v59, %v5053_v34 }
 0x38a   : > { %v5081_v58 = vsel %vm5080_vm15, %v5020_v38, %v5079_v22  ;;  %v5086_v53 = vmul.f32 %v7508_v48, %v5021_v52 }
 0x38b   : > { %v5084_v20 = vsel %vm5082_vm1, %v5083_v49, %v5081_v58 }
 0x38c   : > { %v5095_v21 = vpack.c.bf16 %v5084_v20, %v5049_v8  ;;  %v5088_v41 = vsel %vm5087_vm2, %v5021_v52, %v5086_v53 }
 0x38d   : > { %v5091_v61 = vsel %vm5089_vm4, %v5090_v13, %v5088_v41 }
 0x38e   : > { %5490 = vmatprep.mubr.bf16.mxu1 %v5095_v21  ;;  %v5096_v46 = vpack.c.bf16 %v5091_v61, %v5056_v42 }
 0x38f   : > { %5491 = vmatmul.mubr.bf16.vlgmr.msra.gmra.mxu1 %v5094_v54 }
 0x390   : > { %6435 = vmatmul.mubr.bf16.vlgmr.msra.gmra.mxu0 %v5096_v46 }
 0x3cf   : > { %v6381_v0 = vpop.f32.mrf.mxu0 }
 0x3d1   : > { %v6382_v1 = vpop.f32.mrf.mxu0 }
 0x3d2   : > { %v6383_v6 = vadd.f32 %v6382_v1, %v6381_v0 }
 0x3d3   : > { %v6384_v29 = vpop.f32.mrf.mxu0 }
 0x3d5   : > { %v6385_v2 = vpop.f32.mrf.mxu0 }
 0x3d6   : > { %v6386_v16 = vadd.f32 %v6385_v2, %v6384_v29 }
 0x44f   : > { %v6403_v43 = vpop.f32.mrf.mxu1 }
 0x450   : > { %v5533_v3 = vpop.f32.mrf.mxu0 }
 0x451   : > { %v6404_v60 = vpop.f32.mrf.mxu1 }
 0x452   : > { %v6405_v7 = vadd.f32 %v6404_v60, %v6403_v43  ;;  %v6436_v10 = vpop.f32.mrf.mxu0 }
 0x453   : > { %v6406_v11 = vpop.f32.mrf.mxu1 }
 0x454   : > { %v5493_v14 = vadd.f32 %v6405_v7, %v6383_v6  ;;  %v5536_v15 = vpop.f32.mrf.mxu0 }
 0x455   : > { %v6407_v27 = vpop.f32.mrf.mxu1 }
 0x456   : > { %v5534_v17 = vadd.f32 %v5533_v3, %v5493_v14  ;;  %v6408_v9 = vadd.f32 %v6407_v27, %v6406_v11  ;;  %v6437_v25 = vpop.f32.mrf.mxu0 }
 0x458   : > { %v5540_v54 = vmax.f32 %v5534_v17, 1e-05  ;;  %v5496_v32 = vadd.f32 %v6408_v9, %v6386_v16 }
 0x45a   : > { %7509 = vlog2.f32 %v5540_v54  ;;  %v5537_v63 = vadd.f32 %v5536_v15, %v5496_v32 }
 0x45c   : > { %v5541_v33 = vmax.f32 %v5537_v63, 1e-05 }
 0x45e   : > { %7511 = vlog2.f32 %v5541_v33 }
 0x467   : > { %v7510_v18 = vpop.eup %7509 }
 0x468   : > { %v5543_v19 = vmul.f32 0.6931472, %v7510_v18 }
 0x46a   : > { %5546 = vst [vmem:[%s241_s18] sm:$0xff] %v5543_v19 }
 0x46b   : > { %v7512_v30 = vpop.eup %7511 }
 0x46c   : > { %v5545_v31 = vmul.f32 0.6931472, %v7512_v30 }
 0x46e   : > { %5547 = vst [vmem:[%s241_s18 + $0x8] sm:$0xff] %v5545_v31 }
 0x46f PF: > { %s15_s14 = sadd.s32 1, %s7595_s14   ;;  %s7972_s12 = smov %s7591_s13 }
 0x470   : > { %p12_p4 = scmp.ge.s32.totalorder %s15_s14, 4   ;;  %s7973_s13 = smov %s7975_s16 }
 0x472   :  { %14 = sbr.rel (!%p12_p4) target bundleno = 3 (0x3), region = 71 }
 0x477   :  { %5578 = vsyncpa [#allocation3], 1 }
 0x478   :  { %5580 = vsyncpa [#allocation3 + $0x1], 1 }
 0x479   :  { %5581 = vsyncpa [#allocation5], 1 }

</bundles_post_ra>
